<compile_context>
chip_gen: v5e
topology: v5e:2x2
jax: 0.10.0
libtpu: 0.0.40
codegen_flags: <defaults>
</compile_context>

<pallas_src>
import jax
import jax.numpy as jnp
from jax.experimental import pallas as pl
from jax.experimental.pallas import tpu as pltpu

LANE = 128
SUBLANE = 8


def _rup(v, m):
    return ((v + m - 1) // m) * m


def _device_kind():
    try:
        return jax.devices()[0].device_kind
    except Exception:
        return ""


def make_hypernet_kernel(n_hidden, ew_dtype):
    """n_hidden = depth + 1 hidden (Linear+ReLU) layers; the final Linear is split.

    ew_dtype: dtype for elementwise work (bias add / ReLU / per-sample products).
    Every MXU matmul uses bf16 operands with f32 accumulation.
    """

    def kernel(*refs):
        x_ref, y_ref = refs[0], refs[1]
        hidden_refs = refs[2:2 + 2 * n_hidden]
        (wf1_ref, bf1_ref, wf2_ref, bf2_ref,
         yrep_ref, s1_ref, s2_ref, out_ref) = refs[2 + 2 * n_hidden:]

        # ---- netF MLP: Linear+ReLU stack (bf16 MXU operands, f32 accumulation) ----
        hb = x_ref[...].astype(jnp.bfloat16)
        for li in range(n_hidden):
            W = hidden_refs[2 * li][...]          # bf16 (in_pad, hid_pad), 128-lane dense
            b = hidden_refs[2 * li + 1][...]      # ew   (1, hid_pad)
            h = jnp.dot(hb, W, preferred_element_type=jnp.float32).astype(ew_dtype) + b
            hb = jnp.maximum(h, 0).astype(jnp.bfloat16)

        # ---- final Linear, split into the two lane-padded halves ----
        w1 = jnp.dot(hb, wf1_ref[...],
                     preferred_element_type=jnp.float32).astype(ew_dtype) + bf1_ref[...]
        w2 = jnp.dot(hb, wf2_ref[...],
                     preferred_element_type=jnp.float32).astype(ew_dtype) + bf2_ref[...]

        # ---- in-kernel y replication via a constant 0/1 matrix on the MXU ----
        # yrep[b, i*in2 + j] = y[b, j]   (exact: 0/1 selector, f32 accumulation)
        y_rep = jnp.dot(y_ref[...].astype(jnp.bfloat16), yrep_ref[...],
                        preferred_element_type=jnp.float32).astype(ew_dtype)

        # ---- bmm 1: h1[b,i] = relu(sum_j w1[b, i*in2 + j] * y[b, j]) ----
        prod1 = w1 * y_rep                                           # VPU, full-lane
        # column-tiled selector: MXU output is h1 already replicated x output_dim
        # (ReLU commutes with column replication)
        h1rep = jnp.maximum(
            jnp.dot(prod1.astype(jnp.bfloat16), s1_ref[...],
                    preferred_element_type=jnp.float32), 0.0).astype(ew_dtype)

        # ---- bmm 2: out[b,o] = sum_k w2[b, o*10 + k] * h1[b, k] ----
        prod2 = w2 * h1rep                                           # VPU, full-lane
        # s2 is zero-padded to 128 columns -> full-width, unmasked lane-dense store
        out_ref[...] = jnp.dot(prod2.astype(jnp.bfloat16), s2_ref[...],
                               preferred_element_type=jnp.float32)

    return kernel


def _pick_bt(B, device_kind):
    """Per-generation batch-tile choice (see perf review)."""
    B8 = _rup(B, SUBLANE)
    dk = device_kind.lower()
    if "v7" in dk or "7x" in dk:
        # keep >= 2 parallel grid steps so both v7x TensorCores get work
        if B8 < 2 * SUBLANE:
            return B8
        return min(_rup(-(-B8 // 2), SUBLANE), 1024)
    # single TensorCore (v5e / v6e): one big block; cap so in-kernel intermediates
    # (~4 KiB per row of f32 temporaries) stay well inside the scoped-VMEM default.
    return min(B8, 2048)


def hypernet_forward(x, y, params, *, input_dim2, output_dim, bt=None,
                     elementwise_bf16=None):
    """params = [(W0,b0), ..., (Wd,bd), (Wf,bf)]; W is (in, out), b is (1, out)."""
    B, input_dim1 = x.shape
    assert y.shape == (B, input_dim2)
    split = input_dim2 * 10
    w2w = 10 * output_dim
    n_hidden = len(params) - 1

    kind = _device_kind()
    if elementwise_bf16 is None:
        dk = kind.lower()
        # v6e / v7x VPU has bf16 VALUs; v5e (and older) must stay f32 elementwise.
        elementwise_bf16 = ("v6" in dk) or ("v7" in dk) or ("7x" in dk)
    ew = jnp.bfloat16 if elementwise_bf16 else jnp.float32

    split_pad = _rup(split, LANE)       # e.g. 160 -> 256
    w2_pad = _rup(w2w, LANE)            # e.g. 120 -> 128
    out_pad = _rup(output_dim, LANE)    # e.g.  12 -> 128

    # -- batch tiling (sublane-aligned; remainder handled by zero-padding) --
    if bt is None:
        bt = _pick_bt(B, kind)
    bt = max(SUBLANE, _rup(min(bt, _rup(B, SUBLANE)), SUBLANE))
    Bp = _rup(B, bt)                    # multiple of bt (hence of 8)

    x_p, y_p = x, y
    if Bp != B:
        x_p = jnp.pad(x_p, ((0, Bp - B), (0, 0)))
        y_p = jnp.pad(y_p, ((0, Bp - B), (0, 0)))

    # -- hidden Linear weights: bf16 MXU operands, output width padded to 128 lanes --
    flat_hidden = []
    row_pad = 0                         # zero rows added to the previous layer's output
    for (W, b) in params[:-1]:
        dout = W.shape[1]
        dout_pad = _rup(dout, LANE)
        Wp = jnp.pad(W.astype(jnp.bfloat16), ((0, row_pad), (0, dout_pad - dout)))
        bp = jnp.pad(b.astype(ew), ((0, 0), (0, dout_pad - dout)))
        flat_hidden += [Wp, bp]
        row_pad = dout_pad - dout

    # -- final Linear split into lane-padded halves --
    Wf, bf = params[-1]
    Wf = jnp.pad(Wf.astype(jnp.bfloat16), ((0, row_pad), (0, 0)))
    Wf1 = jnp.pad(Wf[:, :split], ((0, 0), (0, split_pad - split)))
    Wf2 = jnp.pad(Wf[:, split:], ((0, 0), (0, w2_pad - w2w)))
    bf1 = jnp.pad(bf[:, :split].astype(ew), ((0, 0), (0, split_pad - split)))
    bf2 = jnp.pad(bf[:, split:].astype(ew), ((0, 0), (0, w2_pad - w2w)))

    # -- constant 0/1 matrices (bf16 is exact for 0/1) --
    cols1 = jnp.arange(split)
    # y replication: yrep[b, i*in2 + j] = y[b, j]
    yrep_sel = (jnp.arange(input_dim2)[:, None] == (cols1[None, :] % input_dim2))
    yrep_sel = jnp.pad(yrep_sel.astype(jnp.bfloat16),
                       ((0, 0), (0, split_pad - split)))             # (in2, split_pad)
    # bmm-1 selector, column-tiled x output_dim: h1rep[b, o*10 + i] = h1[b, i]
    s1 = (cols1[:, None] // input_dim2 == jnp.arange(10)[None, :])   # (split, 10)
    s1_rep = jnp.tile(s1, (1, output_dim)).astype(jnp.bfloat16)      # (split, 10*out)
    s1_rep = jnp.pad(s1_rep, ((0, split_pad - split), (0, w2_pad - w2w)))
    # bmm-2 selector, zero-padded to a lane-dense 128-wide output slab
    rows2 = jnp.arange(w2w)
    s2 = (rows2[:, None] // 10 == jnp.arange(output_dim)[None, :]).astype(jnp.bfloat16)
    s2_pad = jnp.pad(s2, ((0, w2_pad - w2w), (0, out_pad - output_dim)))

    consts = flat_hidden + [Wf1, bf1, Wf2, bf2, yrep_sel, s1_rep, s2_pad]
    kernel = make_hypernet_kernel(n_hidden, ew)

    def _call(single_buffer_consts):
        def const_spec(a):
            if single_buffer_consts:
                # resident across the whole grid -> single buffer
                # (half the constant VMEM footprint, no duplicated prologue DMA)
                return pl.BlockSpec(a.shape, lambda i: (0, 0),
                                    pipeline_mode=pl.Buffered(1))
            return pl.BlockSpec(a.shape, lambda i: (0, 0))

        in_specs = [pl.BlockSpec((bt, input_dim1), lambda i: (i, 0)),
                    pl.BlockSpec((bt, input_dim2), lambda i: (i, 0))]
        in_specs += [const_spec(a) for a in consts]

        return pl.pallas_call(
            kernel,
            out_shape=jax.ShapeDtypeStruct((Bp, out_pad), jnp.float32),
            grid=(Bp // bt,),
            in_specs=in_specs,
            out_specs=pl.BlockSpec((bt, out_pad), lambda i: (i, 0)),
            compiler_params=pltpu.CompilerParams(
                dimension_semantics=("parallel",)),
        )(x_p, y_p, *consts)

    try:
        out = _call(True)
    except Exception:
        # pl.Buffered(1) not accepted by this JAX version -> default double-buffering
        out = _call(False)

    return out[:B, :output_dim]


def hypernet_reference(x, y, params, input_dim2, output_dim):
    """Pure-JAX f32 reference mirroring the PyTorch forward exactly (act = ReLU)."""
    h = x
    for li, (W, b) in enumerate(params):
        h = h @ W + b
        if li < len(params) - 1:
            h = jnp.maximum(h, 0.0)
    B = x.shape[0]
    w1 = h[:, : input_dim2 * 10].reshape(B, 10, input_dim2)
    w2 = h[:, input_dim2 * 10:].reshape(B, output_dim, 10)  # .view(-1, out, 10) in torch
    h1 = jnp.maximum(jnp.einsum("bij,bj->bi", w1, y), 0.0)
    return jnp.einsum("bok,bk->bo", w2, h1)


if __name__ == "__main__":
    # task='rotations' -> output_dim=12, act=ReLU.
    B = 256
    input_dim1 = 32
    input_dim2 = 16
    hidden_dim = 32
    depth = 1
    output_dim = 12
    D = input_dim2 * 10 + 10 * output_dim  # 280

    key = jax.random.PRNGKey(0)
    keys = jax.random.split(key, 16)

    # Deterministic synthetic parameters (not a checkpoint).
    dims = [input_dim1] + [hidden_dim] * (depth + 1) + [D]
    params = []
    ki = 0
    for li in range(len(dims) - 1):
        W = 0.1 * jax.random.normal(keys[ki], (dims[li], dims[li + 1]), jnp.float32)
        b = 0.1 * jax.random.normal(keys[ki + 1], (1, dims[li + 1]), jnp.float32)
        params.append((W, b))
        ki += 2

    x = jax.random.normal(keys[ki], (B, input_dim1), jnp.float32)
    y = jax.random.normal(keys[ki + 1], (B, input_dim2), jnp.float32)

    out = hypernet_forward(x, y, params,
                           input_dim2=input_dim2, output_dim=output_dim)
    out = jax.block_until_ready(out)

    ref = hypernet_reference(x, y, params, input_dim2, output_dim)
    assert out.shape == (B, output_dim)
    # bf16 MXU operands (f32 accumulation) + bf16 elementwise on v6e/v7x vs a pure-f32
    # reference -> ~1-2% relative error, well inside the tolerance below.
    assert jnp.allclose(out, ref, atol=5e-2, rtol=5e-2), "mismatch vs reference"

    print("KERNEL_OK")
</pallas_src>

<mosaic_0001>
module attributes {stable_mosaic.version = 11 : i64} {
  func.func @kernel(%arg0: i32, %arg1: memref<256x32xf32, #tpu.memory_space<vmem>>, %arg2: memref<256x16xf32, #tpu.memory_space<vmem>>, %arg3: memref<32x128xbf16, #tpu.memory_space<vmem>>, %arg4: memref<1x128xf32, #tpu.memory_space<vmem>>, %arg5: memref<128x128xbf16, #tpu.memory_space<vmem>>, %arg6: memref<1x128xf32, #tpu.memory_space<vmem>>, %arg7: memref<128x256xbf16, #tpu.memory_space<vmem>>, %arg8: memref<1x256xf32, #tpu.memory_space<vmem>>, %arg9: memref<128x128xbf16, #tpu.memory_space<vmem>>, %arg10: memref<1x128xf32, #tpu.memory_space<vmem>>, %arg11: memref<16x256xbf16, #tpu.memory_space<vmem>>, %arg12: memref<256x128xbf16, #tpu.memory_space<vmem>>, %arg13: memref<128x128xbf16, #tpu.memory_space<vmem>>, %arg14: memref<256x128xf32, #tpu.memory_space<vmem>>) attributes {dimension_semantics = [#tpu.dimension_semantics<parallel>], iteration_bounds = array<i64: 1>, scalar_prefetch = 0 : i64, scratch_operands = 0 : i64, tpu.core_type = #tpu.core_type<tc>, window_params = [{transform_indices = @transform_0, window_bounds = array<i64: 256, 32>}, {transform_indices = @transform_1, window_bounds = array<i64: 256, 16>}, {pipeline_mode = #tpu.pipeline_mode<synchronous>, transform_indices = @transform_2, window_bounds = array<i64: 32, 128>}, {pipeline_mode = #tpu.pipeline_mode<synchronous>, transform_indices = @transform_3, window_bounds = array<i64: 1, 128>}, {pipeline_mode = #tpu.pipeline_mode<synchronous>, transform_indices = @transform_4, window_bounds = array<i64: 128, 128>}, {pipeline_mode = #tpu.pipeline_mode<synchronous>, transform_indices = @transform_5, window_bounds = array<i64: 1, 128>}, {pipeline_mode = #tpu.pipeline_mode<synchronous>, transform_indices = @transform_6, window_bounds = array<i64: 128, 256>}, {pipeline_mode = #tpu.pipeline_mode<synchronous>, transform_indices = @transform_7, window_bounds = array<i64: 1, 256>}, {pipeline_mode = #tpu.pipeline_mode<synchronous>, transform_indices = @transform_8, window_bounds = array<i64: 128, 128>}, {pipeline_mode = #tpu.pipeline_mode<synchronous>, transform_indices = @transform_9, window_bounds = array<i64: 1, 128>}, {pipeline_mode = #tpu.pipeline_mode<synchronous>, transform_indices = @transform_10, window_bounds = array<i64: 16, 256>}, {pipeline_mode = #tpu.pipeline_mode<synchronous>, transform_indices = @transform_11, window_bounds = array<i64: 256, 128>}, {pipeline_mode = #tpu.pipeline_mode<synchronous>, transform_indices = @transform_12, window_bounds = array<i64: 128, 128>}, {transform_indices = @transform_13, window_bounds = array<i64: 256, 128>}]} {
    %c0 = arith.constant 0 : index
    %c0_0 = arith.constant 0 : index
    %0 = vector.load %arg1[%c0, %c0_0] : memref<256x32xf32, #tpu.memory_space<vmem>>, vector<256x32xf32>
    %1 = arith.truncf %0 : vector<256x32xf32> to vector<256x32xbf16>
    %c0_1 = arith.constant 0 : index
    %c0_2 = arith.constant 0 : index
    %2 = vector.load %arg3[%c0_1, %c0_2] : memref<32x128xbf16, #tpu.memory_space<vmem>>, vector<32x128xbf16>
    %c0_3 = arith.constant 0 : index
    %c0_4 = arith.constant 0 : index
    %3 = vector.load %arg4[%c0_3, %c0_4] : memref<1x128xf32, #tpu.memory_space<vmem>>, vector<1x128xf32>
    %cst = arith.constant dense<0.000000e+00> : vector<256x128xf32>
    %4 = tpu.matmul %1, %2, %cst {dimension_numbers = #tpu.dot_dimension_numbers<[1], [0], [0], [1], [0, 0, 1, 1], [], []>} : vector<256x32xbf16>, vector<32x128xbf16>, vector<256x128xf32> -> vector<256x128xf32>
    %5 = vector.broadcast %3 : vector<1x128xf32> to vector<256x128xf32>
    %6 = arith.addf %4, %5 : vector<256x128xf32>
    %cst_5 = arith.constant 0.000000e+00 : f32
    %7 = vector.broadcast %cst_5 : f32 to vector<256x128xf32>
    %8 = arith.maximumf %6, %7 : vector<256x128xf32>
    %9 = arith.truncf %8 : vector<256x128xf32> to vector<256x128xbf16>
    %c0_6 = arith.constant 0 : index
    %c0_7 = arith.constant 0 : index
    %10 = vector.load %arg5[%c0_6, %c0_7] : memref<128x128xbf16, #tpu.memory_space<vmem>>, vector<128x128xbf16>
    %c0_8 = arith.constant 0 : index
    %c0_9 = arith.constant 0 : index
    %11 = vector.load %arg6[%c0_8, %c0_9] : memref<1x128xf32, #tpu.memory_space<vmem>>, vector<1x128xf32>
    %cst_10 = arith.constant dense<0.000000e+00> : vector<256x128xf32>
    %12 = tpu.matmul %9, %10, %cst_10 {dimension_numbers = #tpu.dot_dimension_numbers<[1], [0], [0], [1], [0, 0, 1, 1], [], []>} : vector<256x128xbf16>, vector<128x128xbf16>, vector<256x128xf32> -> vector<256x128xf32>
    %13 = vector.broadcast %11 : vector<1x128xf32> to vector<256x128xf32>
    %14 = arith.addf %12, %13 : vector<256x128xf32>
    %cst_11 = arith.constant 0.000000e+00 : f32
    %15 = vector.broadcast %cst_11 : f32 to vector<256x128xf32>
    %16 = arith.maximumf %14, %15 : vector<256x128xf32>
    %17 = arith.truncf %16 : vector<256x128xf32> to vector<256x128xbf16>
    %c0_12 = arith.constant 0 : index
    %c0_13 = arith.constant 0 : index
    %18 = vector.load %arg7[%c0_12, %c0_13] : memref<128x256xbf16, #tpu.memory_space<vmem>>, vector<128x256xbf16>
    %cst_14 = arith.constant dense<0.000000e+00> : vector<256x256xf32>
    %19 = tpu.matmul %17, %18, %cst_14 {dimension_numbers = #tpu.dot_dimension_numbers<[1], [0], [0], [1], [0, 0, 1, 1], [], []>} : vector<256x128xbf16>, vector<128x256xbf16>, vector<256x256xf32> -> vector<256x256xf32>
    %c0_15 = arith.constant 0 : index
    %c0_16 = arith.constant 0 : index
    %20 = vector.load %arg8[%c0_15, %c0_16] : memref<1x256xf32, #tpu.memory_space<vmem>>, vector<1x256xf32>
    %21 = vector.broadcast %20 : vector<1x256xf32> to vector<256x256xf32>
    %22 = arith.addf %19, %21 : vector<256x256xf32>
    %c0_17 = arith.constant 0 : index
    %c0_18 = arith.constant 0 : index
    %23 = vector.load %arg9[%c0_17, %c0_18] : memref<128x128xbf16, #tpu.memory_space<vmem>>, vector<128x128xbf16>
    %cst_19 = arith.constant dense<0.000000e+00> : vector<256x128xf32>
    %24 = tpu.matmul %17, %23, %cst_19 {dimension_numbers = #tpu.dot_dimension_numbers<[1], [0], [0], [1], [0, 0, 1, 1], [], []>} : vector<256x128xbf16>, vector<128x128xbf16>, vector<256x128xf32> -> vector<256x128xf32>
    %c0_20 = arith.constant 0 : index
    %c0_21 = arith.constant 0 : index
    %25 = vector.load %arg10[%c0_20, %c0_21] : memref<1x128xf32, #tpu.memory_space<vmem>>, vector<1x128xf32>
    %26 = vector.broadcast %25 : vector<1x128xf32> to vector<256x128xf32>
    %27 = arith.addf %24, %26 : vector<256x128xf32>
    %c0_22 = arith.constant 0 : index
    %c0_23 = arith.constant 0 : index
    %28 = vector.load %arg2[%c0_22, %c0_23] : memref<256x16xf32, #tpu.memory_space<vmem>>, vector<256x16xf32>
    %29 = arith.truncf %28 : vector<256x16xf32> to vector<256x16xbf16>
    %c0_24 = arith.constant 0 : index
    %c0_25 = arith.constant 0 : index
    %30 = vector.load %arg11[%c0_24, %c0_25] : memref<16x256xbf16, #tpu.memory_space<vmem>>, vector<16x256xbf16>
    %cst_26 = arith.constant dense<0.000000e+00> : vector<256x256xf32>
    %31 = tpu.matmul %29, %30, %cst_26 {dimension_numbers = #tpu.dot_dimension_numbers<[1], [0], [0], [1], [0, 0, 1, 1], [], []>} : vector<256x16xbf16>, vector<16x256xbf16>, vector<256x256xf32> -> vector<256x256xf32>
    %32 = arith.mulf %22, %31 : vector<256x256xf32>
    %33 = arith.truncf %32 : vector<256x256xf32> to vector<256x256xbf16>
    %c0_27 = arith.constant 0 : index
    %c0_28 = arith.constant 0 : index
    %34 = vector.load %arg12[%c0_27, %c0_28] : memref<256x128xbf16, #tpu.memory_space<vmem>>, vector<256x128xbf16>
    %cst_29 = arith.constant dense<0.000000e+00> : vector<256x128xf32>
    %35 = tpu.matmul %33, %34, %cst_29 {dimension_numbers = #tpu.dot_dimension_numbers<[1], [0], [0], [1], [0, 0, 1, 1], [], []>} : vector<256x256xbf16>, vector<256x128xbf16>, vector<256x128xf32> -> vector<256x128xf32>
    %cst_30 = arith.constant 0.000000e+00 : f32
    %36 = vector.broadcast %cst_30 : f32 to vector<256x128xf32>
    %37 = arith.maximumf %35, %36 : vector<256x128xf32>
    %38 = arith.mulf %27, %37 : vector<256x128xf32>
    %39 = arith.truncf %38 : vector<256x128xf32> to vector<256x128xbf16>
    %c0_31 = arith.constant 0 : index
    %c0_32 = arith.constant 0 : index
    %40 = vector.load %arg13[%c0_31, %c0_32] : memref<128x128xbf16, #tpu.memory_space<vmem>>, vector<128x128xbf16>
    %cst_33 = arith.constant dense<0.000000e+00> : vector<256x128xf32>
    %41 = tpu.matmul %39, %40, %cst_33 {dimension_numbers = #tpu.dot_dimension_numbers<[1], [0], [0], [1], [0, 0, 1, 1], [], []>} : vector<256x128xbf16>, vector<128x128xbf16>, vector<256x128xf32> -> vector<256x128xf32>
    %c0_34 = arith.constant 0 : index
    %c0_35 = arith.constant 0 : index
    %42 = vector.load %arg14[%c0_34, %c0_35] : memref<256x128xf32, #tpu.memory_space<vmem>>, vector<256x128xf32>
    tpu.vector_store %arg14[%c0_34, %c0_35], %41 {strides = array<i32>} : memref<256x128xf32, #tpu.memory_space<vmem>>, vector<256x128xf32>,
    return
  }
  func.func @transform_0(%arg0: i32) -> (i32, i32) {
    %c0_i32 = arith.constant 0 : i32
    %c0_i32_0 = arith.constant 0 : i32
    return %arg0, %c0_i32 : i32, i32
  }
  func.func @transform_1(%arg0: i32) -> (i32, i32) {
    %c0_i32 = arith.constant 0 : i32
    %c0_i32_0 = arith.constant 0 : i32
    return %arg0, %c0_i32 : i32, i32
  }
  func.func @transform_2(%arg0: i32) -> (i32, i32) {
    %c0_i32 = arith.constant 0 : i32
    %c0_i32_0 = arith.constant 0 : i32
    %c0_i32_1 = arith.constant 0 : i32
    return %c0_i32, %c0_i32_0 : i32, i32
  }
  func.func @transform_3(%arg0: i32) -> (i32, i32) {
    %c0_i32 = arith.constant 0 : i32
    %c0_i32_0 = arith.constant 0 : i32
    %c0_i32_1 = arith.constant 0 : i32
    return %c0_i32, %c0_i32_0 : i32, i32
  }
  func.func @transform_4(%arg0: i32) -> (i32, i32) {
    %c0_i32 = arith.constant 0 : i32
    %c0_i32_0 = arith.constant 0 : i32
    %c0_i32_1 = arith.constant 0 : i32
    return %c0_i32, %c0_i32_0 : i32, i32
  }
  func.func @transform_5(%arg0: i32) -> (i32, i32) {
    %c0_i32 = arith.constant 0 : i32
    %c0_i32_0 = arith.constant 0 : i32
    %c0_i32_1 = arith.constant 0 : i32
    return %c0_i32, %c0_i32_0 : i32, i32
  }
  func.func @transform_6(%arg0: i32) -> (i32, i32) {
    %c0_i32 = arith.constant 0 : i32
    %c0_i32_0 = arith.constant 0 : i32
    %c0_i32_1 = arith.constant 0 : i32
    return %c0_i32, %c0_i32_0 : i32, i32
  }
  func.func @transform_7(%arg0: i32) -> (i32, i32) {
    %c0_i32 = arith.constant 0 : i32
    %c0_i32_0 = arith.constant 0 : i32
    %c0_i32_1 = arith.constant 0 : i32
    return %c0_i32, %c0_i32_0 : i32, i32
  }
  func.func @transform_8(%arg0: i32) -> (i32, i32) {
    %c0_i32 = arith.constant 0 : i32
    %c0_i32_0 = arith.constant 0 : i32
    %c0_i32_1 = arith.constant 0 : i32
    return %c0_i32, %c0_i32_0 : i32, i32
  }
  func.func @transform_9(%arg0: i32) -> (i32, i32) {
    %c0_i32 = arith.constant 0 : i32
    %c0_i32_0 = arith.constant 0 : i32
    %c0_i32_1 = arith.constant 0 : i32
    return %c0_i32, %c0_i32_0 : i32, i32
  }
  func.func @transform_10(%arg0: i32) -> (i32, i32) {
    %c0_i32 = arith.constant 0 : i32
    %c0_i32_0 = arith.constant 0 : i32
    %c0_i32_1 = arith.constant 0 : i32
    return %c0_i32, %c0_i32_0 : i32, i32
  }
  func.func @transform_11(%arg0: i32) -> (i32, i32) {
    %c0_i32 = arith.constant 0 : i32
    %c0_i32_0 = arith.constant 0 : i32
    %c0_i32_1 = arith.constant 0 : i32
    return %c0_i32, %c0_i32_0 : i32, i32
  }
  func.func @transform_12(%arg0: i32) -> (i32, i32) {
    %c0_i32 = arith.constant 0 : i32
    %c0_i32_0 = arith.constant 0 : i32
    %c0_i32_1 = arith.constant 0 : i32
    return %c0_i32, %c0_i32_0 : i32, i32
  }
  func.func @transform_13(%arg0: i32) -> (i32, i32) {
    %c0_i32 = arith.constant 0 : i32
    %c0_i32_0 = arith.constant 0 : i32
    return %arg0, %c0_i32 : i32, i32
  }
}

module attributes {stable_mosaic.version = 11 : i64} {
  func.func @kernel(%arg0: i32, %arg1: memref<256x32xf32, #tpu.memory_space<vmem>>, %arg2: memref<256x16xf32, #tpu.memory_space<vmem>>, %arg3: memref<32x128xbf16, #tpu.memory_space<vmem>>, %arg4: memref<1x128xf32, #tpu.memory_space<vmem>>, %arg5: memref<128x128xbf16, #tpu.memory_space<vmem>>, %arg6: memref<1x128xf32, #tpu.memory_space<vmem>>, %arg7: memref<128x256xbf16, #tpu.memory_space<vmem>>, %arg8: memref<1x256xf32, #tpu.memory_space<vmem>>, %arg9: memref<128x128xbf16, #tpu.memory_space<vmem>>, %arg10: memref<1x128xf32, #tpu.memory_space<vmem>>, %arg11: memref<16x256xbf16, #tpu.memory_space<vmem>>, %arg12: memref<256x128xbf16, #tpu.memory_space<vmem>>, %arg13: memref<128x128xbf16, #tpu.memory_space<vmem>>, %arg14: memref<256x128xf32, #tpu.memory_space<vmem>>) attributes {dimension_semantics = [#tpu.dimension_semantics<parallel>], iteration_bounds = array<i64: 1>, scalar_prefetch = 0 : i64, scratch_operands = 0 : i64, tpu.core_type = #tpu.core_type<tc>, window_params = [{transform_indices = @transform_0, window_bounds = array<i64: 256, 32>}, {transform_indices = @transform_1, window_bounds = array<i64: 256, 16>}, {pipeline_mode = #tpu.pipeline_mode<synchronous>, transform_indices = @transform_2, window_bounds = array<i64: 32, 128>}, {pipeline_mode = #tpu.pipeline_mode<synchronous>, transform_indices = @transform_3, window_bounds = array<i64: 1, 128>}, {pipeline_mode = #tpu.pipeline_mode<synchronous>, transform_indices = @transform_4, window_bounds = array<i64: 128, 128>}, {pipeline_mode = #tpu.pipeline_mode<synchronous>, transform_indices = @transform_5, window_bounds = array<i64: 1, 128>}, {pipeline_mode = #tpu.pipeline_mode<synchronous>, transform_indices = @transform_6, window_bounds = array<i64: 128, 256>}, {pipeline_mode = #tpu.pipeline_mode<synchronous>, transform_indices = @transform_7, window_bounds = array<i64: 1, 256>}, {pipeline_mode = #tpu.pipeline_mode<synchronous>, transform_indices = @transform_8, window_bounds = array<i64: 128, 128>}, {pipeline_mode = #tpu.pipeline_mode<synchronous>, transform_indices = @transform_9, window_bounds = array<i64: 1, 128>}, {pipeline_mode = #tpu.pipeline_mode<synchronous>, transform_indices = @transform_10, window_bounds = array<i64: 16, 256>}, {pipeline_mode = #tpu.pipeline_mode<synchronous>, transform_indices = @transform_11, window_bounds = array<i64: 256, 128>}, {pipeline_mode = #tpu.pipeline_mode<synchronous>, transform_indices = @transform_12, window_bounds = array<i64: 128, 128>}, {transform_indices = @transform_13, window_bounds = array<i64: 256, 128>}]} {
    %c0 = arith.constant 0 : index
    %c0_0 = arith.constant 0 : index
    %0 = vector.load %arg1[%c0, %c0_0] : memref<256x32xf32, #tpu.memory_space<vmem>>, vector<256x32xf32>
    %1 = arith.truncf %0 : vector<256x32xf32> to vector<256x32xbf16>
    %c0_1 = arith.constant 0 : index
    %c0_2 = arith.constant 0 : index
    %2 = vector.load %arg3[%c0_1, %c0_2] : memref<32x128xbf16, #tpu.memory_space<vmem>>, vector<32x128xbf16>
    %c0_3 = arith.constant 0 : index
    %c0_4 = arith.constant 0 : index
    %3 = vector.load %arg4[%c0_3, %c0_4] : memref<1x128xf32, #tpu.memory_space<vmem>>, vector<1x128xf32>
    %cst = arith.constant dense<0.000000e+00> : vector<256x128xf32>
    %4 = tpu.matmul %1, %2, %cst {dimension_numbers = #tpu.dot_dimension_numbers<[1], [0], [0], [1], [0, 0, 1, 1], [], []>} : vector<256x32xbf16>, vector<32x128xbf16>, vector<256x128xf32> -> vector<256x128xf32>
    %5 = vector.broadcast %3 : vector<1x128xf32> to vector<256x128xf32>
    %6 = arith.addf %4, %5 : vector<256x128xf32>
    %cst_5 = arith.constant 0.000000e+00 : f32
    %7 = vector.broadcast %cst_5 : f32 to vector<256x128xf32>
    %8 = arith.maximumf %6, %7 : vector<256x128xf32>
    %9 = arith.truncf %8 : vector<256x128xf32> to vector<256x128xbf16>
    %c0_6 = arith.constant 0 : index
    %c0_7 = arith.constant 0 : index
    %10 = vector.load %arg5[%c0_6, %c0_7] : memref<128x128xbf16, #tpu.memory_space<vmem>>, vector<128x128xbf16>
    %c0_8 = arith.constant 0 : index
    %c0_9 = arith.constant 0 : index
    %11 = vector.load %arg6[%c0_8, %c0_9] : memref<1x128xf32, #tpu.memory_space<vmem>>, vector<1x128xf32>
    %cst_10 = arith.constant dense<0.000000e+00> : vector<256x128xf32>
    %12 = tpu.matmul %9, %10, %cst_10 {dimension_numbers = #tpu.dot_dimension_numbers<[1], [0], [0], [1], [0, 0, 1, 1], [], []>} : vector<256x128xbf16>, vector<128x128xbf16>, vector<256x128xf32> -> vector<256x128xf32>
    %13 = vector.broadcast %11 : vector<1x128xf32> to vector<256x128xf32>
    %14 = arith.addf %12, %13 : vector<256x128xf32>
    %cst_11 = arith.constant 0.000000e+00 : f32
    %15 = vector.broadcast %cst_11 : f32 to vector<256x128xf32>
    %16 = arith.maximumf %14, %15 : vector<256x128xf32>
    %17 = arith.truncf %16 : vector<256x128xf32> to vector<256x128xbf16>
    %c0_12 = arith.constant 0 : index
    %c0_13 = arith.constant 0 : index
    %18 = vector.load %arg7[%c0_12, %c0_13] : memref<128x256xbf16, #tpu.memory_space<vmem>>, vector<128x256xbf16>
    %cst_14 = arith.constant dense<0.000000e+00> : vector<256x256xf32>
    %19 = tpu.matmul %17, %18, %cst_14 {dimension_numbers = #tpu.dot_dimension_numbers<[1], [0], [0], [1], [0, 0, 1, 1], [], []>} : vector<256x128xbf16>, vector<128x256xbf16>, vector<256x256xf32> -> vector<256x256xf32>
    %c0_15 = arith.constant 0 : index
    %c0_16 = arith.constant 0 : index
    %20 = vector.load %arg8[%c0_15, %c0_16] : memref<1x256xf32, #tpu.memory_space<vmem>>, vector<1x256xf32>
    %21 = vector.broadcast %20 : vector<1x256xf32> to vector<256x256xf32>
    %22 = arith.addf %19, %21 : vector<256x256xf32>
    %c0_17 = arith.constant 0 : index
    %c0_18 = arith.constant 0 : index
    %23 = vector.load %arg9[%c0_17, %c0_18] : memref<128x128xbf16, #tpu.memory_space<vmem>>, vector<128x128xbf16>
    %cst_19 = arith.constant dense<0.000000e+00> : vector<256x128xf32>
    %24 = tpu.matmul %17, %23, %cst_19 {dimension_numbers = #tpu.dot_dimension_numbers<[1], [0], [0], [1], [0, 0, 1, 1], [], []>} : vector<256x128xbf16>, vector<128x128xbf16>, vector<256x128xf32> -> vector<256x128xf32>
    %c0_20 = arith.constant 0 : index
    %c0_21 = arith.constant 0 : index
    %25 = vector.load %arg10[%c0_20, %c0_21] : memref<1x128xf32, #tpu.memory_space<vmem>>, vector<1x128xf32>
    %26 = vector.broadcast %25 : vector<1x128xf32> to vector<256x128xf32>
    %27 = arith.addf %24, %26 : vector<256x128xf32>
    %c0_22 = arith.constant 0 : index
    %c0_23 = arith.constant 0 : index
    %28 = vector.load %arg2[%c0_22, %c0_23] : memref<256x16xf32, #tpu.memory_space<vmem>>, vector<256x16xf32>
    %29 = arith.truncf %28 : vector<256x16xf32> to vector<256x16xbf16>
    %c0_24 = arith.constant 0 : index
    %c0_25 = arith.constant 0 : index
    %30 = vector.load %arg11[%c0_24, %c0_25] : memref<16x256xbf16, #tpu.memory_space<vmem>>, vector<16x256xbf16>
    %cst_26 = arith.constant dense<0.000000e+00> : vector<256x256xf32>
    %31 = tpu.matmul %29, %30, %cst_26 {dimension_numbers = #tpu.dot_dimension_numbers<[1], [0], [0], [1], [0, 0, 1, 1], [], []>} : vector<256x16xbf16>, vector<16x256xbf16>, vector<256x256xf32> -> vector<256x256xf32>
    %32 = arith.mulf %22, %31 : vector<256x256xf32>
    %33 = arith.truncf %32 : vector<256x256xf32> to vector<256x256xbf16>
    %c0_27 = arith.constant 0 : index
    %c0_28 = arith.constant 0 : index
    %34 = vector.load %arg12[%c0_27, %c0_28] : memref<256x128xbf16, #tpu.memory_space<vmem>>, vector<256x128xbf16>
    %cst_29 = arith.constant dense<0.000000e+00> : vector<256x128xf32>
    %35 = tpu.matmul %33, %34, %cst_29 {dimension_numbers = #tpu.dot_dimension_numbers<[1], [0], [0], [1], [0, 0, 1, 1], [], []>} : vector<256x256xbf16>, vector<256x128xbf16>, vector<256x128xf32> -> vector<256x128xf32>
    %cst_30 = arith.constant 0.000000e+00 : f32
    %36 = vector.broadcast %cst_30 : f32 to vector<256x128xf32>
    %37 = arith.maximumf %35, %36 : vector<256x128xf32>
    %38 = arith.mulf %27, %37 : vector<256x128xf32>
    %39 = arith.truncf %38 : vector<256x128xf32> to vector<256x128xbf16>
    %c0_31 = arith.constant 0 : index
    %c0_32 = arith.constant 0 : index
    %40 = vector.load %arg13[%c0_31, %c0_32] : memref<128x128xbf16, #tpu.memory_space<vmem>>, vector<128x128xbf16>
    %cst_33 = arith.constant dense<0.000000e+00> : vector<256x128xf32>
    %41 = tpu.matmul %39, %40, %cst_33 {dimension_numbers = #tpu.dot_dimension_numbers<[1], [0], [0], [1], [0, 0, 1, 1], [], []>} : vector<256x128xbf16>, vector<128x128xbf16>, vector<256x128xf32> -> vector<256x128xf32>
    %c0_34 = arith.constant 0 : index
    %c0_35 = arith.constant 0 : index
    %42 = vector.load %arg14[%c0_34, %c0_35] : memref<256x128xf32, #tpu.memory_space<vmem>>, vector<256x128xf32>
    tpu.vector_store %arg14[%c0_34, %c0_35], %41 {strides = array<i32>} : memref<256x128xf32, #tpu.memory_space<vmem>>, vector<256x128xf32>,
    return
  }
  func.func @transform_0(%arg0: i32) -> (i32, i32) {
    %c0_i32 = arith.constant 0 : i32
    %c0_i32_0 = arith.constant 0 : i32
    return %arg0, %c0_i32 : i32, i32
  }
  func.func @transform_1(%arg0: i32) -> (i32, i32) {
    %c0_i32 = arith.constant 0 : i32
    %c0_i32_0 = arith.constant 0 : i32
    return %arg0, %c0_i32 : i32, i32
  }
  func.func @transform_2(%arg0: i32) -> (i32, i32) {
    %c0_i32 = arith.constant 0 : i32
    %c0_i32_0 = arith.constant 0 : i32
    %c0_i32_1 = arith.constant 0 : i32
    return %c0_i32, %c0_i32_0 : i32, i32
  }
  func.func @transform_3(%arg0: i32) -> (i32, i32) {
    %c0_i32 = arith.constant 0 : i32
    %c0_i32_0 = arith.constant 0 : i32
    %c0_i32_1 = arith.constant 0 : i32
    return %c0_i32, %c0_i32_0 : i32, i32
  }
  func.func @transform_4(%arg0: i32) -> (i32, i32) {
    %c0_i32 = arith.constant 0 : i32
    %c0_i32_0 = arith.constant 0 : i32
    %c0_i32_1 = arith.constant 0 : i32
    return %c0_i32, %c0_i32_0 : i32, i32
  }
  func.func @transform_5(%arg0: i32) -> (i32, i32) {
    %c0_i32 = arith.constant 0 : i32
    %c0_i32_0 = arith.constant 0 : i32
    %c0_i32_1 = arith.constant 0 : i32
    return %c0_i32, %c0_i32_0 : i32, i32
  }
  func.func @transform_6(%arg0: i32) -> (i32, i32) {
    %c0_i32 = arith.constant 0 : i32
    %c0_i32_0 = arith.constant 0 : i32
    %c0_i32_1 = arith.constant 0 : i32
    return %c0_i32, %c0_i32_0 : i32, i32
  }
  func.func @transform_7(%arg0: i32) -> (i32, i32) {
    %c0_i32 = arith.constant 0 : i32
    %c0_i32_0 = arith.constant 0 : i32
    %c0_i32_1 = arith.constant 0 : i32
    return %c0_i32, %c0_i32_0 : i32, i32
  }
  func.func @transform_8(%arg0: i32) -> (i32, i32) {
    %c0_i32 = arith.constant 0 : i32
    %c0_i32_0 = arith.constant 0 : i32
    %c0_i32_1 = arith.constant 0 : i32
    return %c0_i32, %c0_i32_0 : i32, i32
  }
  func.func @transform_9(%arg0: i32) -> (i32, i32) {
    %c0_i32 = arith.constant 0 : i32
    %c0_i32_0 = arith.constant 0 : i32
    %c0_i32_1 = arith.constant 0 : i32
    return %c0_i32, %c0_i32_0 : i32, i32
  }
  func.func @transform_10(%arg0: i32) -> (i32, i32) {
    %c0_i32 = arith.constant 0 : i32
    %c0_i32_0 = arith.constant 0 : i32
    %c0_i32_1 = arith.constant 0 : i32
    return %c0_i32, %c0_i32_0 : i32, i32
  }
  func.func @transform_11(%arg0: i32) -> (i32, i32) {
    %c0_i32 = arith.constant 0 : i32
    %c0_i32_0 = arith.constant 0 : i32
    %c0_i32_1 = arith.constant 0 : i32
    return %c0_i32, %c0_i32_0 : i32, i32
  }
  func.func @transform_12(%arg0: i32) -> (i32, i32) {
    %c0_i32 = arith.constant 0 : i32
    %c0_i32_0 = arith.constant 0 : i32
    %c0_i32_1 = arith.constant 0 : i32
    return %c0_i32, %c0_i32_0 : i32, i32
  }
  func.func @transform_13(%arg0: i32) -> (i32, i32) {
    %c0_i32 = arith.constant 0 : i32
    %c0_i32_0 = arith.constant 0 : i32
    return %arg0, %c0_i32 : i32, i32
  }
}

</mosaic_0001>

<bundles_post_ra>
// kernel: tpu_custom_call.1
= control target key start
LH: loop header
LB: loop body
LE: loop exit
PB: predicated region body
PF: predicated region fallthrough
CT: control target
= control target key end

     0   :  { %s3406_s0 = inlined_call_operand.vmem [shape: f32[256,32], index: 0, kind: input, shape index: {}]   ;;  %s3407_s1 = inlined_call_operand.vmem [shape: f32[256,16], index: 1, kind: input, shape index: {}]   ;;  %s3408_s2 = inlined_call_operand.vmem [shape: bf16[32,128], index: 2, kind: input, shape index: {}]   ;;  %s3409_s3 = inlined_call_operand.vmem [shape: f32[1,128], index: 3, kind: input, shape index: {}]   ;;  %s3410_s4 = inlined_call_operand.vmem [shape: bf16[128,128], index: 4, kind: input, shape index: {}]   ;;  %s3411_s5 = inlined_call_operand.vmem [shape: f32[1,128], index: 5, kind: input, shape index: {}]   ;;  %s3412_s6 = inlined_call_operand.vmem [shape: bf16[128,256], index: 6, kind: input, shape index: {}]   ;;  %s3413_s7 = inlined_call_operand.vmem [shape: f32[1,256], index: 7, kind: input, shape index: {}]   ;;  %s3414_s8 = inlined_call_operand.vmem [shape: bf16[128,128], index: 8, kind: input, shape index: {}]   ;;  %s3415_s9 = inlined_call_operand.vmem [shape: f32[1,128], index: 9, kind: input, shape index: {}]   ;;  %s3416_s10 = inlined_call_operand.vmem [shape: bf16[16,256], index: 10, kind: input, shape index: {}]   ;;  %s3417_s11 = inlined_call_operand.vmem [shape: bf16[256,128], index: 11, kind: input, shape index: {}]   ;;  %s3418_s12 = inlined_call_operand.vmem [shape: bf16[128,128], index: 12, kind: input, shape index: {}]   ;;  %s3419_s13 = inlined_call_operand.hbm [shape: f32[256,128], index: 13, kind: output, shape index: {}]  }
   0x1   :  { %v2203_v0 = vld [vmem:[%s3408_s2 + $0x8] sm:$0xff]  ;;  %v2202_v1 = vld [vmem:[%s3408_s2] sm:$0xff] }
   0x2   :  { %169 = vmatpush.bf16.msra.mxu0 %v2203_v0  ;;  %v46_v2 = vld [vmem:[%s3406_s0] sm:$0xff]  ;;  %v47_v3 = vld [vmem:[%s3406_s0 + $0x8] sm:$0xff]  ;;  %2262 = vmatpush.bf16.msra.mxu3 %v2203_v0 }
   0x3   :  { %18 = vsyncpa [#allocation3], 0  ;;  %v78_v4 = vpack.c.bf16 %v47_v3, %v46_v2  ;;  %vm114_vm0 = vcmask 261120   ;;  %v48_v5 = vld [vmem:[%s3406_s0 + $0x10] sm:$0xff]  ;;  %v49_v6 = vld [vmem:[%s3406_s0 + $0x18] sm:$0xff]  ;;  %vm1002_vm1 = vcmask 130048  }
   0x4   :  { %v79_v7 = vpack.c.bf16 %v49_v6, %v48_v5  ;;  %v50_v8 = vld [vmem:[%s3406_s0 + $0x20] sm:$0xff]  ;;  %v51_v9 = vld [vmem:[%s3406_s0 + $0x28] sm:$0xff]  ;;  %v52_v11 = vld [vmem:[%s3406_s0 + $0x30] sm:$0xff] }
   0x5   :  { %v80_v10 = vpack.c.bf16 %v51_v9, %v50_v8  ;;  %v53_v12 = vld [vmem:[%s3406_s0 + $0x38] sm:$0xff]  ;;  %v54_v14 = vld [vmem:[%s3406_s0 + $0x40] sm:$0xff]  ;;  %v55_v15 = vld [vmem:[%s3406_s0 + $0x48] sm:$0xff] }
   0x6   :  { %170 = vmatpush.bf16.msra.mxu0 %v2202_v1  ;;  %2263 = vmatpush.bf16.msra.mxu3 %v2202_v1  ;;  %v81_v13 = vpack.c.bf16 %v53_v12, %v52_v11  ;;  %v82_v16 = vpack.c.bf16 %v55_v15, %v54_v14  ;;  %v2211_v17 = vld [vmem:[%s3410_s4 + $0x38] sm:$0xff]  ;;  %v56_v18 = vld [vmem:[%s3406_s0 + $0x50] sm:$0xff]  ;;  %v2209_v22 = vld [vmem:[%s3410_s4 + $0x28] sm:$0xff] }
   0x7   :  { %368 = vmatpush.bf16.msra.mxu1 %v2211_v17  ;;  %2264 = vmatpush.bf16.msra.mxu2 %v2211_v17  ;;  %v57_v19 = vld [vmem:[%s3406_s0 + $0x58] sm:$0xff]  ;;  %v2210_v21 = vld [vmem:[%s3410_s4 + $0x30] sm:$0xff]  ;;  %v2208_v23 = vld [vmem:[%s3410_s4 + $0x20] sm:$0xff] }
   0x8   :  { %v83_v20 = vpack.c.bf16 %v57_v19, %v56_v18  ;;  %v58_v24 = vld [vmem:[%s3406_s0 + $0x60] sm:$0xff]  ;;  %v59_v25 = vld [vmem:[%s3406_s0 + $0x68] sm:$0xff]  ;;  %v2207_v26 = vld [vmem:[%s3410_s4 + $0x18] sm:$0xff] }
   0x9   :  { %1922 = vmatmul.msk.bf16.vlgmr.msra.gmra.mxu0 %vm114_vm0, %v78_v4  ;;  %v84_v27 = vpack.c.bf16 %v59_v25, %v58_v24  ;;  %v2206_v28 = vld [vmem:[%s3410_s4 + $0x10] sm:$0xff]  ;;  %v65_v30 = vld [vmem:[%s3406_s0 + $0x98] sm:$0xff]  ;;  %v2205_v32 = vld [vmem:[%s3410_s4 + $0x8] sm:$0xff] }
   0xa   :  { %v64_v29 = vld [vmem:[%s3406_s0 + $0x90] sm:$0xff]  ;;  %v2204_v33 = vld [vmem:[%s3410_s4] sm:$0xff]  ;;  %v61_v35 = vld [vmem:[%s3406_s0 + $0x78] sm:$0xff] }
   0xb   :  { %369 = vmatpush.bf16.msra.mxu1 %v2210_v21  ;;  %2265 = vmatpush.bf16.msra.mxu2 %v2210_v21  ;;  %v87_v31 = vpack.c.bf16 %v65_v30, %v64_v29  ;;  %v60_v34 = vld [vmem:[%s3406_s0 + $0x70] sm:$0xff]  ;;  %v66_v37 = vld [vmem:[%s3406_s0 + $0xa0] sm:$0xff]  ;;  %v67_v38 = vld [vmem:[%s3406_s0 + $0xa8] sm:$0xff] }
   0xc   :  { %v85_v36 = vpack.c.bf16 %v61_v35, %v60_v34  ;;  %v88_v39 = vpack.c.bf16 %v67_v38, %v66_v37  ;;  %v62_v40 = vld [vmem:[%s3406_s0 + $0x80] sm:$0xff]  ;;  %v63_v41 = vld [vmem:[%s3406_s0 + $0x88] sm:$0xff]  ;;  %v68_v44 = vld [vmem:[%s3406_s0 + $0xb0] sm:$0xff] }
   0xd   :  { %1931 = vmatmul.msk.bf16.vlgmr.msra.gmra.mxu3 %vm114_vm0, %v87_v31  ;;  %v86_v42 = vpack.c.bf16 %v63_v41, %v62_v40  ;;  %v69_v45 = vld [vmem:[%s3406_s0 + $0xb8] sm:$0xff]  ;;  %v2492_v46 = vld [vmem:[%s3409_s3] ss:$0 sm:$0xff]  ;;  %v71_v56 = vld [vmem:[%s3406_s0 + $0xc8] sm:$0xff] }
   0xe   :  { %v89_v47 = vpack.c.bf16 %v69_v45, %v68_v44  ;;  %v70_v55 = vld [vmem:[%s3406_s0 + $0xc0] sm:$0xff]  ;;  %v72_v1 = vld [vmem:[%s3406_s0 + $0xd0] sm:$0xff]  ;;  %v73_v2 = vld [vmem:[%s3406_s0 + $0xd8] sm:$0xff] }
   0xf   :  { %370 = vmatpush.bf16.msra.mxu1 %v2209_v22  ;;  %2266 = vmatpush.bf16.msra.mxu2 %v2209_v22  ;;  %v90_v57 = vpack.c.bf16 %v71_v56, %v70_v55  ;;  %v91_v3 = vpack.c.bf16 %v73_v2, %v72_v1  ;;  %v74_v11 = vld [vmem:[%s3406_s0 + $0xe0] sm:$0xff]  ;;  %v75_v12 = vld [vmem:[%s3406_s0 + $0xe8] sm:$0xff]  ;;  %v76_v21 = vld [vmem:[%s3406_s0 + $0xf0] sm:$0xff] }
  0x10   :  { %v77_v22 = vld [vmem:[%s3406_s0 + $0xf8] sm:$0xff]  ;;  %v2226_v34 = vld [vmem:[%s3412_s6 + $0x74] sm:$0xf]  ;;  %v2224_v41 = vld [vmem:[%s3412_s6 + $0x64] sm:$0xf] }
  0x11   :  { %v2030_v35 = vld [vmem:[%s3412_s6 + $0x78] sm:$0xf0]  ;;  %v2234_v44 = vld [vmem:[%s3414_s8 + $0x30] sm:$0xff]  ;;  %v2216_v1 = vld [vmem:[%s3412_s6 + $0x24] sm:$0xf] }
  0x12   :  { %v2235_v37 = vld [vmem:[%s3414_s8 + $0x38] sm:$0xff]  ;;  %v1990_v2 = vld [vmem:[%s3412_s6 + $0x28] sm:$0xf0] }
  0x13   :  { %371 = vmatpush.bf16.msra.mxu1 %v2208_v23  ;;  %2267 = vmatpush.bf16.msra.mxu2 %v2208_v23  ;;  %v93_v23 = vpack.c.bf16 %v77_v22, %v76_v21 }
  0x14   :  { %853 = vmatpush.bf16.msrb.mxu0 %v2235_v37 }
  0x17   :  { %372 = vmatpush.bf16.msra.mxu1 %v2207_v26  ;;  %2268 = vmatpush.bf16.msra.mxu2 %v2207_v26 }
  0x18   :  { %854 = vmatpush.bf16.msrb.mxu0 %v2234_v44 }
  0x19   :  { %1923 = vmatmul.msk.bf16.gmra.mxu0 %vm114_vm0, %v79_v7 }
  0x1b   :  { %373 = vmatpush.bf16.msra.mxu1 %v2206_v28  ;;  %2269 = vmatpush.bf16.msra.mxu2 %v2206_v28 }
  0x1d   :  { %1932 = vmatmul.msk.bf16.gmra.mxu3 %vm114_vm0, %v88_v39 }
  0x1f   :  { %374 = vmatpush.bf16.msra.mxu1 %v2205_v32  ;;  %2270 = vmatpush.bf16.msra.mxu2 %v2205_v32 }
  0x23   :  { %375 = vmatpush.bf16.msra.mxu1 %v2204_v33  ;;  %2271 = vmatpush.bf16.msra.mxu2 %v2204_v33 }
  0x29   :  { %1924 = vmatmul.msk.bf16.gmra.mxu0 %vm114_vm0, %v80_v10 }
  0x2d   :  { %1933 = vmatmul.msk.bf16.gmra.mxu3 %vm114_vm0, %v89_v47  ;;  %v2222_v47 = vld [vmem:[%s3412_s6 + $0x54] sm:$0xf] }
  0x39   :  { %1925 = vmatmul.msk.bf16.gmra.mxu0 %vm114_vm0, %v81_v13  ;;  %v92_v13 = vpack.c.bf16 %v75_v12, %v74_v11  ;;  %v1982_v11 = vld [vmem:[%s3412_s6 + $0x18] sm:$0xf0] }
  0x3d   :  { %1934 = vmatmul.msk.bf16.gmra.mxu3 %vm114_vm0, %v90_v57 }
  0x49   :  { %1926 = vmatmul.msk.bf16.gmra.mxu0 %vm114_vm0, %v82_v16 }
  0x4d   :  { %1935 = vmatmul.msk.bf16.gmra.mxu3 %vm114_vm0, %v91_v3  ;;  %v1993_v3 = vor.u32 %v2216_v1, %v1990_v2 }
  0x59   :  { %1927 = vmatmul.msk.bf16.gmra.mxu0 %vm114_vm0, %v83_v20 }
  0x5d   :  { %1936 = vmatmul.msk.bf16.gmra.mxu3 %vm114_vm0, %v92_v13  ;;  %v2229_v13 = vld [vmem:[%s3414_s8 + $0x8] sm:$0xff] }
  0x69   :  { %1928 = vmatmul.msk.bf16.gmra.mxu0 %vm114_vm0, %v84_v27 }
  0x6d   :  { %1937 = vmatmul.msk.bf16.gmra.mxu3 %vm114_vm0, %v93_v23 }
  0x79   :  { %1929 = vmatmul.msk.bf16.gmra.mxu0 %vm114_vm0, %v85_v36  ;;  %v2033_v36 = vor.u32 %v2226_v34, %v2030_v35 }
  0x7b   :  { %696 = vmatpush.bf16.msrb.mxu3 %v2033_v36 }
  0x86   :  { %v172_v43 = vpop.f32.mrf.mxu0 }
  0x87   :  { %v173_v48 = vadd.f32 %v2492_v46, %v172_v43 }
  0x89   :  { %1930 = vmatmul.msk.bf16.gmra.mxu0 %vm114_vm0, %v86_v42  ;;  %v252_v51 = vmax.f32 %v173_v48, 0.0  ;;  %v2022_v42 = vld [vmem:[%s3412_s6 + $0x68] sm:$0xf0]  ;;  %v2014_v48 = vld [vmem:[%s3412_s6 + $0x58] sm:$0xf0] }
  0x8a   :  { %v2025_v43 = vor.u32 %v2224_v41, %v2022_v42 }
  0x8c   :  { %697 = vmatpush.bf16.msrb.mxu3 %v2025_v43 }
  0x8e   :  { %v174_v49 = vpop.f32.mrf.mxu0 }
  0x8f   :  { %v175_v50 = vadd.f32 %v2492_v46, %v174_v49  ;;  %v2017_v49 = vor.u32 %v2222_v47, %v2014_v48 }
  0x91   :  { %v253_v52 = vmax.f32 %v175_v50, 0.0  ;;  %v2233_v50 = vld [vmem:[%s3414_s8 + $0x28] sm:$0xff]  ;;  %698 = vmatpush.bf16.msrb.mxu3 %v2017_v49 }
  0x92   :  { %855 = vmatpush.bf16.msrb.mxu0 %v2233_v50 }
  0x93   :  { %v284_v53 = vpack.c.bf16 %v253_v52, %v252_v51  ;;  %v2220_v51 = vld [vmem:[%s3412_s6 + $0x44] sm:$0xf]  ;;  %v2006_v52 = vld [vmem:[%s3412_s6 + $0x48] sm:$0xf0] }
  0x95   :  { %376 = vmatmul.bf16.vlgmr.msra.gmra.mxu1 %v284_v53  ;;  %v2009_v53 = vor.u32 %v2220_v51, %v2006_v52 }
  0x96   :  { %v177_v54 = vpop.f32.mrf.mxu0 }
  0x97   :  { %v178_v58 = vadd.f32 %v2492_v46, %v177_v54  ;;  %v2232_v54 = vld [vmem:[%s3414_s8 + $0x20] sm:$0xff]  ;;  %699 = vmatpush.bf16.msrb.mxu3 %v2009_v53 }
  0x98   :  { %856 = vmatpush.bf16.msrb.mxu0 %v2232_v54 }
  0x99   :  { %v254_v61 = vmax.f32 %v178_v58, 0.0  ;;  %v2218_v58 = vld [vmem:[%s3412_s6 + $0x34] sm:$0xf] }
  0x9e   :  { %v179_v59 = vpop.f32.mrf.mxu0 }
  0x9f   :  { %v180_v60 = vadd.f32 %v2492_v46, %v179_v59  ;;  %v1998_v59 = vld [vmem:[%s3412_s6 + $0x38] sm:$0xf0] }
  0xa1   :  { %v255_v62 = vmax.f32 %v180_v60, 0.0  ;;  %v2001_v60 = vor.u32 %v2218_v58, %v1998_v59 }
  0xa3   :  { %v285_v63 = vpack.c.bf16 %v255_v62, %v254_v61  ;;  %v2231_v61 = vld [vmem:[%s3414_s8 + $0x18] sm:$0xff]  ;;  %700 = vmatpush.bf16.msrb.mxu3 %v2001_v60 }
  0xa4   :  { %857 = vmatpush.bf16.msrb.mxu0 %v2231_v61 }
  0xa5   :  { %381 = vmatmul.bf16.gmra.mxu1 %v285_v63 }
  0xa6   :  { %v182_v0 = vpop.f32.mrf.mxu0 }
  0xa7   :  { %v183_v4 = vadd.f32 %v2492_v46, %v182_v0  ;;  %701 = vmatpush.bf16.msrb.mxu3 %v1993_v3 }
  0xa9   :  { %v256_v7 = vmax.f32 %v183_v4, 0.0  ;;  %v2230_v4 = vld [vmem:[%s3414_s8 + $0x10] sm:$0xff] }
  0xaa   :  { %858 = vmatpush.bf16.msrb.mxu0 %v2230_v4 }
  0xae   :  { %v184_v5 = vpop.f32.mrf.mxu0  ;;  %859 = vmatpush.bf16.msrb.mxu0 %v2229_v13 }
  0xaf   :  { %v185_v6 = vadd.f32 %v2492_v46, %v184_v5  ;;  %v2028_v5 = vld [vmem:[%s3412_s6 + $0x70] sm:$0xf] }
  0xb1   :  { %v257_v8 = vmax.f32 %v185_v6, 0.0  ;;  %v2227_v6 = vld [vmem:[%s3412_s6 + $0x74] sm:$0xf0] }
  0xb3   :  { %v286_v9 = vpack.c.bf16 %v257_v8, %v256_v7  ;;  %v217_v8 = vpop.f32.mrf.mxu3 }
  0xb4   :  { %v218_v44 = vadd.f32 %v2492_v46, %v217_v8 }
  0xb5   :  { %386 = vmatmul.bf16.gmra.mxu1 %v286_v9  ;;  %v2029_v9 = vor.u32 %v2227_v6, %v2028_v5 }
  0xb6   :  { %v187_v10 = vpop.f32.mrf.mxu0  ;;  %v270_v51 = vmax.f32 %v218_v44, 0.0  ;;  %v2215_v44 = vld [vmem:[%s3412_s6 + $0x14] sm:$0xf0] }
  0xb7   :  { %v188_v14 = vadd.f32 %v2492_v46, %v187_v10  ;;  %v2214_v10 = vld [vmem:[%s3412_s6 + $0x14] sm:$0xf]  ;;  %607 = vmatpush.bf16.msrb.mxu2 %v2029_v9  ;;  %v1996_v9 = vld [vmem:[%s3412_s6 + $0x30] sm:$0xf] }
  0xb8   :  { %v1985_v12 = vor.u32 %v2214_v10, %v1982_v11  ;;  %v2219_v10 = vld [vmem:[%s3412_s6 + $0x34] sm:$0xf0] }
  0xb9   :  { %v258_v17 = vmax.f32 %v188_v14, 0.0  ;;  %v2212_v14 = vld [vmem:[%s3412_s6 + $0x4] sm:$0xf]  ;;  %v1997_v11 = vor.u32 %v2219_v10, %v1996_v9 }
  0xba   :  { %702 = vmatpush.bf16.msrb.mxu3 %v1985_v12 }
  0xbb   :  { %v219_v21 = vpop.f32.mrf.mxu3 }
  0xbe   :  { %v189_v15 = vpop.f32.mrf.mxu0 }
  0xbf   :  { %v190_v16 = vadd.f32 %v2492_v46, %v189_v15  ;;  %v1974_v15 = vld [vmem:[%s3412_s6 + $0x8] sm:$0xf0] }
  0xc1   :  { %v259_v18 = vmax.f32 %v190_v16, 0.0  ;;  %v1977_v16 = vor.u32 %v2212_v14, %v1974_v15 }
  0xc3   :  { %v287_v19 = vpack.c.bf16 %v259_v18, %v258_v17  ;;  %v2228_v17 = vld [vmem:[%s3414_s8] sm:$0xff]  ;;  %703 = vmatpush.bf16.msrb.mxu3 %v1977_v16  ;;  %s2306_s8 = smov 8  }
  0xc4   :  { %860 = vmatpush.bf16.msrb.mxu0 %v2228_v17 }
  0xc5   :  { %391 = vmatmul.bf16.gmra.mxu1 %v287_v19 }
  0xc6   :  { %v192_v20 = vpop.f32.mrf.mxu0 }
  0xc7   :  { %v193_v24 = vadd.f32 %v2492_v46, %v192_v20 }
  0xc9   :  { %v260_v27 = vmax.f32 %v193_v24, 0.0 }
  0xce   :  { %v194_v25 = vpop.f32.mrf.mxu0 }
  0xcf   :  { %v195_v26 = vadd.f32 %v2492_v46, %v194_v25  ;;  %v2020_v25 = vld [vmem:[%s3412_s6 + $0x60] sm:$0xf] }
  0xd1   :  { %v261_v28 = vmax.f32 %v195_v26, 0.0  ;;  %v2225_v26 = vld [vmem:[%s3412_s6 + $0x64] sm:$0xf0] }
  0xd3   :  { %v288_v29 = vpack.c.bf16 %v261_v28, %v260_v27  ;;  %v2021_v28 = vor.u32 %v2225_v26, %v2020_v25  ;;  %v1988_v25 = vld [vmem:[%s3412_s6 + $0x20] sm:$0xf]  ;;  %v2217_v26 = vld [vmem:[%s3412_s6 + $0x24] sm:$0xf0] }
  0xd5   :  { %396 = vmatmul.bf16.gmra.mxu1 %v288_v29  ;;  %608 = vmatpush.bf16.msrb.mxu2 %v2021_v28  ;;  %v222_v29 = vpop.f32.mrf.mxu3  ;;  %v1989_v28 = vor.u32 %v2217_v26, %v1988_v25  ;;  %v942_v26 = vld [vmem:[%s3407_s1] sm:$0xff] }
  0xd6   :  { %v197_v30 = vpop.f32.mrf.mxu0 }
  0xd7   :  { %v198_v31 = vadd.f32 %v2492_v46, %v197_v30 }
  0xd9   :  { %v262_v38 = vmax.f32 %v198_v31, 0.0 }
  0xdd   :  { %v224_v37 = vpop.f32.mrf.mxu3 }
  0xde   :  { %v199_v32 = vpop.f32.mrf.mxu0 }
  0xdf   :  { %v200_v33 = vadd.f32 %v2492_v46, %v199_v32 }
  0xe1   :  { %v263_v39 = vmax.f32 %v200_v33, 0.0 }
  0xe3   :  { %v289_v40 = vpack.c.bf16 %v263_v39, %v262_v38  ;;  %v2629_v38 = vld [vmem:[%s3411_s5] ss:$0 sm:$0xff]  ;;  %v2012_v39 = vld [vmem:[%s3412_s6 + $0x50] sm:$0xf] }
  0xe5   :  { %401 = vmatmul.bf16.gmra.mxu1 %v289_v40  ;;  %v2223_v40 = vld [vmem:[%s3412_s6 + $0x54] sm:$0xf0]  ;;  %v227_v50 = vpop.f32.mrf.mxu3 }
  0xe6   :  { %v202_v45 = vpop.f32.mrf.mxu0  ;;  %v2013_v41 = vor.u32 %v2223_v40, %v2012_v39  ;;  %v228_v14 = vadd.f32 %v2492_v46, %v227_v50 }
  0xe7   :  { %v203_v55 = vadd.f32 %v2492_v46, %v202_v45  ;;  %v220_v45 = vadd.f32 %v2492_v46, %v219_v21 }
  0xe8   :  { %609 = vmatpush.bf16.msrb.mxu2 %v2013_v41 }
  0xe9   :  { %v264_v62 = vmax.f32 %v203_v55, 0.0  ;;  %v271_v52 = vmax.f32 %v220_v45, 0.0 }
  0xeb   :  { %v293_v55 = vpack.c.bf16 %v271_v52, %v270_v51 }
  0xed   :  { %v229_v59 = vpop.f32.mrf.mxu3 }
  0xee   :  { %v204_v56 = vpop.f32.mrf.mxu0  ;;  %v230_v15 = vadd.f32 %v2492_v46, %v229_v59 }
  0xef   :  { %v205_v57 = vadd.f32 %v2492_v46, %v204_v56  ;;  %v2004_v56 = vld [vmem:[%s3412_s6 + $0x40] sm:$0xf] }
  0xf0   :  { %v275_v21 = vmax.f32 %v230_v15, 0.0  ;;  %v2236_v15 = vld [vmem:[%s3416_s10 + $0x4] sm:$0xf] }
  0xf1   :  { %v265_v63 = vmax.f32 %v205_v57, 0.0  ;;  %v2221_v57 = vld [vmem:[%s3412_s6 + $0x44] sm:$0xf0] }
  0xf2   :  { %v2005_v58 = vor.u32 %v2221_v57, %v2004_v56 }
  0xf3   :  { %v290_v0 = vpack.c.bf16 %v265_v63, %v264_v62  ;;  %v223_v62 = vadd.f32 %v2492_v46, %v222_v29  ;;  %v225_v63 = vadd.f32 %v2492_v46, %v224_v37 }
  0xf4   :  { %610 = vmatpush.bf16.msrb.mxu2 %v2005_v58 }
  0xf5   :  { %406 = vmatmul.bf16.gmra.mxu1 %v290_v0  ;;  %v272_v3 = vmax.f32 %v223_v62, 0.0  ;;  %v273_v4 = vmax.f32 %v225_v63, 0.0  ;;  %v1972_v62 = vld [vmem:[%s3412_s6] sm:$0xf]  ;;  %v2213_v63 = vld [vmem:[%s3412_s6 + $0x4] sm:$0xf0] }
  0xf6   :  { %v207_v7 = vpop.f32.mrf.mxu0 }
  0xf7   :  { %v208_v18 = vadd.f32 %v2492_v46, %v207_v7  ;;  %v232_v7 = vpop.f32.mrf.mxu3  ;;  %v294_v8 = vpack.c.bf16 %v273_v4, %v272_v3 }
  0xf8   :  { %611 = vmatpush.bf16.msrb.mxu2 %v1997_v11 }
  0xf9   :  { %v266_v22 = vmax.f32 %v208_v18, 0.0 }
  0xfc   :  { %612 = vmatpush.bf16.msrb.mxu2 %v1989_v28 }
  0xfe   :  { %v209_v19 = vpop.f32.mrf.mxu0 }
  0xff   :  { %v210_v20 = vadd.f32 %v2492_v46, %v209_v19  ;;  %v234_v17 = vpop.f32.mrf.mxu3 }
 0x101   :  { %v267_v23 = vmax.f32 %v210_v20, 0.0  ;;  %v274_v20 = vmax.f32 %v228_v14, 0.0 }
 0x103   :  { %v291_v24 = vpack.c.bf16 %v267_v23, %v266_v22 }
 0x105   :  { %411 = vmatmul.bf16.gmra.mxu1 %v291_v24  ;;  %v295_v24 = vpack.c.bf16 %v275_v21, %v274_v20 }
 0x106   :  { %v212_v27 = vpop.f32.mrf.mxu0 }
 0x107   :  { %v213_v30 = vadd.f32 %v2492_v46, %v212_v27  ;;  %v237_v27 = vpop.f32.mrf.mxu3 }
 0x108   :  { %v238_v50 = vadd.f32 %v2492_v46, %v237_v27  ;;  %v943_v27 = vld [vmem:[%s3407_s1 + $0x8] sm:$0xff] }
 0x109   :  { %v268_v33 = vmax.f32 %v213_v30, 0.0 }
 0x10a   :  { %v278_v56 = vmax.f32 %v238_v50, 0.0  ;;  %v946_v50 = vld [vmem:[%s3407_s1 + $0x20] sm:$0xff] }
 0x10e   :  { %v214_v31 = vpop.f32.mrf.mxu0 }
 0x10f   :  { %v215_v32 = vadd.f32 %v2492_v46, %v214_v31  ;;  %v233_v31 = vadd.f32 %v2492_v46, %v232_v7  ;;  %v239_v40 = vpop.f32.mrf.mxu3 }
 0x110   :  { %v240_v51 = vadd.f32 %v2492_v46, %v239_v40 }
 0x111   :  { %v269_v34 = vmax.f32 %v215_v32, 0.0  ;;  %v235_v32 = vadd.f32 %v2492_v46, %v234_v17 }
 0x112   :  { %v377_v35 = vpop.f32.mrf.mxu1  ;;  %v279_v57 = vmax.f32 %v240_v51, 0.0  ;;  %v947_v51 = vld [vmem:[%s3407_s1 + $0x28] sm:$0xff] }
 0x113   :  { %v292_v36 = vpack.c.bf16 %v269_v34, %v268_v33  ;;  %v378_v42 = vadd.f32 %v2629_v38, %v377_v35  ;;  %v277_v37 = vmax.f32 %v235_v32, 0.0 }
 0x115   :  { %416 = vmatmul.bf16.vlgmr.msra.gmra.mxu2 %v292_v36  ;;  %v457_v48 = vmax.f32 %v378_v42, 0.0  ;;  %v276_v36 = vmax.f32 %v233_v31, 0.0 }
 0x117   :  { %v296_v42 = vpack.c.bf16 %v277_v37, %v276_v36 }
 0x11a   :  { %v379_v43 = vpop.f32.mrf.mxu1 }
 0x11b   :  { %v380_v47 = vadd.f32 %v2629_v38, %v379_v43  ;;  %v1980_v43 = vld [vmem:[%s3412_s6 + $0x10] sm:$0xf] }
 0x11c   :  { %v1981_v45 = vor.u32 %v2215_v44, %v1980_v43 }
 0x11d   :  { %v458_v49 = vmax.f32 %v380_v47, 0.0 }
 0x11e   :  { %613 = vmatpush.bf16.msrb.mxu2 %v1981_v45 }
 0x11f   :  { %v2641_v53 = vpack.c.bf16 %v458_v49, %v457_v48  ;;  %v242_v49 = vpop.f32.mrf.mxu3 }
 0x120   :  { %v243_v3 = vadd.f32 %v2492_v46, %v242_v49 }
 0x121   :  { %704 = vmatmul.bf16.vlgmr.msrb.gmra.mxu3 %v2641_v53  ;;  %861 = vmatmul.bf16.vlgmr.msrb.gmra.mxu0 %v2641_v53 }
 0x122   :  { %v382_v54 = vpop.f32.mrf.mxu1  ;;  %v280_v10 = vmax.f32 %v243_v3, 0.0 }
 0x123   :  { %v383_v60 = vadd.f32 %v2629_v38, %v382_v54 }
 0x125   :  { %421 = vmatmul.bf16.gmra.mxu2 %v293_v55  ;;  %v459_v1 = vmax.f32 %v383_v60, 0.0  ;;  %v297_v60 = vpack.c.bf16 %v279_v57, %v278_v56 }
 0x12a   :  { %v384_v61 = vpop.f32.mrf.mxu1 }
 0x12b   :  { %v385_v0 = vadd.f32 %v2629_v38, %v384_v61  ;;  %v244_v61 = vpop.f32.mrf.mxu3 }
 0x12c   :  { %v245_v4 = vadd.f32 %v2492_v46, %v244_v61 }
 0x12d   :  { %v460_v2 = vmax.f32 %v385_v0, 0.0  ;;  %v1973_v0 = vor.u32 %v2213_v63, %v1972_v62  ;;  %v948_v62 = vld [vmem:[%s3407_s1 + $0x30] sm:$0xff]  ;;  %v949_v63 = vld [vmem:[%s3407_s1 + $0x38] sm:$0xff] }
 0x12e   :  { %v281_v11 = vmax.f32 %v245_v4, 0.0 }
 0x12f   :  { %v2655_v5 = vpack.c.bf16 %v460_v2, %v459_v1  ;;  %614 = vmatpush.bf16.msrb.mxu2 %v1973_v0  ;;  %v2787_v0 = vpack.c.bf16 %v949_v63, %v948_v62  ;;  %v2243_v63 = vld [vmem:[%s3417_s11 + $0x28] sm:$0xff] }
 0x130   :  { %v298_v14 = vpack.c.bf16 %v281_v11, %v280_v10  ;;  %v950_v10 = vld [vmem:[%s3407_s1 + $0x40] sm:$0xff]  ;;  %v951_v11 = vld [vmem:[%s3407_s1 + $0x48] sm:$0xff] }
 0x131   :  { %709 = vmatmul.bf16.gmra.mxu3 %v2655_v5  ;;  %866 = vmatmul.bf16.gmra.mxu0 %v2655_v5 }
 0x132   :  { %v387_v6 = vpop.f32.mrf.mxu1 }
 0x133   :  { %v388_v12 = vadd.f32 %v2629_v38, %v387_v6  ;;  %v247_v9 = vpop.f32.mrf.mxu3 }
 0x135   :  { %426 = vmatmul.bf16.gmra.mxu2 %v294_v8  ;;  %v461_v18 = vmax.f32 %v388_v12, 0.0 }
 0x13a   :  { %v389_v13 = vpop.f32.mrf.mxu1 }
 0x13b   :  { %v390_v16 = vadd.f32 %v2629_v38, %v389_v13  ;;  %v249_v20 = vpop.f32.mrf.mxu3 }
 0x13c   :  { %v250_v28 = vadd.f32 %v2492_v46, %v249_v20 }
 0x13d   :  { %v462_v19 = vmax.f32 %v390_v16, 0.0  ;;  %v2070_v16 = vld [vmem:[%s3416_s10 + $0x8] sm:$0xf0] }
 0x13e   :  { %v2073_v17 = vor.u32 %v2236_v15, %v2070_v16 }
 0x13f   :  { %v2669_v22 = vpack.c.bf16 %v462_v19, %v461_v18  ;;  %v2068_v18 = vld [vmem:[%s3416_s10] sm:$0xf]  ;;  %v2237_v19 = vld [vmem:[%s3416_s10 + $0x4] sm:$0xf0] }
 0x140   :  { %1147 = vmatpush.bf16.msra.mxu2 %v2073_v17  ;;  %v2069_v21 = vor.u32 %v2237_v19, %v2068_v18 }
 0x141   :  { %714 = vmatmul.bf16.gmra.mxu3 %v2669_v22  ;;  %871 = vmatmul.bf16.gmra.mxu0 %v2669_v22 }
 0x142   :  { %v392_v23 = vpop.f32.mrf.mxu1  ;;  %1058 = vmatpush.bf16.msrb.mxu1 %v2069_v21 }
 0x143   :  { %v393_v29 = vadd.f32 %v2629_v38, %v392_v23 }
 0x145   :  { %431 = vmatmul.bf16.gmra.mxu2 %v295_v24  ;;  %v463_v34 = vmax.f32 %v393_v29, 0.0  ;;  %v248_v24 = vadd.f32 %v2492_v46, %v247_v9 }
 0x14a   :  { %v394_v30 = vpop.f32.mrf.mxu1 }
 0x14b   :  { %v395_v33 = vadd.f32 %v2629_v38, %v394_v30  ;;  %v2737_v30 = vpack.c.bf16 %v943_v27, %v942_v26 }
 0x14d   :  { %v464_v35 = vmax.f32 %v395_v33, 0.0  ;;  %2074 = vmatmul.msk.bf16.vlgmr.msrb.gmra.mxu1 %vm1002_vm1, %v2737_v30  ;;  %v282_v33 = vmax.f32 %v248_v24, 0.0  ;;  %v953_v24 = vld [vmem:[%s3407_s1 + $0x58] sm:$0xff] }
 0x14f   :  { %v2683_v39 = vpack.c.bf16 %v464_v35, %v463_v34  ;;  %v283_v34 = vmax.f32 %v250_v28, 0.0 }
 0x151   :  { %719 = vmatmul.bf16.gmra.mxu3 %v2683_v39  ;;  %876 = vmatmul.bf16.gmra.mxu0 %v2683_v39  ;;  %v299_v46 = vpack.c.bf16 %v283_v34, %v282_v33 }
 0x152   :  { %v397_v41 = vpop.f32.mrf.mxu1 }
 0x153   :  { %v398_v47 = vadd.f32 %v2629_v38, %v397_v41  ;;  %v944_v41 = vld [vmem:[%s3407_s1 + $0x10] sm:$0xff] }
 0x155   :  { %436 = vmatmul.bf16.gmra.mxu2 %v296_v42  ;;  %v465_v54 = vmax.f32 %v398_v47, 0.0  ;;  %v945_v42 = vld [vmem:[%s3407_s1 + $0x18] sm:$0xff] }
 0x156   :  { %v2753_v44 = vpack.c.bf16 %v945_v42, %v944_v41 }
 0x15a   :  { %v399_v48 = vpop.f32.mrf.mxu1 }
 0x15b   :  { %v400_v52 = vadd.f32 %v2629_v38, %v399_v48 }
 0x15d   :  { %v466_v55 = vmax.f32 %v400_v52, 0.0  ;;  %2075 = vmatmul.msk.bf16.gmra.mxu1 %vm1002_vm1, %v2753_v44  ;;  %v2768_v52 = vpack.c.bf16 %v947_v51, %v946_v50 }
 0x15f   :  { %v2697_v58 = vpack.c.bf16 %v466_v55, %v465_v54 }
 0x161   :  { %724 = vmatmul.bf16.gmra.mxu3 %v2697_v58  ;;  %881 = vmatmul.bf16.gmra.mxu0 %v2697_v58 }
 0x162   :  { %v402_v59 = vpop.f32.mrf.mxu1 }
 0x163   :  { %v403_v1 = vadd.f32 %v2629_v38, %v402_v59 }
 0x165   :  { %441 = vmatmul.bf16.gmra.mxu2 %v297_v60  ;;  %v467_v7 = vmax.f32 %v403_v1, 0.0 }
 0x16a   :  { %v404_v2 = vpop.f32.mrf.mxu1 }
 0x16b   :  { %v405_v6 = vadd.f32 %v2629_v38, %v404_v2 }
 0x16d   :  { %v468_v8 = vmax.f32 %v405_v6, 0.0  ;;  %2076 = vmatmul.msk.bf16.gmra.mxu1 %vm1002_vm1, %v2768_v52 }
 0x16f   :  { %v2711_v12 = vpack.c.bf16 %v468_v8, %v467_v7 }
 0x171   :  { %729 = vmatmul.bf16.gmra.mxu3 %v2711_v12  ;;  %886 = vmatmul.bf16.gmra.mxu0 %v2711_v12 }
 0x172   :  { %v407_v13 = vpop.f32.mrf.mxu1 }
 0x173   :  { %v408_v23 = vadd.f32 %v2629_v38, %v407_v13  ;;  %v2808_v13 = vpack.c.bf16 %v951_v11, %v950_v10 }
 0x175   :  { %446 = vmatmul.bf16.gmra.mxu2 %v298_v14  ;;  %v469_v31 = vmax.f32 %v408_v23, 0.0  ;;  %v952_v23 = vld [vmem:[%s3407_s1 + $0x50] sm:$0xff] }
 0x17a   :  { %v409_v25 = vpop.f32.mrf.mxu1 }
 0x17b   :  { %v410_v29 = vadd.f32 %v2629_v38, %v409_v25  ;;  %v2829_v25 = vpack.c.bf16 %v953_v24, %v952_v23  ;;  %v959_v23 = vld [vmem:[%s3407_s1 + $0x88] sm:$0xff] }
 0x17d   :  { %v470_v32 = vmax.f32 %v410_v29, 0.0  ;;  %2077 = vmatmul.msk.bf16.gmra.mxu1 %vm1002_vm1, %v2787_v0 }
 0x17f   :  { %v2741_v35 = vpack.c.bf16 %v470_v32, %v469_v31 }
 0x181   :  { %734 = vmatmul.bf16.gmra.mxu3 %v2741_v35  ;;  %891 = vmatmul.bf16.gmra.mxu0 %v2741_v35 }
 0x182   :  { %v412_v36 = vpop.f32.mrf.mxu1 }
 0x183   :  { %v413_v37 = vadd.f32 %v2629_v38, %v412_v36 }
 0x185   :  { %451 = vmatmul.bf16.gmra.mxu2 %v299_v46  ;;  %v471_v45 = vmax.f32 %v413_v37, 0.0  ;;  %v954_v46 = vld [vmem:[%s3407_s1 + $0x60] sm:$0xff]  ;;  %v955_v37 = vld [vmem:[%s3407_s1 + $0x68] sm:$0xff] }
 0x186   :  { %v2854_v41 = vpack.c.bf16 %v955_v37, %v954_v46  ;;  %v2238_v46 = vld [vmem:[%s3417_s11] sm:$0xff] }
 0x18a   :  { %v414_v40 = vpop.f32.mrf.mxu1 }
 0x18b   :  { %v415_v43 = vadd.f32 %v2629_v38, %v414_v40 }
 0x18d   :  { %v472_v47 = vmax.f32 %v415_v43, 0.0  ;;  %2078 = vmatmul.msk.bf16.gmra.mxu1 %vm1002_vm1, %v2808_v13 }
 0x18f   :  { %v2757_v48 = vpack.c.bf16 %v472_v47, %v471_v45 }
 0x191   :  { %739 = vmatmul.bf16.gmra.mxu3 %v2757_v48  ;;  %896 = vmatmul.bf16.gmra.mxu0 %v2757_v48 }
 0x195   :  { %615 = vmatmul.bf16.vlgmr.msrb.gmra.mxu2 %v2641_v53 }
 0x198   :  { %v417_v49 = vpop.f32.mrf.mxu2 }
 0x199   :  { %v418_v54 = vadd.f32 %v2629_v38, %v417_v49 }
 0x19b   :  { %v473_v53 = vmax.f32 %v418_v54, 0.0 }
 0x19d   :  { %2079 = vmatmul.msk.bf16.gmra.mxu1 %vm1002_vm1, %v2829_v25 }
 0x19e   :  { %v2836_v28 = vpop.f32.mrf.mxu0 }
 0x1a0   :  { %v419_v55 = vpop.f32.mrf.mxu2 }
 0x1a1   :  { %v420_v56 = vadd.f32 %v2629_v38, %v419_v55  ;;  %v2245_v55 = vld [vmem:[%s3417_s11 + $0x38] sm:$0xff] }
 0x1a2   :  { %1453 = vmatpush.bf16.msra.mxu3 %v2245_v55 }
 0x1a3   :  { %v474_v57 = vmax.f32 %v420_v56, 0.0 }
 0x1a4   :  { %v2774_v59 = vpop.f32.mrf.mxu3 }
 0x1a5   :  { %620 = vmatmul.bf16.gmra.mxu2 %v2655_v5  ;;  %v2777_v60 = vpack.c.bf16 %v474_v57, %v473_v53  ;;  %v2244_v53 = vld [vmem:[%s3417_s11 + $0x30] sm:$0xff]  ;;  %v957_v57 = vld [vmem:[%s3407_s1 + $0x78] sm:$0xff] }
 0x1a6   :  { %v2852_v40 = vpop.f32.mrf.mxu0  ;;  %1454 = vmatpush.bf16.msra.mxu3 %v2244_v53 }
 0x1a7   :  { %744 = vmatmul.bf16.gmra.mxu3 %v2777_v60  ;;  %901 = vmatmul.bf16.gmra.mxu0 %v2777_v60 }
 0x1a8   :  { %v422_v61 = vpop.f32.mrf.mxu2 }
 0x1a9   :  { %v423_v5 = vadd.f32 %v2629_v38, %v422_v61 }
 0x1aa   :  { %1455 = vmatpush.bf16.msra.mxu3 %v2243_v63 }
 0x1ab   :  { %v475_v4 = vmax.f32 %v423_v5, 0.0 }
 0x1ac   :  { %v2789_v1 = vpop.f32.mrf.mxu3 }
 0x1ad   :  { %2080 = vmatmul.msk.bf16.gmra.mxu1 %vm1002_vm1, %v2854_v41 }
 0x1ae   :  { %v2864_v51 = vpop.f32.mrf.mxu0 }
 0x1b0   :  { %v424_v2 = vpop.f32.mrf.mxu2 }
 0x1b1   :  { %v425_v3 = vadd.f32 %v2629_v38, %v424_v2 }
 0x1b3   :  { %v476_v6 = vmax.f32 %v425_v3, 0.0 }
 0x1b4   :  { %v2795_v7 = vpop.f32.mrf.mxu3 }
 0x1b5   :  { %625 = vmatmul.bf16.gmra.mxu2 %v2669_v22  ;;  %v2798_v8 = vpack.c.bf16 %v476_v6, %v475_v4  ;;  %v2242_v6 = vld [vmem:[%s3417_s11 + $0x20] sm:$0xff] }
 0x1b6   :  { %v2892_v5 = vpop.f32.mrf.mxu0  ;;  %1456 = vmatpush.bf16.msra.mxu3 %v2242_v6 }
 0x1b7   :  { %749 = vmatmul.bf16.gmra.mxu3 %v2798_v8  ;;  %906 = vmatmul.bf16.gmra.mxu0 %v2798_v8  ;;  %3420 = vst [vmem:[#allocation5_spill] sm:$0xff] %v2892_v5 }
 0x1b8   :  { %v427_v9 = vpop.f32.mrf.mxu2 }
 0x1b9   :  { %v428_v22 = vadd.f32 %v2629_v38, %v427_v9 }
 0x1bb   :  { %v477_v17 = vmax.f32 %v428_v22, 0.0  ;;  %v2241_v22 = vld [vmem:[%s3417_s11 + $0x18] sm:$0xff] }
 0x1bc   :  { %v2810_v14 = vpop.f32.mrf.mxu3  ;;  %1457 = vmatpush.bf16.msra.mxu3 %v2241_v22 }
 0x1c0   :  { %v429_v15 = vpop.f32.mrf.mxu2 }
 0x1c1   :  { %v430_v16 = vadd.f32 %v2629_v38, %v429_v15 }
 0x1c3   :  { %v478_v18 = vmax.f32 %v430_v16, 0.0 }
 0x1c4   :  { %v2816_v19 = vpop.f32.mrf.mxu3 }
 0x1c5   :  { %630 = vmatmul.bf16.gmra.mxu2 %v2683_v39  ;;  %v2819_v20 = vpack.c.bf16 %v478_v18, %v477_v17  ;;  %v2909_v17 = vpop.f32.mrf.mxu0 }
 0x1c6   :  { %3421 = vst [vmem:[#allocation6_spill] sm:$0xff] %v2909_v17 }
 0x1c7   :  { %754 = vmatmul.bf16.gmra.mxu3 %v2819_v20  ;;  %911 = vmatmul.bf16.gmra.mxu0 %v2819_v20 }
 0x1c8   :  { %v432_v21 = vpop.f32.mrf.mxu2 }
 0x1c9   :  { %v433_v39 = vadd.f32 %v2629_v38, %v432_v21  ;;  %v958_v21 = vld [vmem:[%s3407_s1 + $0x80] sm:$0xff] }
 0x1ca   :  { %v1060_v18 = vpop.f32.mrf.mxu1  ;;  %v2920_v24 = vpack.c.bf16 %v959_v23, %v958_v21  ;;  %v962_v23 = vld [vmem:[%s3407_s1 + $0xa0] sm:$0xff] }
 0x1cb   :  { %v479_v31 = vmax.f32 %v433_v39, 0.0  ;;  %v2239_v39 = vld [vmem:[%s3417_s11 + $0x8] sm:$0xff] }
 0x1cc   :  { %v2831_v26 = vpop.f32.mrf.mxu3 }
 0x1cd   :  { %v2934_v37 = vpop.f32.mrf.mxu0 }
 0x1ce   :  { %3422 = vst [vmem:[#allocation7_spill] sm:$0xff] %v2934_v37 }
 0x1d0   :  { %v434_v27 = vpop.f32.mrf.mxu2 }
 0x1d1   :  { %v435_v29 = vadd.f32 %v2629_v38, %v434_v27 }
 0x1d3   :  { %v480_v32 = vmax.f32 %v435_v29, 0.0 }
 0x1d4   :  { %v2839_v33 = vpop.f32.mrf.mxu3 }
 0x1d5   :  { %635 = vmatmul.bf16.gmra.mxu2 %v2697_v58  ;;  %v2842_v34 = vpack.c.bf16 %v480_v32, %v479_v31 }
 0x1d7   :  { %759 = vmatmul.bf16.gmra.mxu3 %v2842_v34  ;;  %916 = vmatmul.bf16.gmra.mxu0 %v2842_v34 }
 0x1d8   :  { %v437_v36 = vpop.f32.mrf.mxu2 }
 0x1d9   :  { %v438_v42 = vadd.f32 %v2629_v38, %v437_v36  ;;  %v1062_v36 = vpop.f32.mrf.mxu1 }
 0x1db   :  { %v481_v47 = vmax.f32 %v438_v42, 0.0 }
 0x1dc   :  { %v2856_v58 = vpop.f32.mrf.mxu3 }
 0x1e0   :  { %v439_v43 = vpop.f32.mrf.mxu2 }
 0x1e1   :  { %v440_v45 = vadd.f32 %v2629_v38, %v439_v43  ;;  %v1065_v55 = vpop.f32.mrf.mxu1 }
 0x1e3   :  { %v482_v49 = vmax.f32 %v440_v45, 0.0 }
 0x1e4   :  { %v2862_v50 = vpop.f32.mrf.mxu3 }
 0x1e5   :  { %640 = vmatmul.bf16.gmra.mxu2 %v2711_v12  ;;  %v2867_v54 = vpack.c.bf16 %v482_v49, %v481_v47  ;;  %v956_v12 = vld [vmem:[%s3407_s1 + $0x70] sm:$0xff]  ;;  %v2253_v47 = vld [vmem:[%s3417_s11 + $0x78] sm:$0xff] }
 0x1e6   :  { %v2883_v61 = vpack.c.bf16 %v957_v57, %v956_v12  ;;  %1542 = vmatpush.bf16.msra.mxu0 %v2253_v47  ;;  %v2954_v57 = vpop.f32.mrf.mxu0 }
 0x1e7   :  { %764 = vmatmul.bf16.gmra.mxu3 %v2867_v54  ;;  %921 = vmatmul.bf16.gmra.mxu0 %v2867_v54  ;;  %3423 = vst [vmem:[#allocation8_spill] sm:$0xff] %v2954_v57 }
 0x1e8   :  { %v442_v56 = vpop.f32.mrf.mxu2  ;;  %2081 = vmatmul.msk.bf16.gmra.mxu1 %vm1002_vm1, %v2883_v61 }
 0x1e9   :  { %v443_v2 = vadd.f32 %v2629_v38, %v442_v56  ;;  %v960_v56 = vld [vmem:[%s3407_s1 + $0x90] sm:$0xff] }
 0x1eb   :  { %v483_v9 = vmax.f32 %v443_v2, 0.0 }
 0x1ec   :  { %v2885_v62 = vpop.f32.mrf.mxu3 }
 0x1f0   :  { %v444_v3 = vpop.f32.mrf.mxu2 }
 0x1f1   :  { %v445_v4 = vadd.f32 %v2629_v38, %v444_v3 }
 0x1f3   :  { %v484_v10 = vmax.f32 %v445_v4, 0.0  ;;  %v1067_v4 = vpop.f32.mrf.mxu1 }
 0x1f4   :  { %v2905_v15 = vpop.f32.mrf.mxu3 }
 0x1f5   :  { %645 = vmatmul.bf16.gmra.mxu2 %v2741_v35  ;;  %v2900_v11 = vpack.c.bf16 %v484_v10, %v483_v9  ;;  %v2240_v35 = vld [vmem:[%s3417_s11 + $0x10] sm:$0xff] }
 0x1f6   :  { %1458 = vmatpush.bf16.msra.mxu3 %v2240_v35 }
 0x1f7   :  { %769 = vmatmul.bf16.gmra.mxu3 %v2900_v11  ;;  %926 = vmatmul.bf16.gmra.mxu0 %v2900_v11 }
 0x1f8   :  { %v447_v16 = vpop.f32.mrf.mxu2  ;;  %2082 = vmatmul.msk.bf16.gmra.mxu1 %vm1002_vm1, %v2920_v24 }
 0x1f9   :  { %v448_v27 = vadd.f32 %v2629_v38, %v447_v16  ;;  %v2965_v16 = vpop.f32.mrf.mxu0 }
 0x1fa   :  { %1459 = vmatpush.bf16.msra.mxu3 %v2239_v39  ;;  %3424 = vst [vmem:[#allocation9_spill] sm:$0xff] %v2965_v16  ;;  %v970_v16 = vld [vmem:[%s3407_s1 + $0xe0] sm:$0xff] }
 0x1fb   :  { %v485_v42 = vmax.f32 %v448_v27, 0.0  ;;  %v1070_v21 = vpop.f32.mrf.mxu1 }
 0x1fc   :  { %v2928_v31 = vpop.f32.mrf.mxu3 }
 0x1fe   :  { %1460 = vmatpush.bf16.msra.mxu3 %v2238_v46 }
 0x200   :  { %v449_v29 = vpop.f32.mrf.mxu2 }
 0x201   :  { %v450_v32 = vadd.f32 %v2629_v38, %v449_v29 }
 0x203   :  { %v486_v43 = vmax.f32 %v450_v32, 0.0 }
 0x204   :  { %v2950_v53 = vpop.f32.mrf.mxu3 }
 0x205   :  { %650 = vmatmul.bf16.gmra.mxu2 %v2757_v48  ;;  %v2937_v45 = vpack.c.bf16 %v486_v43, %v485_v42  ;;  %v961_v48 = vld [vmem:[%s3407_s1 + $0x98] sm:$0xff]  ;;  %v1072_v43 = vpop.f32.mrf.mxu1 }
 0x206   :  { %v2952_v12 = vpack.c.bf16 %v961_v48, %v960_v56  ;;  %v2252_v48 = vld [vmem:[%s3417_s11 + $0x70] sm:$0xff] }
 0x207   :  { %774 = vmatmul.bf16.gmra.mxu3 %v2937_v45  ;;  %931 = vmatmul.bf16.gmra.mxu0 %v2937_v45 }
 0x208   :  { %v452_v49 = vpop.f32.mrf.mxu2  ;;  %2083 = vmatmul.msk.bf16.gmra.mxu1 %vm1002_vm1, %v2952_v12  ;;  %1543 = vmatpush.bf16.msra.mxu0 %v2252_v48  ;;  %v967_v48 = vld [vmem:[%s3407_s1 + $0xc8] sm:$0xff] }
 0x209   :  { %v453_v63 = vadd.f32 %v2629_v38, %v452_v49 }
 0x20b   :  { %v487_v6 = vmax.f32 %v453_v63, 0.0 }
 0x20c   :  { %v2960_v10 = vpop.f32.mrf.mxu3 }
 0x210   :  { %v454_v2 = vpop.f32.mrf.mxu2 }
 0x211   :  { %v455_v3 = vadd.f32 %v2629_v38, %v454_v2  ;;  %v2972_v38 = vld [vmem:[%s3413_s7] sm:$0x3]  ;;  %s2305_s7 = smov 128  }
 0x212   :  { %v2981_v39 = vperm.slane %v2972_v38, 0 }
 0x213   :  { %v488_v9 = vmax.f32 %v455_v3, 0.0  ;;  %v1075_v3 = vpop.f32.mrf.mxu1 }
 0x214   :  { %v2987_v29 = vpop.f32.mrf.mxu3 }
 0x215   :  { %655 = vmatmul.bf16.gmra.mxu2 %v2777_v60  ;;  %v2963_v22 = vpack.c.bf16 %v488_v9, %v487_v6  ;;  %v963_v60 = vld [vmem:[%s3407_s1 + $0xa8] sm:$0xff]  ;;  %v964_v6 = vld [vmem:[%s3407_s1 + $0xb0] sm:$0xff] }
 0x216   :  { %v2983_v27 = vpack.c.bf16 %v963_v60, %v962_v23 }
 0x217   :  { %779 = vmatmul.bf16.gmra.mxu3 %v2963_v22  ;;  %936 = vmatmul.bf16.gmra.mxu0 %v2963_v22 }
 0x218   :  { %v616_v35 = vpop.f32.mrf.mxu2  ;;  %2084 = vmatmul.msk.bf16.gmra.mxu1 %vm1002_vm1, %v2983_v27 }
 0x219   :  { %v617_v32 = vadd.f32 %v616_v35, %v2981_v39 }
 0x21b   :  { %v1229_v47 = vmul.f32 %v1060_v18, %v617_v32  ;;  %v965_v18 = vld [vmem:[%s3407_s1 + $0xb8] sm:$0xff]  ;;  %v1077_v60 = vpop.f32.mrf.mxu1 }
 0x21c   :  { %v2995_v2 = vpop.f32.mrf.mxu3 }
 0x220   :  { %v618_v46 = vpop.f32.mrf.mxu2 }
 0x221   :  { %v619_v42 = vadd.f32 %v618_v46, %v2981_v39 }
 0x223   :  { %v1231_v49 = vmul.f32 %v1062_v36, %v619_v42  ;;  %v3003_v36 = vpack.c.bf16 %v965_v18, %v964_v6 }
 0x225   :  { %v1293_v56 = vpack.c.bf16 %v1231_v49, %v1229_v47  ;;  %660 = vmatmul.bf16.gmra.mxu2 %v2798_v8  ;;  %v1080_v49 = vpop.f32.mrf.mxu1 }
 0x227   :  { %1461 = vmatmul.bf16.vlgmr.msra.gmra.mxu3 %v1293_v56  ;;  %v966_v56 = vld [vmem:[%s3407_s1 + $0xc0] sm:$0xff] }
 0x228   :  { %v621_v63 = vpop.f32.mrf.mxu2  ;;  %2085 = vmatmul.msk.bf16.gmra.mxu1 %vm1002_vm1, %v3003_v36  ;;  %v3020_v6 = vpack.c.bf16 %v967_v48, %v966_v56 }
 0x229   :  { %v622_v8 = vadd.f32 %v621_v63, %v2981_v39 }
 0x22a   :  { %v3008_v35 = vpop.f32.mrf.mxu3 }
 0x22b   :  { %v1233_v32 = vmul.f32 %v1065_v55, %v622_v8 }
 0x22d   :  { %v1082_v18 = vpop.f32.mrf.mxu1 }
 0x230   :  { %v623_v9 = vpop.f32.mrf.mxu2 }
 0x231   :  { %v624_v23 = vadd.f32 %v623_v9, %v2981_v39 }
 0x232   :  { %v3018_v63 = vpop.f32.mrf.mxu3 }
 0x233   :  { %v1235_v46 = vmul.f32 %v1067_v4, %v624_v23 }
 0x235   :  { %v1295_v42 = vpack.c.bf16 %v1235_v46, %v1233_v32  ;;  %665 = vmatmul.bf16.gmra.mxu2 %v2819_v20  ;;  %v2251_v46 = vld [vmem:[%s3417_s11 + $0x68] sm:$0xff]  ;;  %v1085_v56 = vpop.f32.mrf.mxu1 }
 0x236   :  { %1544 = vmatpush.bf16.msra.mxu0 %v2251_v46 }
 0x237   :  { %1466 = vmatmul.bf16.gmra.mxu3 %v1295_v42 }
 0x238   :  { %v626_v47 = vpop.f32.mrf.mxu2  ;;  %2086 = vmatmul.msk.bf16.gmra.mxu1 %vm1002_vm1, %v3020_v6 }
 0x239   :  { %v627_v20 = vadd.f32 %v626_v47, %v2981_v39  ;;  %v968_v47 = vld [vmem:[%s3407_s1 + $0xd0] sm:$0xff] }
 0x23a   :  { %v3026_v23 = vpop.f32.mrf.mxu3 }
 0x23b   :  { %v1237_v8 = vmul.f32 %v1070_v21, %v627_v20  ;;  %v969_v21 = vld [vmem:[%s3407_s1 + $0xd8] sm:$0xff] }
 0x240   :  { %v628_v55 = vpop.f32.mrf.mxu2 }
 0x241   :  { %v629_v4 = vadd.f32 %v628_v55, %v2981_v39 }
 0x243   :  { %v1239_v9 = vmul.f32 %v1072_v43, %v629_v4  ;;  %v3038_v43 = vpack.c.bf16 %v969_v21, %v968_v47  ;;  %v1087_v4 = vpop.f32.mrf.mxu1 }
 0x245   :  { %v1297_v32 = vpack.c.bf16 %v1239_v9, %v1237_v8  ;;  %670 = vmatmul.bf16.gmra.mxu2 %v2842_v34  ;;  %v3042_v34 = vpop.f32.mrf.mxu3 }
 0x247   :  { %1471 = vmatmul.bf16.gmra.mxu3 %v1297_v32 }
 0x248   :  { %v631_v42 = vpop.f32.mrf.mxu2  ;;  %2087 = vmatmul.msk.bf16.gmra.mxu1 %vm1002_vm1, %v3038_v43 }
 0x249   :  { %v632_v48 = vadd.f32 %v631_v42, %v2981_v39  ;;  %v971_v42 = vld [vmem:[%s3407_s1 + $0xe8] sm:$0xff] }
 0x24b   :  { %v1241_v8 = vmul.f32 %v1075_v3, %v632_v48  ;;  %v1090_v21 = vpop.f32.mrf.mxu1 }
 0x24d   :  { %v3047_v47 = vpop.f32.mrf.mxu3 }
 0x24e   :  { %3425 = vst [vmem:[#allocation10_spill] sm:$0xff] %v3047_v47 }
 0x250   :  { %v633_v20 = vpop.f32.mrf.mxu2 }
 0x251   :  { %v634_v55 = vadd.f32 %v633_v20, %v2981_v39  ;;  %v3055_v20 = vpack.c.bf16 %v971_v42, %v970_v16  ;;  %v2250_v16 = vld [vmem:[%s3417_s11 + $0x60] sm:$0xff] }
 0x252   :  { %1545 = vmatpush.bf16.msra.mxu0 %v2250_v16 }
 0x253   :  { %v1243_v9 = vmul.f32 %v1077_v60, %v634_v55  ;;  %v1092_v48 = vpop.f32.mrf.mxu1 }
 0x255   :  { %v1299_v32 = vpack.c.bf16 %v1243_v9, %v1241_v8  ;;  %675 = vmatmul.bf16.gmra.mxu2 %v2867_v54  ;;  %v3061_v55 = vpop.f32.mrf.mxu3 }
 0x256   :  { %3426 = vst [vmem:[#allocation11_spill] sm:$0xff] %v3061_v55 }
 0x257   :  { %1476 = vmatmul.bf16.gmra.mxu3 %v1299_v32 }
 0x258   :  { %v636_v46 = vpop.f32.mrf.mxu2  ;;  %2088 = vmatmul.msk.bf16.gmra.mxu1 %vm1002_vm1, %v3055_v20 }
 0x259   :  { %v637_v54 = vadd.f32 %v636_v46, %v2981_v39  ;;  %v972_v46 = vld [vmem:[%s3407_s1 + $0xf0] sm:$0xff] }
 0x25b   :  { %v1245_v8 = vmul.f32 %v1080_v49, %v637_v54  ;;  %v973_v49 = vld [vmem:[%s3407_s1 + $0xf8] sm:$0xff]  ;;  %s1902_s1 = sshll.u32 %s3419_s13, 4  ;;  %s1903_s1 = int_to_ptr.hbm [resolvable:$true] %s1902_s1 }
 0x25d   :  { %v3075_v54 = vpop.f32.mrf.mxu3 }
 0x25e   :  { %3427 = vst [vmem:[#allocation12_spill] sm:$0xff] %v3075_v54 }
 0x260   :  { %v638_v3 = vpop.f32.mrf.mxu2 }
 0x261   :  { %v639_v60 = vadd.f32 %v638_v3, %v2981_v39 }
 0x263   :  { %v1247_v9 = vmul.f32 %v1082_v18, %v639_v60  ;;  %v3073_v18 = vpack.c.bf16 %v973_v49, %v972_v46 }
 0x265   :  { %v1301_v32 = vpack.c.bf16 %v1247_v9, %v1245_v8  ;;  %680 = vmatmul.bf16.gmra.mxu2 %v2900_v11  ;;  %v1095_v57 = vpop.f32.mrf.mxu1  ;;  %v3082_v37 = vpop.f32.mrf.mxu3 }
 0x267   :  { %1481 = vmatmul.bf16.gmra.mxu3 %v1301_v32 }
 0x268   :  { %v641_v42 = vpop.f32.mrf.mxu2  ;;  %2089 = vmatmul.msk.bf16.gmra.mxu1 %vm1002_vm1, %v3073_v18 }
 0x269   :  { %v642_v11 = vadd.f32 %v641_v42, %v2981_v39 }
 0x26b   :  { %v1249_v9 = vmul.f32 %v1085_v56, %v642_v11 }
 0x26d   :  { %v1097_v8 = vpop.f32.mrf.mxu1  ;;  %v3085_v55 = vpop.f32.mrf.mxu3 }
 0x270   :  { %v643_v3 = vpop.f32.mrf.mxu2 }
 0x271   :  { %v644_v60 = vadd.f32 %v643_v3, %v2981_v39 }
 0x273   :  { %v1251_v32 = vmul.f32 %v1087_v4, %v644_v60 }
 0x275   :  { %v1303_v16 = vpack.c.bf16 %v1251_v32, %v1249_v9  ;;  %685 = vmatmul.bf16.gmra.mxu2 %v2937_v45  ;;  %v1100_v49 = vpop.f32.mrf.mxu1  ;;  %v2249_v45 = vld [vmem:[%s3417_s11 + $0x58] sm:$0xff]  ;;  %v3092_v11 = vpop.f32.mrf.mxu3 }
 0x276   :  { %1546 = vmatpush.bf16.msra.mxu0 %v2249_v45 }
 0x277   :  { %1486 = vmatmul.bf16.gmra.mxu3 %v1303_v16 }
 0x278   :  { %v646_v46 = vpop.f32.mrf.mxu2 }
 0x279   :  { %v647_v54 = vadd.f32 %v646_v46, %v2981_v39 }
 0x27b   :  { %v1253_v47 = vmul.f32 %v1090_v21, %v647_v54  ;;  %v2261_v54 = vld [vmem:[%s3418_s12 + $0x38] sm:$0xff] }
 0x27c   :  { %1775 = vmatpush.bf16.msra.mxu1 %v2261_v54 }
 0x27d   :  { %v1102_v5 = vpop.f32.mrf.mxu1 }
 0x280   :  { %v648_v17 = vpop.f32.mrf.mxu2 }
 0x281   :  { %v649_v42 = vadd.f32 %v648_v17, %v2981_v39 }
 0x283   :  { %v1255_v3 = vmul.f32 %v1092_v48, %v649_v42 }
 0x285   :  { %v1305_v56 = vpack.c.bf16 %v1255_v3, %v1253_v47  ;;  %690 = vmatmul.bf16.gmra.mxu2 %v2963_v22  ;;  %v1105_v60 = vpop.f32.mrf.mxu1  ;;  %v3096_v47 = vpop.f32.mrf.mxu3 }
 0x287   :  { %1491 = vmatmul.bf16.gmra.mxu3 %v1305_v56 }
 0x288   :  { %v651_v4 = vpop.f32.mrf.mxu2 }
 0x289   :  { %v652_v9 = vadd.f32 %v651_v4, %v2981_v39 }
 0x28b   :  { %v1257_v21 = vmul.f32 %v1095_v57, %v652_v9 }
 0x28d   :  { %v1107_v46 = vpop.f32.mrf.mxu1  ;;  %v3103_v42 = vpop.f32.mrf.mxu3 }
 0x290   :  { %v653_v32 = vpop.f32.mrf.mxu2 }
 0x291   :  { %v654_v17 = vadd.f32 %v653_v32, %v2981_v39 }
 0x293   :  { %v1259_v48 = vmul.f32 %v1097_v8, %v654_v17 }
 0x295   :  { %v1307_v22 = vpack.c.bf16 %v1259_v48, %v1257_v21  ;;  %2090 = vmatmul.msk.bf16.vlgmr.msra.gmra.mxu2 %vm1002_vm1, %v2737_v30  ;;  %v1110_v56 = vpop.f32.mrf.mxu1  ;;  %v2248_v30 = vld [vmem:[%s3417_s11 + $0x50] sm:$0xff]  ;;  %v3112_v17 = vpop.f32.mrf.mxu3 }
 0x296   :  { %1547 = vmatpush.bf16.msra.mxu0 %v2248_v30  ;;  %3428 = vst [vmem:[#allocation13_spill] sm:$0xff] %v3112_v17 }
 0x297   :  { %1496 = vmatmul.bf16.gmra.mxu3 %v1307_v22 }
 0x298   :  { %v656_v16 = vpop.f32.mrf.mxu2 }
 0x299   :  { %v657_v3 = vadd.f32 %v656_v16, %v2981_v39 }
 0x29b   :  { %v1261_v45 = vmul.f32 %v1100_v49, %v657_v3 }
 0x29d   :  { %v1112_v21 = vpop.f32.mrf.mxu1 }
 0x2a0   :  { %v658_v57 = vpop.f32.mrf.mxu2 }
 0x2a1   :  { %v659_v8 = vadd.f32 %v658_v57, %v2981_v39  ;;  %v2260_v57 = vld [vmem:[%s3418_s12 + $0x30] sm:$0xff] }
 0x2a2   :  { %1776 = vmatpush.bf16.msra.mxu1 %v2260_v57 }
 0x2a3   :  { %v1263_v4 = vmul.f32 %v1102_v5, %v659_v8  ;;  %v3116_v5 = vpop.f32.mrf.mxu3 }
 0x2a4   :  { %3429 = vst [vmem:[#allocation14_spill] sm:$0xff] %v3116_v5 }
 0x2a5   :  { %v1309_v9 = vpack.c.bf16 %v1263_v4, %v1261_v45  ;;  %2091 = vmatmul.msk.bf16.gmra.mxu2 %vm1002_vm1, %v2753_v44  ;;  %v3118_v44 = vpop.f32.mrf.mxu0  ;;  %v1115_v8 = vpop.f32.mrf.mxu1 }
 0x2a7   :  { %1501 = vmatmul.bf16.gmra.mxu3 %v1309_v9 }
 0x2a8   :  { %v661_v32 = vpop.f32.mrf.mxu2 }
 0x2a9   :  { %v662_v48 = vadd.f32 %v661_v32, %v2981_v39 }
 0x2ab   :  { %v1265_v54 = vmul.f32 %v1105_v60, %v662_v48  ;;  %v3125_v4 = vpop.f32.mrf.mxu3 }
 0x2ac   :  { %3430 = vst [vmem:[#allocation15_spill] sm:$0xff] %v3125_v4 }
 0x2ad   :  { %v3127_v9 = vpop.f32.mrf.mxu0  ;;  %v1117_v30 = vpop.f32.mrf.mxu1 }
 0x2b0   :  { %v663_v22 = vpop.f32.mrf.mxu2 }
 0x2b1   :  { %v664_v49 = vadd.f32 %v663_v22, %v2981_v39 }
 0x2b3   :  { %v1267_v16 = vmul.f32 %v1107_v46, %v664_v49  ;;  %v2247_v49 = vld [vmem:[%s3417_s11 + $0x48] sm:$0xff] }
 0x2b4   :  { %1548 = vmatpush.bf16.msra.mxu0 %v2247_v49 }
 0x2b5   :  { %v1311_v3 = vpack.c.bf16 %v1267_v16, %v1265_v54  ;;  %2092 = vmatmul.msk.bf16.gmra.mxu2 %vm1002_vm1, %v2768_v52  ;;  %v3136_v54 = vpop.f32.mrf.mxu3  ;;  %v1120_v57 = vpop.f32.mrf.mxu1 }
 0x2b6   :  { %3431 = vst [vmem:[#allocation16_spill] sm:$0xff] %v3136_v54 }
 0x2b7   :  { %1506 = vmatmul.bf16.gmra.mxu3 %v1311_v3  ;;  %v3138_v3 = vpop.f32.mrf.mxu0 }
 0x2b8   :  { %v666_v45 = vpop.f32.mrf.mxu2 }
 0x2b9   :  { %v667_v60 = vadd.f32 %v666_v45, %v2981_v39 }
 0x2bb   :  { %v1269_v48 = vmul.f32 %v1110_v56, %v667_v60 }
 0x2c0   :  { %v668_v46 = vpop.f32.mrf.mxu2 }
 0x2c1   :  { %v669_v32 = vadd.f32 %v668_v46, %v2981_v39 }
 0x2c3   :  { %v1271_v52 = vmul.f32 %v1112_v21, %v669_v32  ;;  %v3141_v21 = vpop.f32.mrf.mxu3 }
 0x2c5   :  { %v1313_v22 = vpack.c.bf16 %v1271_v52, %v1269_v48  ;;  %2093 = vmatmul.msk.bf16.gmra.mxu2 %vm1002_vm1, %v2787_v0  ;;  %v3144_v0 = vpop.f32.mrf.mxu0  ;;  %v1122_v48 = vpop.f32.mrf.mxu1 }
 0x2c7   :  { %1511 = vmatmul.bf16.gmra.mxu3 %v1313_v22  ;;  %v2259_v22 = vld [vmem:[%s3418_s12 + $0x28] sm:$0xff] }
 0x2c8   :  { %v671_v16 = vpop.f32.mrf.mxu2  ;;  %1777 = vmatpush.bf16.msra.mxu1 %v2259_v22 }
 0x2c9   :  { %v672_v45 = vadd.f32 %v671_v16, %v2981_v39 }
 0x2cb   :  { %v1273_v46 = vmul.f32 %v1115_v8, %v672_v45  ;;  %v3151_v16 = vpop.f32.mrf.mxu3 }
 0x2cd   :  { %v3153_v54 = vpop.f32.mrf.mxu0 }
 0x2ce   :  { %3432 = vst [vmem:[#allocation17_spill] sm:$0xff] %v3153_v54 }
 0x2d0   :  { %v673_v56 = vpop.f32.mrf.mxu2 }
 0x2d1   :  { %v674_v60 = vadd.f32 %v673_v56, %v2981_v39  ;;  %v1125_v56 = vpop.f32.mrf.mxu1 }
 0x2d3   :  { %v1275_v32 = vmul.f32 %v1117_v30, %v674_v60 }
 0x2d5   :  { %v1315_v52 = vpack.c.bf16 %v1275_v32, %v1273_v46  ;;  %2094 = vmatmul.msk.bf16.gmra.mxu2 %vm1002_vm1, %v2808_v13  ;;  %v3157_v13 = vpop.f32.mrf.mxu3  ;;  %v3164_v22 = vpop.f32.mrf.mxu0 }
 0x2d6   :  { %3433 = vst [vmem:[#allocation18_spill] sm:$0xff] %v3164_v22 }
 0x2d7   :  { %1516 = vmatmul.bf16.gmra.mxu3 %v1315_v52  ;;  %v2246_v52 = vld [vmem:[%s3417_s11 + $0x40] sm:$0xff] }
 0x2d8   :  { %v676_v49 = vpop.f32.mrf.mxu2  ;;  %1549 = vmatpush.bf16.msra.mxu0 %v2246_v52 }
 0x2d9   :  { %v677_v8 = vadd.f32 %v676_v49, %v2981_v39  ;;  %v1127_v4 = vpop.f32.mrf.mxu1 }
 0x2db   :  { %v1277_v60 = vmul.f32 %v1120_v57, %v677_v8 }
 0x2dd   :  { %v3166_v54 = vpop.f32.mrf.mxu3 }
 0x2e0   :  { %v678_v30 = vpop.f32.mrf.mxu2 }
 0x2e1   :  { %v679_v45 = vadd.f32 %v678_v30, %v2981_v39  ;;  %v3170_v30 = vpop.f32.mrf.mxu0 }
 0x2e2   :  { %3434 = vst [vmem:[#allocation19_spill] sm:$0xff] %v3170_v30 }
 0x2e3   :  { %v1279_v46 = vmul.f32 %v1122_v48, %v679_v45 }
 0x2e5   :  { %v1317_v32 = vpack.c.bf16 %v1279_v46, %v1277_v60  ;;  %2095 = vmatmul.msk.bf16.gmra.mxu2 %vm1002_vm1, %v2829_v25  ;;  %v1130_v25 = vpop.f32.mrf.mxu1 }
 0x2e7   :  { %1521 = vmatmul.bf16.gmra.mxu3 %v1317_v32  ;;  %v2258_v32 = vld [vmem:[%s3418_s12 + $0x20] sm:$0xff] }
 0x2e8   :  { %v681_v49 = vpop.f32.mrf.mxu2  ;;  %1778 = vmatpush.bf16.msra.mxu1 %v2258_v32 }
 0x2e9   :  { %v682_v57 = vadd.f32 %v681_v49, %v2981_v39  ;;  %v3177_v49 = vpop.f32.mrf.mxu3  ;;  %v3179_v22 = vpop.f32.mrf.mxu0 }
 0x2ea   :  { %3435 = vst [vmem:[#allocation20_spill] sm:$0xff] %v3179_v22 }
 0x2eb   :  { %v1281_v45 = vmul.f32 %v1125_v56, %v682_v57 }
 0x2f0   :  { %v683_v48 = vpop.f32.mrf.mxu2 }
 0x2f1   :  { %v684_v8 = vadd.f32 %v683_v48, %v2981_v39  ;;  %v1132_v48 = vpop.f32.mrf.mxu1  ;;  %v3183_v57 = vpop.f32.mrf.mxu3 }
 0x2f3   :  { %v1283_v60 = vmul.f32 %v1127_v4, %v684_v8 }
 0x2f5   :  { %v1319_v46 = vpack.c.bf16 %v1283_v60, %v1281_v45  ;;  %2096 = vmatmul.msk.bf16.gmra.mxu2 %vm1002_vm1, %v2854_v41  ;;  %v3185_v45 = vpop.f32.mrf.mxu0 }
 0x2f7   :  { %1526 = vmatmul.bf16.gmra.mxu3 %v1319_v46 }
 0x2f8   :  { %v686_v52 = vpop.f32.mrf.mxu2 }
 0x2f9   :  { %v687_v30 = vadd.f32 %v686_v52, %v2981_v39  ;;  %v1135_v46 = vpop.f32.mrf.mxu1  ;;  %v3189_v22 = vpop.f32.mrf.mxu3 }
 0x2fb   :  { %v1285_v41 = vmul.f32 %v1130_v25, %v687_v30 }
 0x2fd   :  { %v3191_v5 = vpop.f32.mrf.mxu0 }
 0x300   :  { %v688_v56 = vpop.f32.mrf.mxu2 }
 0x301   :  { %v689_v4 = vadd.f32 %v688_v56, %v2981_v39  ;;  %v1137_v17 = vpop.f32.mrf.mxu1 }
 0x303   :  { %v1287_v8 = vmul.f32 %v1132_v48, %v689_v4  ;;  %v2257_v4 = vld [vmem:[%s3418_s12 + $0x18] sm:$0xff] }
 0x304   :  { %1779 = vmatpush.bf16.msra.mxu1 %v2257_v4 }
 0x305   :  { %v1321_v60 = vpack.c.bf16 %v1287_v8, %v1285_v41  ;;  %2097 = vmatmul.msk.bf16.gmra.mxu2 %vm1002_vm1, %v2883_v61  ;;  %v3200_v41 = vpop.f32.mrf.mxu3  ;;  %v3202_v8 = vpop.f32.mrf.mxu0 }
 0x307   :  { %1531 = vmatmul.bf16.gmra.mxu3 %v1321_v60 }
 0x308   :  { %v691_v32 = vpop.f32.mrf.mxu2 }
 0x309   :  { %v692_v52 = vadd.f32 %v691_v32, %v2981_v39  ;;  %v3205_v32 = vperm.slane %v2972_v38, 1 }
 0x30b   :  { %v1289_v25 = vmul.f32 %v1135_v46, %v692_v52  ;;  %v711_v38 = vadd.f32 %v2795_v7, %v3205_v32  ;;  %v716_v7 = vadd.f32 %v2816_v19, %v3205_v32  ;;  %v723_v19 = vadd.f32 %v2856_v58, %v3205_v32 }
 0x30c   :  { %v726_v58 = vadd.f32 %v2862_v50, %v3205_v32  ;;  %v733_v50 = vadd.f32 %v2928_v31, %v3205_v32  ;;  %v736_v31 = vadd.f32 %v2950_v53, %v3205_v32  ;;  %v743_v53 = vadd.f32 %v2995_v2, %v3205_v32 }
 0x310   :  { %v693_v56 = vpop.f32.mrf.mxu2 }
 0x311   :  { %v694_v30 = vadd.f32 %v693_v56, %v2981_v39  ;;  %v706_v39 = vadd.f32 %v2774_v59, %v3205_v32  ;;  %v713_v59 = vadd.f32 %v2810_v14, %v3205_v32  ;;  %v718_v14 = vadd.f32 %v2831_v26, %v3205_v32 }
 0x313   :  { %v1291_v48 = vmul.f32 %v1137_v17, %v694_v30  ;;  %v708_v17 = vadd.f32 %v2789_v1, %v3205_v32 }
 0x315   :  { %v1323_v61 = vpack.c.bf16 %v1291_v48, %v1289_v25  ;;  %2098 = vmatmul.msk.bf16.gmra.mxu2 %vm1002_vm1, %v2920_v24  ;;  %v3211_v24 = vpop.f32.mrf.mxu0 }
 0x317   :  { %1536 = vmatmul.bf16.gmra.mxu3 %v1323_v61 }
 0x318   :  { %v1149_v60 = vpop.f32.mrf.mxu2 }
 0x319   :  { %v1230_v52 = vmul.f32 %v1149_v60, %v706_v39  ;;  %v2256_v39 = vld [vmem:[%s3418_s12 + $0x10] sm:$0xff] }
 0x31a   :  { %1780 = vmatpush.bf16.msra.mxu1 %v2256_v39 }
 0x31d   :  { %v3215_v48 = vpop.f32.mrf.mxu0 }
 0x320   :  { %v1151_v46 = vpop.f32.mrf.mxu2 }
 0x321   :  { %v1232_v56 = vmul.f32 %v1151_v46, %v708_v17 }
 0x323   :  { %v1294_v30 = vpack.c.bf16 %v1232_v56, %v1230_v52 }
 0x325   :  { %2099 = vmatmul.msk.bf16.gmra.mxu2 %vm1002_vm1, %v2952_v12  ;;  %1550 = vmatmul.bf16.vlgmr.msra.gmra.mxu0 %v1294_v30  ;;  %v3226_v12 = vpop.f32.mrf.mxu0 }
 0x328   :  { %v1154_v25 = vpop.f32.mrf.mxu2 }
 0x329   :  { %v1234_v4 = vmul.f32 %v1154_v25, %v711_v38 }
 0x32d   :  { %v3232_v46 = vpop.f32.mrf.mxu0 }
 0x330   :  { %v1156_v1 = vpop.f32.mrf.mxu2 }
 0x331   :  { %v1236_v61 = vmul.f32 %v1156_v1, %v713_v59  ;;  %v721_v59 = vadd.f32 %v2839_v33, %v3205_v32 }
 0x333   :  { %v1296_v60 = vpack.c.bf16 %v1236_v61, %v1234_v4 }
 0x335   :  { %2100 = vmatmul.msk.bf16.gmra.mxu2 %vm1002_vm1, %v2983_v27  ;;  %1555 = vmatmul.bf16.gmra.mxu0 %v1296_v60  ;;  %v3236_v38 = vpop.f32.mrf.mxu0  ;;  %v2255_v60 = vld [vmem:[%s3418_s12 + $0x8] sm:$0xff] }
 0x336   :  { %1781 = vmatpush.bf16.msra.mxu1 %v2255_v60 }
 0x338   :  { %v1159_v17 = vpop.f32.mrf.mxu2 }
 0x339   :  { %v1238_v56 = vmul.f32 %v1159_v17, %v716_v7  ;;  %v728_v17 = vadd.f32 %v2885_v62, %v3205_v32 }
 0x33d   :  { %v3245_v39 = vpop.f32.mrf.mxu0 }
 0x340   :  { %v1161_v52 = vpop.f32.mrf.mxu2 }
 0x341   :  { %v1240_v30 = vmul.f32 %v1161_v52, %v718_v14 }
 0x343   :  { %v1298_v25 = vpack.c.bf16 %v1240_v30, %v1238_v56 }
 0x345   :  { %2101 = vmatmul.msk.bf16.gmra.mxu2 %vm1002_vm1, %v3003_v36  ;;  %1560 = vmatmul.bf16.gmra.mxu0 %v1298_v25  ;;  %v3249_v33 = vpop.f32.mrf.mxu0  ;;  %v731_v25 = vadd.f32 %v2905_v15, %v3205_v32 }
 0x348   :  { %v1164_v27 = vpop.f32.mrf.mxu2 }
 0x349   :  { %v1242_v1 = vmul.f32 %v1164_v27, %v721_v59 }
 0x350   :  { %v1166_v26 = vpop.f32.mrf.mxu2 }
 0x351   :  { %v1244_v4 = vmul.f32 %v1166_v26, %v723_v19 }
 0x353   :  { %v1300_v61 = vpack.c.bf16 %v1244_v4, %v1242_v1  ;;  %v738_v4 = vadd.f32 %v2960_v10, %v3205_v32 }
 0x355   :  { %2102 = vmatmul.msk.bf16.gmra.mxu2 %vm1002_vm1, %v3020_v6  ;;  %1565 = vmatmul.bf16.gmra.mxu0 %v1300_v61  ;;  %v3257_v6 = vpop.f32.mrf.mxu0 }
 0x358   :  { %v1169_v36 = vpop.f32.mrf.mxu2 }
 0x359   :  { %v1246_v14 = vmul.f32 %v1169_v36, %v726_v58 }
 0x35d   :  { %v3263_v19 = vpop.f32.mrf.mxu0 }
 0x360   :  { %v1171_v7 = vpop.f32.mrf.mxu2 }
 0x361   :  { %v1248_v52 = vmul.f32 %v1171_v7, %v728_v17  ;;  %v741_v7 = vadd.f32 %v2987_v29, %v3205_v32 }
 0x363   :  { %v1302_v56 = vpack.c.bf16 %v1248_v52, %v1246_v14 }
 0x365   :  { %2103 = vmatmul.msk.bf16.gmra.mxu2 %vm1002_vm1, %v3038_v43  ;;  %1570 = vmatmul.bf16.gmra.mxu0 %v1302_v56  ;;  %v2254_v43 = vld [vmem:[%s3418_s12] sm:$0xff]  ;;  %v3270_v15 = vpop.f32.mrf.mxu0 }
 0x366   :  { %1782 = vmatpush.bf16.msra.mxu1 %v2254_v43 }
 0x368   :  { %v1174_v30 = vpop.f32.mrf.mxu2 }
 0x369   :  { %v1250_v59 = vmul.f32 %v1174_v30, %v731_v25 }
 0x370   :  { %v1176_v27 = vpop.f32.mrf.mxu2 }
 0x371   :  { %v1252_v62 = vmul.f32 %v1176_v27, %v733_v50  ;;  %v748_v27 = vadd.f32 %v3018_v63, %v3205_v32 }
 0x373   :  { %v1304_v26 = vpack.c.bf16 %v1252_v62, %v1250_v59 }
 0x375   :  { %2104 = vmatmul.msk.bf16.gmra.mxu2 %vm1002_vm1, %v3055_v20  ;;  %1575 = vmatmul.bf16.gmra.mxu0 %v1304_v26  ;;  %v3278_v20 = vpop.f32.mrf.mxu0 }
 0x378   :  { %v1179_v1 = vpop.f32.mrf.mxu2 }
 0x379   :  { %v1254_v60 = vmul.f32 %v1179_v1, %v736_v31  ;;  %v3296_v31 = vld [vmem:[%s3415_s9] ss:$0 sm:$0xff]  ;;  %s2304_s9 = smov [#allocation2]  }
 0x37a   :  { %v863_v63 = vadd.f32 %v3296_v31, %v2836_v28  ;;  %v3307_v28 = vpop.f32.mrf.mxu3  ;;  %s1900_s27 = sshll.u32 %s2304_s9, 4  ;;  %s1901_s27 = int_to_ptr.vmem [resolvable:$true] %s1900_s27 }
 0x37d   :  { %v3284_v14 = vpop.f32.mrf.mxu0 }
 0x380   :  { %v1181_v61 = vpop.f32.mrf.mxu2 }
 0x381   :  { %v1256_v36 = vmul.f32 %v1181_v61, %v738_v4 }
 0x383   :  { %v1306_v58 = vpack.c.bf16 %v1256_v36, %v1254_v60  ;;  %v865_v60 = vadd.f32 %v3296_v31, %v2852_v40 }
 0x385   :  { %2105 = vmatmul.msk.bf16.gmra.mxu2 %vm1002_vm1, %v3073_v18  ;;  %1580 = vmatmul.bf16.gmra.mxu0 %v1306_v58  ;;  %v3286_v50 = vpop.f32.mrf.mxu0  ;;  %v746_v18 = vadd.f32 %v3008_v35, %v3205_v32  ;;  %v753_v58 = vadd.f32 %v3042_v34, %v3205_v32  ;;  %v868_v34 = vadd.f32 %v3296_v31, %v2864_v51 }
 0x388   :  { %v1184_v17 = vpop.f32.mrf.mxu2 }
 0x389   :  { %v1258_v52 = vmul.f32 %v1184_v17, %v741_v7 }
 0x390   :  { %v1186_v10 = vpop.f32.mrf.mxu2 }
 0x391   :  { %v1260_v56 = vmul.f32 %v1186_v10, %v743_v53 }
 0x393   :  { %v1308_v30 = vpack.c.bf16 %v1260_v56, %v1258_v52 }
 0x395   :  { %1585 = vmatmul.bf16.gmra.mxu0 %v1308_v30 }
 0x398   :  { %v1189_v25 = vpop.f32.mrf.mxu2 }
 0x399   :  { %v1262_v59 = vmul.f32 %v1189_v25, %v746_v18 }
 0x3a0   :  { %v1191_v29 = vpop.f32.mrf.mxu2 }
 0x3a1   :  { %v1264_v62 = vmul.f32 %v1191_v29, %v748_v27  ;;  %v3436_v29 = vld [vmem:[#allocation5_spill] sm:$0xff] }
 0x3a2   :  { %v1551_v2 = vpop.f32.mrf.mxu0 }
 0x3a3   :  { %v1310_v26 = vpack.c.bf16 %v1264_v62, %v1262_v59  ;;  %v1552_v43 = vadd.f32 %v1551_v2, %v3141_v21  ;;  %v751_v21 = vadd.f32 %v3026_v23, %v3205_v32  ;;  %v870_v59 = vadd.f32 %v3296_v31, %v3436_v29  ;;  %v1484_v2 = vpop.f32.mrf.mxu3 }
 0x3a5   :  { %1590 = vmatmul.bf16.gmra.mxu0 %v1310_v26  ;;  %v1631_v61 = vmax.f32 %v1552_v43, 0.0  ;;  %v3437_v26 = vld [vmem:[#allocation10_spill] sm:$0xff] }
 0x3a6   :  { %v756_v43 = vadd.f32 %v3437_v26, %v3205_v32 }
 0x3a7   :  { %v1663_v17 = vmul.f32 %v1631_v61, %v863_v63 }
 0x3a8   :  { %v1194_v1 = vpop.f32.mrf.mxu2 }
 0x3a9   :  { %v1266_v10 = vmul.f32 %v1194_v1, %v751_v21  ;;  %v3438_v1 = vld [vmem:[#allocation11_spill] sm:$0xff] }
 0x3aa   :  { %v1553_v4 = vpop.f32.mrf.mxu0 }
 0x3ab   :  { %v1554_v35 = vadd.f32 %v1553_v4, %v3151_v16  ;;  %v758_v4 = vadd.f32 %v3438_v1, %v3205_v32 }
 0x3ad   :  { %v1632_v36 = vmax.f32 %v1554_v35, 0.0 }
 0x3af   :  { %v1664_v7 = vmul.f32 %v1632_v36, %v865_v60 }
 0x3b0   :  { %v1196_v53 = vpop.f32.mrf.mxu2 }
 0x3b1   :  { %v1695_v52 = vpack.c.bf16 %v1664_v7, %v1663_v17  ;;  %v1268_v56 = vmul.f32 %v1196_v53, %v753_v58  ;;  %v3320_v58 = vpop.f32.mrf.mxu3 }
 0x3b2   :  { %v1556_v16 = vpop.f32.mrf.mxu0 }
 0x3b3   :  { %v1312_v30 = vpack.c.bf16 %v1268_v56, %v1266_v10  ;;  %1783 = vmatmul.bf16.vlgmr.msra.gmra.mxu1 %v1695_v52  ;;  %v1557_v40 = vadd.f32 %v1556_v16, %v3157_v13  ;;  %v3439_v52 = vld [vmem:[#allocation6_spill] sm:$0xff]  ;;  %v3440_v16 = vld [vmem:[#allocation7_spill] sm:$0xff] }
 0x3b4   :  { %v873_v56 = vadd.f32 %v3296_v31, %v3439_v52 }
 0x3b5   :  { %1595 = vmatmul.bf16.gmra.mxu0 %v1312_v30  ;;  %v1633_v23 = vmax.f32 %v1557_v40, 0.0  ;;  %v875_v30 = vadd.f32 %v3296_v31, %v3440_v16 }
 0x3b7   :  { %v1665_v13 = vmul.f32 %v1633_v23, %v868_v34 }
 0x3b8   :  { %v1199_v25 = vpop.f32.mrf.mxu2 }
 0x3b9   :  { %v1270_v63 = vmul.f32 %v1199_v25, %v756_v43  ;;  %v3441_v25 = vld [vmem:[#allocation12_spill] sm:$0xff] }
 0x3ba   :  { %v1558_v18 = vpop.f32.mrf.mxu0 }
 0x3bb   :  { %v1559_v27 = vadd.f32 %v1558_v18, %v3166_v54  ;;  %v761_v18 = vadd.f32 %v3441_v25, %v3205_v32 }
 0x3bd   :  { %v1634_v62 = vmax.f32 %v1559_v27, 0.0 }
 0x3bf   :  { %v1666_v61 = vmul.f32 %v1634_v62, %v870_v59 }
 0x3c0   :  { %v1201_v35 = vpop.f32.mrf.mxu2 }
 0x3c1   :  { %v1272_v60 = vmul.f32 %v1201_v35, %v758_v4  ;;  %v1696_v54 = vpack.c.bf16 %v1666_v61, %v1665_v13 }
 0x3c2   :  { %v1561_v36 = vpop.f32.mrf.mxu0 }
 0x3c3   :  { %v1314_v21 = vpack.c.bf16 %v1272_v60, %v1270_v63  ;;  %1788 = vmatmul.bf16.gmra.mxu1 %v1696_v54  ;;  %v1562_v51 = vadd.f32 %v1561_v36, %v3177_v49  ;;  %v763_v49 = vadd.f32 %v3082_v37, %v3205_v32  ;;  %v3442_v37 = vld [vmem:[#allocation8_spill] sm:$0xff]  ;;  %v3443_v54 = vld [vmem:[#allocation9_spill] sm:$0xff] }
 0x3c4   :  { %v878_v60 = vadd.f32 %v3296_v31, %v3442_v37  ;;  %v880_v36 = vadd.f32 %v3296_v31, %v3443_v54 }
 0x3c5   :  { %1600 = vmatmul.bf16.gmra.mxu0 %v1314_v21  ;;  %v1635_v53 = vmax.f32 %v1562_v51, 0.0  ;;  %v766_v51 = vadd.f32 %v3085_v55, %v3205_v32 }
 0x3c7   :  { %v1667_v23 = vmul.f32 %v1635_v53, %v873_v56 }
 0x3c8   :  { %v1204_v17 = vpop.f32.mrf.mxu2 }
 0x3c9   :  { %v1274_v29 = vmul.f32 %v1204_v17, %v761_v18  ;;  %v768_v17 = vadd.f32 %v3092_v11, %v3205_v32  ;;  %v883_v11 = vadd.f32 %v3296_v31, %v3118_v44 }
 0x3ca   :  { %v1563_v7 = vpop.f32.mrf.mxu0 }
 0x3cb   :  { %v1564_v10 = vadd.f32 %v1563_v7, %v3183_v57  ;;  %v1489_v57 = vpop.f32.mrf.mxu3 }
 0x3cd   :  { %v1636_v40 = vmax.f32 %v1564_v10, 0.0 }
 0x3cf   :  { %v1668_v27 = vmul.f32 %v1636_v40, %v875_v30 }
 0x3d0   :  { %v1206_v34 = vpop.f32.mrf.mxu2 }
 0x3d1   :  { %v1276_v59 = vmul.f32 %v1206_v34, %v763_v49  ;;  %v1697_v62 = vpack.c.bf16 %v1668_v27, %v1667_v23  ;;  %v885_v23 = vadd.f32 %v3296_v31, %v3127_v9  ;;  %v771_v34 = vadd.f32 %v3096_v47, %v3205_v32 }
 0x3d2   :  { %v1566_v26 = vpop.f32.mrf.mxu0 }
 0x3d3   :  { %v1316_v43 = vpack.c.bf16 %v1276_v59, %v1274_v29  ;;  %1793 = vmatmul.bf16.gmra.mxu1 %v1697_v62  ;;  %v1567_v1 = vadd.f32 %v1566_v26, %v3189_v22  ;;  %v1492_v63 = vpop.f32.mrf.mxu3  ;;  %v773_v29 = vadd.f32 %v3103_v42, %v3205_v32  ;;  %v888_v42 = vadd.f32 %v3296_v31, %v3138_v3 }
 0x3d5   :  { %1605 = vmatmul.bf16.gmra.mxu0 %v1316_v43  ;;  %v1637_v61 = vmax.f32 %v1567_v1, 0.0 }
 0x3d7   :  { %v1669_v22 = vmul.f32 %v1637_v61, %v878_v60  ;;  %v890_v60 = vadd.f32 %v3296_v31, %v3144_v0 }
 0x3d8   :  { %v1209_v4 = vpop.f32.mrf.mxu2 }
 0x3d9   :  { %v1278_v10 = vmul.f32 %v1209_v4, %v766_v51  ;;  %v3445_v51 = vld [vmem:[#allocation14_spill] sm:$0xff] }
 0x3da   :  { %v1568_v13 = vpop.f32.mrf.mxu0 }
 0x3db   :  { %v1569_v35 = vadd.f32 %v1568_v13, %v3200_v41  ;;  %v1494_v30 = vpop.f32.mrf.mxu3 }
 0x3dd   :  { %v1638_v21 = vmax.f32 %v1569_v35, 0.0 }
 0x3df   :  { %v1670_v7 = vmul.f32 %v1638_v21, %v880_v36  ;;  %v3444_v36 = vld [vmem:[#allocation13_spill] sm:$0xff] }
 0x3e0   :  { %v1211_v53 = vpop.f32.mrf.mxu2  ;;  %v776_v21 = vadd.f32 %v3444_v36, %v3205_v32 }
 0x3e1   :  { %v1280_v52 = vmul.f32 %v1211_v53, %v768_v17  ;;  %v1698_v41 = vpack.c.bf16 %v1670_v7, %v1669_v22  ;;  %v778_v17 = vadd.f32 %v3445_v51, %v3205_v32 }
 0x3e2   :  { %v1571_v56 = vpop.f32.mrf.mxu0 }
 0x3e3   :  { %v1318_v16 = vpack.c.bf16 %v1280_v52, %v1278_v10  ;;  %1798 = vmatmul.bf16.gmra.mxu1 %v1698_v41  ;;  %v1572_v40 = vadd.f32 %v1571_v56, %v3307_v28  ;;  %v1497_v28 = vpop.f32.mrf.mxu3 }
 0x3e5   :  { %1610 = vmatmul.bf16.gmra.mxu0 %v1318_v16  ;;  %v1639_v49 = vmax.f32 %v1572_v40, 0.0 }
 0x3e7   :  { %v1671_v59 = vmul.f32 %v1639_v49, %v883_v11 }
 0x3e8   :  { %v1214_v25 = vpop.f32.mrf.mxu2 }
 0x3e9   :  { %v1282_v43 = vmul.f32 %v1214_v25, %v771_v34  ;;  %v3448_v34 = vld [vmem:[#allocation15_spill] sm:$0xff] }
 0x3ea   :  { %v1573_v18 = vpop.f32.mrf.mxu0 }
 0x3eb   :  { %v1574_v55 = vadd.f32 %v1573_v18, %v1484_v2  ;;  %v1499_v61 = vpop.f32.mrf.mxu3  ;;  %v3446_v18 = vld [vmem:[#allocation17_spill] sm:$0xff] }
 0x3ec   :  { %v893_v49 = vadd.f32 %v3296_v31, %v3446_v18 }
 0x3ed   :  { %v1640_v27 = vmax.f32 %v1574_v55, 0.0  ;;  %v3447_v55 = vld [vmem:[#allocation18_spill] sm:$0xff] }
 0x3ee   :  { %v895_v11 = vadd.f32 %v3296_v31, %v3447_v55 }
 0x3ef   :  { %v1672_v62 = vmul.f32 %v1640_v27, %v885_v23 }
 0x3f0   :  { %v1216_v26 = vpop.f32.mrf.mxu2 }
 0x3f1   :  { %v1284_v1 = vmul.f32 %v1216_v26, %v773_v29  ;;  %v1699_v2 = vpack.c.bf16 %v1672_v62, %v1671_v59  ;;  %v781_v29 = vadd.f32 %v3448_v34, %v3205_v32  ;;  %v3449_v59 = vld [vmem:[#allocation16_spill] sm:$0xff] }
 0x3f2   :  { %v1576_v4 = vpop.f32.mrf.mxu0  ;;  %v783_v62 = vadd.f32 %v3449_v59, %v3205_v32 }
 0x3f3   :  { %v1320_v13 = vpack.c.bf16 %v1284_v1, %v1282_v43  ;;  %1803 = vmatmul.bf16.gmra.mxu1 %v1699_v2  ;;  %v1577_v44 = vadd.f32 %v1576_v4, %v3320_v58  ;;  %v1502_v3 = vpop.f32.mrf.mxu3 }
 0x3f5   :  { %1615 = vmatmul.bf16.gmra.mxu0 %v1320_v13  ;;  %v1641_v47 = vmax.f32 %v1577_v44, 0.0 }
 0x3f7   :  { %v1673_v22 = vmul.f32 %v1641_v47, %v888_v42  ;;  %v3450_v42 = vld [vmem:[#allocation19_spill] sm:$0xff] }
 0x3f8   :  { %v1219_v9 = vpop.f32.mrf.mxu2 }
 0x3f9   :  { %v1286_v53 = vmul.f32 %v1219_v9, %v776_v21 }
 0x3fa   :  { %v1578_v35 = vpop.f32.mrf.mxu0 }
 0x3fb   :  { %v1579_v37 = vadd.f32 %v1578_v35, %v1489_v57  ;;  %v1504_v27 = vpop.f32.mrf.mxu3 }
 0x3fd   :  { %v1642_v54 = vmax.f32 %v1579_v37, 0.0 }
 0x3ff   :  { %v1674_v58 = vmul.f32 %v1642_v54, %v890_v60  ;;  %v898_v60 = vadd.f32 %v3296_v31, %v3450_v42  ;;  %v3451_v54 = vld [vmem:[#allocation20_spill] sm:$0xff] }
 0x400   :  { %v1221_v7 = vpop.f32.mrf.mxu2  ;;  %v900_v32 = vadd.f32 %v3296_v31, %v3451_v54 }
 0x401   :  { %v1288_v10 = vmul.f32 %v1221_v7, %v778_v17  ;;  %v1700_v52 = vpack.c.bf16 %v1674_v58, %v1673_v22 }
 0x402   :  { %v1581_v57 = vpop.f32.mrf.mxu0 }
 0x403   :  { %v1322_v41 = vpack.c.bf16 %v1288_v10, %v1286_v53  ;;  %1808 = vmatmul.bf16.gmra.mxu1 %v1700_v52  ;;  %v1582_v56 = vadd.f32 %v1581_v57, %v1492_v63  ;;  %v1507_v9 = vpop.f32.mrf.mxu3  ;;  %v905_v57 = vadd.f32 %v3296_v31, %v3191_v5  ;;  %v910_v5 = vadd.f32 %v3296_v31, %v3211_v24 }
 0x404   :  { %v915_v24 = vadd.f32 %v3296_v31, %v3226_v12  ;;  %v920_v12 = vadd.f32 %v3296_v31, %v3236_v38  ;;  %v925_v38 = vadd.f32 %v3296_v31, %v3249_v33  ;;  %v930_v33 = vadd.f32 %v3296_v31, %v3263_v19 }
 0x405   :  { %1620 = vmatmul.bf16.gmra.mxu0 %v1322_v41  ;;  %v1643_v40 = vmax.f32 %v1582_v56, 0.0  ;;  %v935_v19 = vadd.f32 %v3296_v31, %v3278_v20  ;;  %v940_v20 = vadd.f32 %v3296_v31, %v3286_v50 }
 0x407   :  { %v1675_v26 = vmul.f32 %v1643_v40, %v893_v49 }
 0x408   :  { %v1224_v0 = vpop.f32.mrf.mxu2 }
 0x409   :  { %v1290_v1 = vmul.f32 %v1224_v0, %v781_v29 }
 0x40a   :  { %v1583_v16 = vpop.f32.mrf.mxu0 }
 0x40b   :  { %v1584_v25 = vadd.f32 %v1583_v16, %v1494_v30  ;;  %v1509_v22 = vpop.f32.mrf.mxu3 }
 0x40d   :  { %v1644_v23 = vmax.f32 %v1584_v25, 0.0 }
 0x40f   :  { %v1676_v63 = vmul.f32 %v1644_v23, %v895_v11 }
 0x410   :  { %v1226_v43 = vpop.f32.mrf.mxu2 }
 0x411   :  { %v1292_v2 = vmul.f32 %v1226_v43, %v783_v62  ;;  %v1701_v30 = vpack.c.bf16 %v1676_v63, %v1675_v26 }
 0x412   :  { %v1586_v4 = vpop.f32.mrf.mxu0 }
 0x413   :  { %v1324_v13 = vpack.c.bf16 %v1292_v2, %v1290_v1  ;;  %1813 = vmatmul.bf16.gmra.mxu1 %v1701_v30  ;;  %v1587_v44 = vadd.f32 %v1586_v4, %v1497_v28  ;;  %v1512_v52 = vpop.f32.mrf.mxu3 }
 0x415   :  { %1625 = vmatmul.bf16.gmra.mxu0 %v1324_v13  ;;  %v1645_v47 = vmax.f32 %v1587_v44, 0.0 }
 0x417   :  { %v1677_v21 = vmul.f32 %v1645_v47, %v898_v60 }
 0x41a   :  { %v1588_v35 = vpop.f32.mrf.mxu0 }
 0x41b   :  { %v1589_v37 = vadd.f32 %v1588_v35, %v1499_v61  ;;  %v903_v61 = vadd.f32 %v3296_v31, %v3185_v45  ;;  %v1514_v18 = vpop.f32.mrf.mxu3  ;;  %v908_v45 = vadd.f32 %v3296_v31, %v3202_v8  ;;  %v913_v8 = vadd.f32 %v3296_v31, %v3215_v48 }
 0x41c   :  { %v918_v48 = vadd.f32 %v3296_v31, %v3232_v46  ;;  %v923_v46 = vadd.f32 %v3296_v31, %v3245_v39  ;;  %v928_v39 = vadd.f32 %v3296_v31, %v3257_v6  ;;  %v933_v6 = vadd.f32 %v3296_v31, %v3270_v15 }
 0x41d   :  { %v1646_v36 = vmax.f32 %v1589_v37, 0.0  ;;  %v938_v15 = vadd.f32 %v3296_v31, %v3284_v14 }
 0x41f   :  { %v1678_v51 = vmul.f32 %v1646_v36, %v900_v32 }
 0x421   :  { %v1702_v17 = vpack.c.bf16 %v1678_v51, %v1677_v21 }
 0x422   :  { %v1591_v58 = vpop.f32.mrf.mxu0 }
 0x423   :  { %1818 = vmatmul.bf16.gmra.mxu1 %v1702_v17  ;;  %v1592_v7 = vadd.f32 %v1591_v58, %v1502_v3  ;;  %v1517_v59 = vpop.f32.mrf.mxu3 }
 0x425   :  { %v1647_v28 = vmax.f32 %v1592_v7, 0.0 }
 0x427   :  { %v1679_v56 = vmul.f32 %v1647_v28, %v903_v61 }
 0x42a   :  { %v1593_v53 = vpop.f32.mrf.mxu0 }
 0x42b   :  { %v1594_v10 = vadd.f32 %v1593_v53, %v1504_v27  ;;  %v1519_v2 = vpop.f32.mrf.mxu3 }
 0x42d   :  { %v1648_v41 = vmax.f32 %v1594_v10, 0.0 }
 0x42f   :  { %v1680_v0 = vmul.f32 %v1648_v41, %v905_v57 }
 0x430   :  { %v1784_v16 = vpop.f32.mrf.mxu1 }
 0x431   :  { %1864 = vst [vmem:[#allocation2] sm:$0xff] %v1784_v16  ;;  %v1703_v40 = vpack.c.bf16 %v1680_v0, %v1679_v56 }
 0x432   :  { %v1596_v25 = vpop.f32.mrf.mxu0 }
 0x433   :  { %1823 = vmatmul.bf16.gmra.mxu1 %v1703_v40  ;;  %v1597_v3 = vadd.f32 %v1596_v25, %v1507_v9  ;;  %v1522_v60 = vpop.f32.mrf.mxu3 }
 0x435   :  { %v1649_v11 = vmax.f32 %v1597_v3, 0.0 }
 0x437   :  { %v1681_v34 = vmul.f32 %v1649_v11, %v908_v45 }
 0x438   :  { %v1786_v49 = vpop.f32.mrf.mxu1 }
 0x439   :  { %1865 = vst [vmem:[#allocation2 + $0x8] sm:$0xff] %v1786_v49 }
 0x43a   :  { %v1598_v55 = vpop.f32.mrf.mxu0 }
 0x43b   :  { %v1599_v23 = vadd.f32 %v1598_v55, %v1509_v22  ;;  %v1524_v22 = vpop.f32.mrf.mxu3 }
 0x43d   :  { %v1650_v27 = vmax.f32 %v1599_v23, 0.0 }
 0x43f   :  { %v1682_v29 = vmul.f32 %v1650_v27, %v910_v5 }
 0x440   :  { %v1789_v62 = vpop.f32.mrf.mxu1 }
 0x441   :  { %1866 = vst [vmem:[#allocation2 + $0x10] sm:$0xff] %v1789_v62  ;;  %v1704_v26 = vpack.c.bf16 %v1682_v29, %v1681_v34 }
 0x442   :  { %v1601_v63 = vpop.f32.mrf.mxu0 }
 0x443   :  { %1828 = vmatmul.bf16.gmra.mxu1 %v1704_v26  ;;  %v1602_v43 = vadd.f32 %v1601_v63, %v1512_v52  ;;  %v1527_v61 = vpop.f32.mrf.mxu3 }
 0x445   :  { %v1651_v4 = vmax.f32 %v1602_v43, 0.0 }
 0x447   :  { %v1683_v9 = vmul.f32 %v1651_v4, %v913_v8 }
 0x448   :  { %v1791_v1 = vpop.f32.mrf.mxu1 }
 0x449   :  { %1867 = vst [vmem:[#allocation2 + $0x18] sm:$0xff] %v1791_v1 }
 0x44a   :  { %v1603_v30 = vpop.f32.mrf.mxu0 }
 0x44b   :  { %v1604_v13 = vadd.f32 %v1603_v30, %v1514_v18  ;;  %v1529_v49 = vpop.f32.mrf.mxu3 }
 0x44d   :  { %v1652_v44 = vmax.f32 %v1604_v13, 0.0 }
 0x44f   :  { %v1684_v35 = vmul.f32 %v1652_v44, %v915_v24 }
 0x450   :  { %v1794_v47 = vpop.f32.mrf.mxu1 }
 0x451   :  { %1868 = vst [vmem:[#allocation2 + $0x20] sm:$0xff] %v1794_v47  ;;  %v1705_v37 = vpack.c.bf16 %v1684_v35, %v1683_v9 }
 0x452   :  { %v1606_v42 = vpop.f32.mrf.mxu0 }
 0x453   :  { %1833 = vmatmul.bf16.gmra.mxu1 %v1705_v37  ;;  %v1607_v54 = vadd.f32 %v1606_v42, %v1517_v59  ;;  %v1532_v34 = vpop.f32.mrf.mxu3 }
 0x455   :  { %v1653_v21 = vmax.f32 %v1607_v54, 0.0 }
 0x457   :  { %v1685_v58 = vmul.f32 %v1653_v21, %v918_v48 }
 0x458   :  { %v1796_v32 = vpop.f32.mrf.mxu1 }
 0x459   :  { %1869 = vst [vmem:[#allocation2 + $0x28] sm:$0xff] %v1796_v32 }
 0x45a   :  { %v1608_v36 = vpop.f32.mrf.mxu0 }
 0x45b   :  { %v1609_v51 = vadd.f32 %v1608_v36, %v1519_v2  ;;  %v1534_v1 = vpop.f32.mrf.mxu3 }
 0x45d   :  { %v1654_v17 = vmax.f32 %v1609_v51, 0.0 }
 0x45f   :  { %v1686_v7 = vmul.f32 %v1654_v17, %v920_v12 }
 0x460   :  { %v1799_v53 = vpop.f32.mrf.mxu1 }
 0x461   :  { %1870 = vst [vmem:[#allocation2 + $0x30] sm:$0xff] %v1799_v53  ;;  %v1706_v28 = vpack.c.bf16 %v1686_v7, %v1685_v58 }
 0x462   :  { %v1611_v10 = vpop.f32.mrf.mxu0 }
 0x463   :  { %1838 = vmatmul.bf16.gmra.mxu1 %v1706_v28  ;;  %v1612_v52 = vadd.f32 %v1611_v10, %v1522_v60  ;;  %v1537_v35 = vpop.f32.mrf.mxu3 }
 0x465   :  { %v1655_v56 = vmax.f32 %v1612_v52, 0.0 }
 0x467   :  { %v1687_v40 = vmul.f32 %v1655_v56, %v923_v46 }
 0x468   :  { %v1801_v57 = vpop.f32.mrf.mxu1 }
 0x469   :  { %1871 = vst [vmem:[#allocation2 + $0x38] sm:$0xff] %v1801_v57 }
 0x46a   :  { %v1613_v41 = vpop.f32.mrf.mxu0 }
 0x46b   :  { %v1614_v0 = vadd.f32 %v1613_v41, %v1524_v22  ;;  %v1539_v32 = vpop.f32.mrf.mxu3 }
 0x46d   :  { %v1656_v16 = vmax.f32 %v1614_v0, 0.0 }
 0x46f   :  { %v1688_v25 = vmul.f32 %v1656_v16, %v925_v38 }
 0x470   :  { %v1804_v18 = vpop.f32.mrf.mxu1 }
 0x471   :  { %1872 = vst [vmem:[#allocation2 + $0x40] sm:$0xff] %v1804_v18  ;;  %v1707_v3 = vpack.c.bf16 %v1688_v25, %v1687_v40 }
 0x472   :  { %v1616_v55 = vpop.f32.mrf.mxu0 }
 0x473   :  { %1843 = vmatmul.bf16.gmra.mxu1 %v1707_v3  ;;  %v1617_v11 = vadd.f32 %v1616_v55, %v1527_v61 }
 0x475   :  { %v1657_v5 = vmax.f32 %v1617_v11, 0.0 }
 0x477   :  { %v1689_v59 = vmul.f32 %v1657_v5, %v928_v39 }
 0x478   :  { %v1806_v23 = vpop.f32.mrf.mxu1 }
 0x479   :  { %1873 = vst [vmem:[#allocation2 + $0x48] sm:$0xff] %v1806_v23 }
 0x47a   :  { %v1618_v45 = vpop.f32.mrf.mxu0 }
 0x47b   :  { %v1619_v27 = vadd.f32 %v1618_v45, %v1529_v49 }
 0x47d   :  { %v1658_v29 = vmax.f32 %v1619_v27, 0.0 }
 0x47f   :  { %v1690_v62 = vmul.f32 %v1658_v29, %v930_v33 }
 0x480   :  { %v1809_v26 = vpop.f32.mrf.mxu1 }
 0x481   :  { %1874 = vst [vmem:[#allocation2 + $0x50] sm:$0xff] %v1809_v26  ;;  %v1708_v63 = vpack.c.bf16 %v1690_v62, %v1689_v59 }
 0x482   :  { %v1621_v43 = vpop.f32.mrf.mxu0 }
 0x483   :  { %1848 = vmatmul.bf16.gmra.mxu1 %v1708_v63  ;;  %v1622_v2 = vadd.f32 %v1621_v43, %v1532_v34 }
 0x485   :  { %v1659_v13 = vmax.f32 %v1622_v2, 0.0 }
 0x487   :  { %v1691_v44 = vmul.f32 %v1659_v13, %v933_v6 }
 0x488   :  { %v1811_v30 = vpop.f32.mrf.mxu1 }
 0x489   :  { %1875 = vst [vmem:[#allocation2 + $0x58] sm:$0xff] %v1811_v30 }
 0x48a   :  { %v1623_v4 = vpop.f32.mrf.mxu0 }
 0x48b   :  { %v1624_v8 = vadd.f32 %v1623_v4, %v1534_v1 }
 0x48d   :  { %v1660_v24 = vmax.f32 %v1624_v8, 0.0 }
 0x48f   :  { %v1692_v9 = vmul.f32 %v1660_v24, %v935_v19 }
 0x490   :  { %v1814_v47 = vpop.f32.mrf.mxu1 }
 0x491   :  { %1876 = vst [vmem:[#allocation2 + $0x60] sm:$0xff] %v1814_v47  ;;  %v1709_v37 = vpack.c.bf16 %v1692_v9, %v1691_v44 }
 0x492   :  { %v1626_v42 = vpop.f32.mrf.mxu0 }
 0x493   :  { %1853 = vmatmul.bf16.gmra.mxu1 %v1709_v37  ;;  %v1627_v60 = vadd.f32 %v1626_v42, %v1537_v35 }
 0x495   :  { %v1661_v21 = vmax.f32 %v1627_v60, 0.0 }
 0x497   :  { %v1693_v12 = vmul.f32 %v1661_v21, %v938_v15 }
 0x498   :  { %v1816_v54 = vpop.f32.mrf.mxu1 }
 0x499   :  { %1877 = vst [vmem:[#allocation2 + $0x68] sm:$0xff] %v1816_v54 }
 0x49a   :  { %v1628_v36 = vpop.f32.mrf.mxu0 }
 0x49b   :  { %v1629_v51 = vadd.f32 %v1628_v36, %v1539_v32 }
 0x49d   :  { %v1662_v48 = vmax.f32 %v1629_v51, 0.0 }
 0x49f   :  { %v1694_v17 = vmul.f32 %v1662_v48, %v940_v20 }
 0x4a0   :  { %v1819_v22 = vpop.f32.mrf.mxu1 }
 0x4a1   :  { %1878 = vst [vmem:[#allocation2 + $0x70] sm:$0xff] %v1819_v22  ;;  %v1710_v58 = vpack.c.bf16 %v1694_v17, %v1693_v12 }
 0x4a3   :  { %1858 = vmatmul.bf16.gmra.mxu1 %v1710_v58 }
 0x4a8   :  { %v1821_v7 = vpop.f32.mrf.mxu1 }
 0x4a9   :  { %1879 = vst [vmem:[#allocation2 + $0x78] sm:$0xff] %v1821_v7 }
 0x4b0   :  { %v1824_v53 = vpop.f32.mrf.mxu1 }
 0x4b1   :  { %1880 = vst [vmem:[#allocation2 + $0x80] sm:$0xff] %v1824_v53 }
 0x4b8   :  { %v1826_v28 = vpop.f32.mrf.mxu1 }
 0x4b9   :  { %1881 = vst [vmem:[#allocation2 + $0x88] sm:$0xff] %v1826_v28 }
 0x4c0   :  { %v1829_v10 = vpop.f32.mrf.mxu1 }
 0x4c1   :  { %1882 = vst [vmem:[#allocation2 + $0x90] sm:$0xff] %v1829_v10 }
 0x4c8   :  { %v1831_v52 = vpop.f32.mrf.mxu1 }
 0x4c9   :  { %1883 = vst [vmem:[#allocation2 + $0x98] sm:$0xff] %v1831_v52 }
 0x4d0   :  { %v1834_v14 = vpop.f32.mrf.mxu1 }
 0x4d1   :  { %1884 = vst [vmem:[#allocation2 + $0xa0] sm:$0xff] %v1834_v14 }
 0x4d8   :  { %v1836_v50 = vpop.f32.mrf.mxu1 }
 0x4d9   :  { %1885 = vst [vmem:[#allocation2 + $0xa8] sm:$0xff] %v1836_v50 }
 0x4e0   :  { %v1839_v31 = vpop.f32.mrf.mxu1 }
 0x4e1   :  { %1886 = vst [vmem:[#allocation2 + $0xb0] sm:$0xff] %v1839_v31 }
 0x4e8   :  { %v1841_v61 = vpop.f32.mrf.mxu1 }
 0x4e9   :  { %1887 = vst [vmem:[#allocation2 + $0xb8] sm:$0xff] %v1841_v61 }
 0x4f0   :  { %v1844_v57 = vpop.f32.mrf.mxu1 }
 0x4f1   :  { %1888 = vst [vmem:[#allocation2 + $0xc0] sm:$0xff] %v1844_v57 }
 0x4f8   :  { %v1846_v41 = vpop.f32.mrf.mxu1 }
 0x4f9   :  { %1889 = vst [vmem:[#allocation2 + $0xc8] sm:$0xff] %v1846_v41 }
 0x500   :  { %v1849_v56 = vpop.f32.mrf.mxu1 }
 0x501   :  { %1890 = vst [vmem:[#allocation2 + $0xd0] sm:$0xff] %v1849_v56 }
 0x508   :  { %v1851_v0 = vpop.f32.mrf.mxu1 }
 0x509   :  { %1891 = vst [vmem:[#allocation2 + $0xd8] sm:$0xff] %v1851_v0 }
 0x510   :  { %v1854_v46 = vpop.f32.mrf.mxu1 }
 0x511   :  { %1892 = vst [vmem:[#allocation2 + $0xe0] sm:$0xff] %v1854_v46 }
 0x518   :  { %v1856_v38 = vpop.f32.mrf.mxu1 }
 0x519   :  { %1893 = vst [vmem:[#allocation2 + $0xe8] sm:$0xff] %v1856_v38 }
 0x520   :  { %v1859_v16 = vpop.f32.mrf.mxu1 }
 0x521   :  { %1894 = vst [vmem:[#allocation2 + $0xf0] sm:$0xff] %v1859_v16 }
 0x528   :  { %v1861_v40 = vpop.f32.mrf.mxu1 }
 0x529   :  { %1895 = vst [vmem:[#allocation2 + $0xf8] sm:$0xff] %v1861_v40 }
 0x52a   :  { %1908 = dma.vmem_to_hbm [thread:$0]  %s1901_s27, 4096, %s1903_s1, [#allocation3], %s2305_s7, %s2305_s7, %s2306_s8  }
 0x52b   :  { %2302 = dma.done.wait [#allocation3], 4096  }
 0x52c   :  { %2303 = vsyncadd [#allocation3], 4294963200 }
 0x52d   :  { %1913 = vsyncpa [#allocation3], 1 }

// kernel: tpu_custom_call.1
= control target key start
LH: loop header
LB: loop body
LE: loop exit
PB: predicated region body
PF: predicated region fallthrough
CT: control target
= control target key end

     0   :  { %s3406_s0 = inlined_call_operand.vmem [shape: f32[256,32], index: 0, kind: input, shape index: {}]   ;;  %s3407_s1 = inlined_call_operand.vmem [shape: f32[256,16], index: 1, kind: input, shape index: {}]   ;;  %s3408_s2 = inlined_call_operand.vmem [shape: bf16[32,128], index: 2, kind: input, shape index: {}]   ;;  %s3409_s3 = inlined_call_operand.vmem [shape: f32[1,128], index: 3, kind: input, shape index: {}]   ;;  %s3410_s4 = inlined_call_operand.vmem [shape: bf16[128,128], index: 4, kind: input, shape index: {}]   ;;  %s3411_s5 = inlined_call_operand.vmem [shape: f32[1,128], index: 5, kind: input, shape index: {}]   ;;  %s3412_s6 = inlined_call_operand.vmem [shape: bf16[128,256], index: 6, kind: input, shape index: {}]   ;;  %s3413_s7 = inlined_call_operand.vmem [shape: f32[1,256], index: 7, kind: input, shape index: {}]   ;;  %s3414_s8 = inlined_call_operand.vmem [shape: bf16[128,128], index: 8, kind: input, shape index: {}]   ;;  %s3415_s9 = inlined_call_operand.vmem [shape: f32[1,128], index: 9, kind: input, shape index: {}]   ;;  %s3416_s10 = inlined_call_operand.vmem [shape: bf16[16,256], index: 10, kind: input, shape index: {}]   ;;  %s3417_s11 = inlined_call_operand.vmem [shape: bf16[256,128], index: 11, kind: input, shape index: {}]   ;;  %s3418_s12 = inlined_call_operand.vmem [shape: bf16[128,128], index: 12, kind: input, shape index: {}]   ;;  %s3419_s13 = inlined_call_operand.hbm [shape: f32[256,128], index: 13, kind: output, shape index: {}]  }
   0x1   :  { %v2203_v0 = vld [vmem:[%s3408_s2 + $0x8] sm:$0xff]  ;;  %v2202_v1 = vld [vmem:[%s3408_s2] sm:$0xff] }
   0x2   :  { %169 = vmatpush.bf16.msra.mxu0 %v2203_v0  ;;  %v46_v2 = vld [vmem:[%s3406_s0] sm:$0xff]  ;;  %v47_v3 = vld [vmem:[%s3406_s0 + $0x8] sm:$0xff]  ;;  %2262 = vmatpush.bf16.msra.mxu3 %v2203_v0 }
   0x3   :  { %18 = vsyncpa [#allocation3], 0  ;;  %v78_v4 = vpack.c.bf16 %v47_v3, %v46_v2  ;;  %vm114_vm0 = vcmask 261120   ;;  %v48_v5 = vld [vmem:[%s3406_s0 + $0x10] sm:$0xff]  ;;  %v49_v6 = vld [vmem:[%s3406_s0 + $0x18] sm:$0xff]  ;;  %vm1002_vm1 = vcmask 130048  }
   0x4   :  { %v79_v7 = vpack.c.bf16 %v49_v6, %v48_v5  ;;  %v50_v8 = vld [vmem:[%s3406_s0 + $0x20] sm:$0xff]  ;;  %v51_v9 = vld [vmem:[%s3406_s0 + $0x28] sm:$0xff]  ;;  %v52_v11 = vld [vmem:[%s3406_s0 + $0x30] sm:$0xff] }
   0x5   :  { %v80_v10 = vpack.c.bf16 %v51_v9, %v50_v8  ;;  %v53_v12 = vld [vmem:[%s3406_s0 + $0x38] sm:$0xff]  ;;  %v54_v14 = vld [vmem:[%s3406_s0 + $0x40] sm:$0xff]  ;;  %v55_v15 = vld [vmem:[%s3406_s0 + $0x48] sm:$0xff] }
   0x6   :  { %170 = vmatpush.bf16.msra.mxu0 %v2202_v1  ;;  %2263 = vmatpush.bf16.msra.mxu3 %v2202_v1  ;;  %v81_v13 = vpack.c.bf16 %v53_v12, %v52_v11  ;;  %v82_v16 = vpack.c.bf16 %v55_v15, %v54_v14  ;;  %v2211_v17 = vld [vmem:[%s3410_s4 + $0x38] sm:$0xff]  ;;  %v56_v18 = vld [vmem:[%s3406_s0 + $0x50] sm:$0xff]  ;;  %v2209_v22 = vld [vmem:[%s3410_s4 + $0x28] sm:$0xff] }
   0x7   :  { %368 = vmatpush.bf16.msra.mxu1 %v2211_v17  ;;  %2264 = vmatpush.bf16.msra.mxu2 %v2211_v17  ;;  %v57_v19 = vld [vmem:[%s3406_s0 + $0x58] sm:$0xff]  ;;  %v2210_v21 = vld [vmem:[%s3410_s4 + $0x30] sm:$0xff]  ;;  %v2208_v23 = vld [vmem:[%s3410_s4 + $0x20] sm:$0xff] }
   0x8   :  { %v83_v20 = vpack.c.bf16 %v57_v19, %v56_v18  ;;  %v58_v24 = vld [vmem:[%s3406_s0 + $0x60] sm:$0xff]  ;;  %v59_v25 = vld [vmem:[%s3406_s0 + $0x68] sm:$0xff]  ;;  %v2207_v26 = vld [vmem:[%s3410_s4 + $0x18] sm:$0xff] }
   0x9   :  { %1922 = vmatmul.msk.bf16.vlgmr.msra.gmra.mxu0 %vm114_vm0, %v78_v4  ;;  %v84_v27 = vpack.c.bf16 %v59_v25, %v58_v24  ;;  %v2206_v28 = vld [vmem:[%s3410_s4 + $0x10] sm:$0xff]  ;;  %v65_v30 = vld [vmem:[%s3406_s0 + $0x98] sm:$0xff]  ;;  %v2205_v32 = vld [vmem:[%s3410_s4 + $0x8] sm:$0xff] }
   0xa   :  { %v64_v29 = vld [vmem:[%s3406_s0 + $0x90] sm:$0xff]  ;;  %v2204_v33 = vld [vmem:[%s3410_s4] sm:$0xff]  ;;  %v61_v35 = vld [vmem:[%s3406_s0 + $0x78] sm:$0xff] }
   0xb   :  { %369 = vmatpush.bf16.msra.mxu1 %v2210_v21  ;;  %2265 = vmatpush.bf16.msra.mxu2 %v2210_v21  ;;  %v87_v31 = vpack.c.bf16 %v65_v30, %v64_v29  ;;  %v60_v34 = vld [vmem:[%s3406_s0 + $0x70] sm:$0xff]  ;;  %v66_v37 = vld [vmem:[%s3406_s0 + $0xa0] sm:$0xff]  ;;  %v67_v38 = vld [vmem:[%s3406_s0 + $0xa8] sm:$0xff] }
   0xc   :  { %v85_v36 = vpack.c.bf16 %v61_v35, %v60_v34  ;;  %v88_v39 = vpack.c.bf16 %v67_v38, %v66_v37  ;;  %v62_v40 = vld [vmem:[%s3406_s0 + $0x80] sm:$0xff]  ;;  %v63_v41 = vld [vmem:[%s3406_s0 + $0x88] sm:$0xff]  ;;  %v68_v44 = vld [vmem:[%s3406_s0 + $0xb0] sm:$0xff] }
   0xd   :  { %1931 = vmatmul.msk.bf16.vlgmr.msra.gmra.mxu3 %vm114_vm0, %v87_v31  ;;  %v86_v42 = vpack.c.bf16 %v63_v41, %v62_v40  ;;  %v69_v45 = vld [vmem:[%s3406_s0 + $0xb8] sm:$0xff]  ;;  %v2492_v46 = vld [vmem:[%s3409_s3] ss:$0 sm:$0xff]  ;;  %v71_v56 = vld [vmem:[%s3406_s0 + $0xc8] sm:$0xff] }
   0xe   :  { %v89_v47 = vpack.c.bf16 %v69_v45, %v68_v44  ;;  %v70_v55 = vld [vmem:[%s3406_s0 + $0xc0] sm:$0xff]  ;;  %v72_v1 = vld [vmem:[%s3406_s0 + $0xd0] sm:$0xff]  ;;  %v73_v2 = vld [vmem:[%s3406_s0 + $0xd8] sm:$0xff] }
   0xf   :  { %370 = vmatpush.bf16.msra.mxu1 %v2209_v22  ;;  %2266 = vmatpush.bf16.msra.mxu2 %v2209_v22  ;;  %v90_v57 = vpack.c.bf16 %v71_v56, %v70_v55  ;;  %v91_v3 = vpack.c.bf16 %v73_v2, %v72_v1  ;;  %v74_v11 = vld [vmem:[%s3406_s0 + $0xe0] sm:$0xff]  ;;  %v75_v12 = vld [vmem:[%s3406_s0 + $0xe8] sm:$0xff]  ;;  %v76_v21 = vld [vmem:[%s3406_s0 + $0xf0] sm:$0xff] }
  0x10   :  { %v77_v22 = vld [vmem:[%s3406_s0 + $0xf8] sm:$0xff]  ;;  %v2226_v34 = vld [vmem:[%s3412_s6 + $0x74] sm:$0xf]  ;;  %v2224_v41 = vld [vmem:[%s3412_s6 + $0x64] sm:$0xf] }
  0x11   :  { %v2030_v35 = vld [vmem:[%s3412_s6 + $0x78] sm:$0xf0]  ;;  %v2234_v44 = vld [vmem:[%s3414_s8 + $0x30] sm:$0xff]  ;;  %v2216_v1 = vld [vmem:[%s3412_s6 + $0x24] sm:$0xf] }
  0x12   :  { %v2235_v37 = vld [vmem:[%s3414_s8 + $0x38] sm:$0xff]  ;;  %v1990_v2 = vld [vmem:[%s3412_s6 + $0x28] sm:$0xf0] }
  0x13   :  { %371 = vmatpush.bf16.msra.mxu1 %v2208_v23  ;;  %2267 = vmatpush.bf16.msra.mxu2 %v2208_v23  ;;  %v93_v23 = vpack.c.bf16 %v77_v22, %v76_v21 }
  0x14   :  { %853 = vmatpush.bf16.msrb.mxu0 %v2235_v37 }
  0x17   :  { %372 = vmatpush.bf16.msra.mxu1 %v2207_v26  ;;  %2268 = vmatpush.bf16.msra.mxu2 %v2207_v26 }
  0x18   :  { %854 = vmatpush.bf16.msrb.mxu0 %v2234_v44 }
  0x19   :  { %1923 = vmatmul.msk.bf16.gmra.mxu0 %vm114_vm0, %v79_v7 }
  0x1b   :  { %373 = vmatpush.bf16.msra.mxu1 %v2206_v28  ;;  %2269 = vmatpush.bf16.msra.mxu2 %v2206_v28 }
  0x1d   :  { %1932 = vmatmul.msk.bf16.gmra.mxu3 %vm114_vm0, %v88_v39 }
  0x1f   :  { %374 = vmatpush.bf16.msra.mxu1 %v2205_v32  ;;  %2270 = vmatpush.bf16.msra.mxu2 %v2205_v32 }
  0x23   :  { %375 = vmatpush.bf16.msra.mxu1 %v2204_v33  ;;  %2271 = vmatpush.bf16.msra.mxu2 %v2204_v33 }
  0x29   :  { %1924 = vmatmul.msk.bf16.gmra.mxu0 %vm114_vm0, %v80_v10 }
  0x2d   :  { %1933 = vmatmul.msk.bf16.gmra.mxu3 %vm114_vm0, %v89_v47  ;;  %v2222_v47 = vld [vmem:[%s3412_s6 + $0x54] sm:$0xf] }
  0x39   :  { %1925 = vmatmul.msk.bf16.gmra.mxu0 %vm114_vm0, %v81_v13  ;;  %v92_v13 = vpack.c.bf16 %v75_v12, %v74_v11  ;;  %v1982_v11 = vld [vmem:[%s3412_s6 + $0x18] sm:$0xf0] }
  0x3d   :  { %1934 = vmatmul.msk.bf16.gmra.mxu3 %vm114_vm0, %v90_v57 }
  0x49   :  { %1926 = vmatmul.msk.bf16.gmra.mxu0 %vm114_vm0, %v82_v16 }
  0x4d   :  { %1935 = vmatmul.msk.bf16.gmra.mxu3 %vm114_vm0, %v91_v3  ;;  %v1993_v3 = vor.u32 %v2216_v1, %v1990_v2 }
  0x59   :  { %1927 = vmatmul.msk.bf16.gmra.mxu0 %vm114_vm0, %v83_v20 }
  0x5d   :  { %1936 = vmatmul.msk.bf16.gmra.mxu3 %vm114_vm0, %v92_v13  ;;  %v2229_v13 = vld [vmem:[%s3414_s8 + $0x8] sm:$0xff] }
  0x69   :  { %1928 = vmatmul.msk.bf16.gmra.mxu0 %vm114_vm0, %v84_v27 }
  0x6d   :  { %1937 = vmatmul.msk.bf16.gmra.mxu3 %vm114_vm0, %v93_v23 }
  0x79   :  { %1929 = vmatmul.msk.bf16.gmra.mxu0 %vm114_vm0, %v85_v36  ;;  %v2033_v36 = vor.u32 %v2226_v34, %v2030_v35 }
  0x7b   :  { %696 = vmatpush.bf16.msrb.mxu3 %v2033_v36 }
  0x86   :  { %v172_v43 = vpop.f32.mrf.mxu0 }
  0x87   :  { %v173_v48 = vadd.f32 %v2492_v46, %v172_v43 }
  0x89   :  { %1930 = vmatmul.msk.bf16.gmra.mxu0 %vm114_vm0, %v86_v42  ;;  %v252_v51 = vmax.f32 %v173_v48, 0.0  ;;  %v2022_v42 = vld [vmem:[%s3412_s6 + $0x68] sm:$0xf0]  ;;  %v2014_v48 = vld [vmem:[%s3412_s6 + $0x58] sm:$0xf0] }
  0x8a   :  { %v2025_v43 = vor.u32 %v2224_v41, %v2022_v42 }
  0x8c   :  { %697 = vmatpush.bf16.msrb.mxu3 %v2025_v43 }
  0x8e   :  { %v174_v49 = vpop.f32.mrf.mxu0 }
  0x8f   :  { %v175_v50 = vadd.f32 %v2492_v46, %v174_v49  ;;  %v2017_v49 = vor.u32 %v2222_v47, %v2014_v48 }
  0x91   :  { %v253_v52 = vmax.f32 %v175_v50, 0.0  ;;  %v2233_v50 = vld [vmem:[%s3414_s8 + $0x28] sm:$0xff]  ;;  %698 = vmatpush.bf16.msrb.mxu3 %v2017_v49 }
  0x92   :  { %855 = vmatpush.bf16.msrb.mxu0 %v2233_v50 }
  0x93   :  { %v284_v53 = vpack.c.bf16 %v253_v52, %v252_v51  ;;  %v2220_v51 = vld [vmem:[%s3412_s6 + $0x44] sm:$0xf]  ;;  %v2006_v52 = vld [vmem:[%s3412_s6 + $0x48] sm:$0xf0] }
  0x95   :  { %376 = vmatmul.bf16.vlgmr.msra.gmra.mxu1 %v284_v53  ;;  %v2009_v53 = vor.u32 %v2220_v51, %v2006_v52 }
  0x96   :  { %v177_v54 = vpop.f32.mrf.mxu0 }
  0x97   :  { %v178_v58 = vadd.f32 %v2492_v46, %v177_v54  ;;  %v2232_v54 = vld [vmem:[%s3414_s8 + $0x20] sm:$0xff]  ;;  %699 = vmatpush.bf16.msrb.mxu3 %v2009_v53 }
  0x98   :  { %856 = vmatpush.bf16.msrb.mxu0 %v2232_v54 }
  0x99   :  { %v254_v61 = vmax.f32 %v178_v58, 0.0  ;;  %v2218_v58 = vld [vmem:[%s3412_s6 + $0x34] sm:$0xf] }
  0x9e   :  { %v179_v59 = vpop.f32.mrf.mxu0 }
  0x9f   :  { %v180_v60 = vadd.f32 %v2492_v46, %v179_v59  ;;  %v1998_v59 = vld [vmem:[%s3412_s6 + $0x38] sm:$0xf0] }
  0xa1   :  { %v255_v62 = vmax.f32 %v180_v60, 0.0  ;;  %v2001_v60 = vor.u32 %v2218_v58, %v1998_v59 }
  0xa3   :  { %v285_v63 = vpack.c.bf16 %v255_v62, %v254_v61  ;;  %v2231_v61 = vld [vmem:[%s3414_s8 + $0x18] sm:$0xff]  ;;  %700 = vmatpush.bf16.msrb.mxu3 %v2001_v60 }
  0xa4   :  { %857 = vmatpush.bf16.msrb.mxu0 %v2231_v61 }
  0xa5   :  { %381 = vmatmul.bf16.gmra.mxu1 %v285_v63 }
  0xa6   :  { %v182_v0 = vpop.f32.mrf.mxu0 }
  0xa7   :  { %v183_v4 = vadd.f32 %v2492_v46, %v182_v0  ;;  %701 = vmatpush.bf16.msrb.mxu3 %v1993_v3 }
  0xa9   :  { %v256_v7 = vmax.f32 %v183_v4, 0.0  ;;  %v2230_v4 = vld [vmem:[%s3414_s8 + $0x10] sm:$0xff] }
  0xaa   :  { %858 = vmatpush.bf16.msrb.mxu0 %v2230_v4 }
  0xae   :  { %v184_v5 = vpop.f32.mrf.mxu0  ;;  %859 = vmatpush.bf16.msrb.mxu0 %v2229_v13 }
  0xaf   :  { %v185_v6 = vadd.f32 %v2492_v46, %v184_v5  ;;  %v2028_v5 = vld [vmem:[%s3412_s6 + $0x70] sm:$0xf] }
  0xb1   :  { %v257_v8 = vmax.f32 %v185_v6, 0.0  ;;  %v2227_v6 = vld [vmem:[%s3412_s6 + $0x74] sm:$0xf0] }
  0xb3   :  { %v286_v9 = vpack.c.bf16 %v257_v8, %v256_v7  ;;  %v217_v8 = vpop.f32.mrf.mxu3 }
  0xb4   :  { %v218_v44 = vadd.f32 %v2492_v46, %v217_v8 }
  0xb5   :  { %386 = vmatmul.bf16.gmra.mxu1 %v286_v9  ;;  %v2029_v9 = vor.u32 %v2227_v6, %v2028_v5 }
  0xb6   :  { %v187_v10 = vpop.f32.mrf.mxu0  ;;  %v270_v51 = vmax.f32 %v218_v44, 0.0  ;;  %v2215_v44 = vld [vmem:[%s3412_s6 + $0x14] sm:$0xf0] }
  0xb7   :  { %v188_v14 = vadd.f32 %v2492_v46, %v187_v10  ;;  %v2214_v10 = vld [vmem:[%s3412_s6 + $0x14] sm:$0xf]  ;;  %607 = vmatpush.bf16.msrb.mxu2 %v2029_v9  ;;  %v1996_v9 = vld [vmem:[%s3412_s6 + $0x30] sm:$0xf] }
  0xb8   :  { %v1985_v12 = vor.u32 %v2214_v10, %v1982_v11  ;;  %v2219_v10 = vld [vmem:[%s3412_s6 + $0x34] sm:$0xf0] }
  0xb9   :  { %v258_v17 = vmax.f32 %v188_v14, 0.0  ;;  %v2212_v14 = vld [vmem:[%s3412_s6 + $0x4] sm:$0xf]  ;;  %v1997_v11 = vor.u32 %v2219_v10, %v1996_v9 }
  0xba   :  { %702 = vmatpush.bf16.msrb.mxu3 %v1985_v12 }
  0xbb   :  { %v219_v21 = vpop.f32.mrf.mxu3 }
  0xbe   :  { %v189_v15 = vpop.f32.mrf.mxu0 }
  0xbf   :  { %v190_v16 = vadd.f32 %v2492_v46, %v189_v15  ;;  %v1974_v15 = vld [vmem:[%s3412_s6 + $0x8] sm:$0xf0] }
  0xc1   :  { %v259_v18 = vmax.f32 %v190_v16, 0.0  ;;  %v1977_v16 = vor.u32 %v2212_v14, %v1974_v15 }
  0xc3   :  { %v287_v19 = vpack.c.bf16 %v259_v18, %v258_v17  ;;  %v2228_v17 = vld [vmem:[%s3414_s8] sm:$0xff]  ;;  %703 = vmatpush.bf16.msrb.mxu3 %v1977_v16  ;;  %s2306_s8 = smov 8  }
  0xc4   :  { %860 = vmatpush.bf16.msrb.mxu0 %v2228_v17 }
  0xc5   :  { %391 = vmatmul.bf16.gmra.mxu1 %v287_v19 }
  0xc6   :  { %v192_v20 = vpop.f32.mrf.mxu0 }
  0xc7   :  { %v193_v24 = vadd.f32 %v2492_v46, %v192_v20 }
  0xc9   :  { %v260_v27 = vmax.f32 %v193_v24, 0.0 }
  0xce   :  { %v194_v25 = vpop.f32.mrf.mxu0 }
  0xcf   :  { %v195_v26 = vadd.f32 %v2492_v46, %v194_v25  ;;  %v2020_v25 = vld [vmem:[%s3412_s6 + $0x60] sm:$0xf] }
  0xd1   :  { %v261_v28 = vmax.f32 %v195_v26, 0.0  ;;  %v2225_v26 = vld [vmem:[%s3412_s6 + $0x64] sm:$0xf0] }
  0xd3   :  { %v288_v29 = vpack.c.bf16 %v261_v28, %v260_v27  ;;  %v2021_v28 = vor.u32 %v2225_v26, %v2020_v25  ;;  %v1988_v25 = vld [vmem:[%s3412_s6 + $0x20] sm:$0xf]  ;;  %v2217_v26 = vld [vmem:[%s3412_s6 + $0x24] sm:$0xf0] }
  0xd5   :  { %396 = vmatmul.bf16.gmra.mxu1 %v288_v29  ;;  %608 = vmatpush.bf16.msrb.mxu2 %v2021_v28  ;;  %v222_v29 = vpop.f32.mrf.mxu3  ;;  %v1989_v28 = vor.u32 %v2217_v26, %v1988_v25  ;;  %v942_v26 = vld [vmem:[%s3407_s1] sm:$0xff] }
  0xd6   :  { %v197_v30 = vpop.f32.mrf.mxu0 }
  0xd7   :  { %v198_v31 = vadd.f32 %v2492_v46, %v197_v30 }
  0xd9   :  { %v262_v38 = vmax.f32 %v198_v31, 0.0 }
  0xdd   :  { %v224_v37 = vpop.f32.mrf.mxu3 }
  0xde   :  { %v199_v32 = vpop.f32.mrf.mxu0 }
  0xdf   :  { %v200_v33 = vadd.f32 %v2492_v46, %v199_v32 }
  0xe1   :  { %v263_v39 = vmax.f32 %v200_v33, 0.0 }
  0xe3   :  { %v289_v40 = vpack.c.bf16 %v263_v39, %v262_v38  ;;  %v2629_v38 = vld [vmem:[%s3411_s5] ss:$0 sm:$0xff]  ;;  %v2012_v39 = vld [vmem:[%s3412_s6 + $0x50] sm:$0xf] }
  0xe5   :  { %401 = vmatmul.bf16.gmra.mxu1 %v289_v40  ;;  %v2223_v40 = vld [vmem:[%s3412_s6 + $0x54] sm:$0xf0]  ;;  %v227_v50 = vpop.f32.mrf.mxu3 }
  0xe6   :  { %v202_v45 = vpop.f32.mrf.mxu0  ;;  %v2013_v41 = vor.u32 %v2223_v40, %v2012_v39  ;;  %v228_v14 = vadd.f32 %v2492_v46, %v227_v50 }
  0xe7   :  { %v203_v55 = vadd.f32 %v2492_v46, %v202_v45  ;;  %v220_v45 = vadd.f32 %v2492_v46, %v219_v21 }
  0xe8   :  { %609 = vmatpush.bf16.msrb.mxu2 %v2013_v41 }
  0xe9   :  { %v264_v62 = vmax.f32 %v203_v55, 0.0  ;;  %v271_v52 = vmax.f32 %v220_v45, 0.0 }
  0xeb   :  { %v293_v55 = vpack.c.bf16 %v271_v52, %v270_v51 }
  0xed   :  { %v229_v59 = vpop.f32.mrf.mxu3 }
  0xee   :  { %v204_v56 = vpop.f32.mrf.mxu0  ;;  %v230_v15 = vadd.f32 %v2492_v46, %v229_v59 }
  0xef   :  { %v205_v57 = vadd.f32 %v2492_v46, %v204_v56  ;;  %v2004_v56 = vld [vmem:[%s3412_s6 + $0x40] sm:$0xf] }
  0xf0   :  { %v275_v21 = vmax.f32 %v230_v15, 0.0  ;;  %v2236_v15 = vld [vmem:[%s3416_s10 + $0x4] sm:$0xf] }
  0xf1   :  { %v265_v63 = vmax.f32 %v205_v57, 0.0  ;;  %v2221_v57 = vld [vmem:[%s3412_s6 + $0x44] sm:$0xf0] }
  0xf2   :  { %v2005_v58 = vor.u32 %v2221_v57, %v2004_v56 }
  0xf3   :  { %v290_v0 = vpack.c.bf16 %v265_v63, %v264_v62  ;;  %v223_v62 = vadd.f32 %v2492_v46, %v222_v29  ;;  %v225_v63 = vadd.f32 %v2492_v46, %v224_v37 }
  0xf4   :  { %610 = vmatpush.bf16.msrb.mxu2 %v2005_v58 }
  0xf5   :  { %406 = vmatmul.bf16.gmra.mxu1 %v290_v0  ;;  %v272_v3 = vmax.f32 %v223_v62, 0.0  ;;  %v273_v4 = vmax.f32 %v225_v63, 0.0  ;;  %v1972_v62 = vld [vmem:[%s3412_s6] sm:$0xf]  ;;  %v2213_v63 = vld [vmem:[%s3412_s6 + $0x4] sm:$0xf0] }
  0xf6   :  { %v207_v7 = vpop.f32.mrf.mxu0 }
  0xf7   :  { %v208_v18 = vadd.f32 %v2492_v46, %v207_v7  ;;  %v232_v7 = vpop.f32.mrf.mxu3  ;;  %v294_v8 = vpack.c.bf16 %v273_v4, %v272_v3 }
  0xf8   :  { %611 = vmatpush.bf16.msrb.mxu2 %v1997_v11 }
  0xf9   :  { %v266_v22 = vmax.f32 %v208_v18, 0.0 }
  0xfc   :  { %612 = vmatpush.bf16.msrb.mxu2 %v1989_v28 }
  0xfe   :  { %v209_v19 = vpop.f32.mrf.mxu0 }
  0xff   :  { %v210_v20 = vadd.f32 %v2492_v46, %v209_v19  ;;  %v234_v17 = vpop.f32.mrf.mxu3 }
 0x101   :  { %v267_v23 = vmax.f32 %v210_v20, 0.0  ;;  %v274_v20 = vmax.f32 %v228_v14, 0.0 }
 0x103   :  { %v291_v24 = vpack.c.bf16 %v267_v23, %v266_v22 }
 0x105   :  { %411 = vmatmul.bf16.gmra.mxu1 %v291_v24  ;;  %v295_v24 = vpack.c.bf16 %v275_v21, %v274_v20 }
 0x106   :  { %v212_v27 = vpop.f32.mrf.mxu0 }
 0x107   :  { %v213_v30 = vadd.f32 %v2492_v46, %v212_v27  ;;  %v237_v27 = vpop.f32.mrf.mxu3 }
 0x108   :  { %v238_v50 = vadd.f32 %v2492_v46, %v237_v27  ;;  %v943_v27 = vld [vmem:[%s3407_s1 + $0x8] sm:$0xff] }
 0x109   :  { %v268_v33 = vmax.f32 %v213_v30, 0.0 }
 0x10a   :  { %v278_v56 = vmax.f32 %v238_v50, 0.0  ;;  %v946_v50 = vld [vmem:[%s3407_s1 + $0x20] sm:$0xff] }
 0x10e   :  { %v214_v31 = vpop.f32.mrf.mxu0 }
 0x10f   :  { %v215_v32 = vadd.f32 %v2492_v46, %v214_v31  ;;  %v233_v31 = vadd.f32 %v2492_v46, %v232_v7  ;;  %v239_v40 = vpop.f32.mrf.mxu3 }
 0x110   :  { %v240_v51 = vadd.f32 %v2492_v46, %v239_v40 }
 0x111   :  { %v269_v34 = vmax.f32 %v215_v32, 0.0  ;;  %v235_v32 = vadd.f32 %v2492_v46, %v234_v17 }
 0x112   :  { %v377_v35 = vpop.f32.mrf.mxu1  ;;  %v279_v57 = vmax.f32 %v240_v51, 0.0  ;;  %v947_v51 = vld [vmem:[%s3407_s1 + $0x28] sm:$0xff] }
 0x113   :  { %v292_v36 = vpack.c.bf16 %v269_v34, %v268_v33  ;;  %v378_v42 = vadd.f32 %v2629_v38, %v377_v35  ;;  %v277_v37 = vmax.f32 %v235_v32, 0.0 }
 0x115   :  { %416 = vmatmul.bf16.vlgmr.msra.gmra.mxu2 %v292_v36  ;;  %v457_v48 = vmax.f32 %v378_v42, 0.0  ;;  %v276_v36 = vmax.f32 %v233_v31, 0.0 }
 0x117   :  { %v296_v42 = vpack.c.bf16 %v277_v37, %v276_v36 }
 0x11a   :  { %v379_v43 = vpop.f32.mrf.mxu1 }
 0x11b   :  { %v380_v47 = vadd.f32 %v2629_v38, %v379_v43  ;;  %v1980_v43 = vld [vmem:[%s3412_s6 + $0x10] sm:$0xf] }
 0x11c   :  { %v1981_v45 = vor.u32 %v2215_v44, %v1980_v43 }
 0x11d   :  { %v458_v49 = vmax.f32 %v380_v47, 0.0 }
 0x11e   :  { %613 = vmatpush.bf16.msrb.mxu2 %v1981_v45 }
 0x11f   :  { %v2641_v53 = vpack.c.bf16 %v458_v49, %v457_v48  ;;  %v242_v49 = vpop.f32.mrf.mxu3 }
 0x120   :  { %v243_v3 = vadd.f32 %v2492_v46, %v242_v49 }
 0x121   :  { %704 = vmatmul.bf16.vlgmr.msrb.gmra.mxu3 %v2641_v53  ;;  %861 = vmatmul.bf16.vlgmr.msrb.gmra.mxu0 %v2641_v53 }
 0x122   :  { %v382_v54 = vpop.f32.mrf.mxu1  ;;  %v280_v10 = vmax.f32 %v243_v3, 0.0 }
 0x123   :  { %v383_v60 = vadd.f32 %v2629_v38, %v382_v54 }
 0x125   :  { %421 = vmatmul.bf16.gmra.mxu2 %v293_v55  ;;  %v459_v1 = vmax.f32 %v383_v60, 0.0  ;;  %v297_v60 = vpack.c.bf16 %v279_v57, %v278_v56 }
 0x12a   :  { %v384_v61 = vpop.f32.mrf.mxu1 }
 0x12b   :  { %v385_v0 = vadd.f32 %v2629_v38, %v384_v61  ;;  %v244_v61 = vpop.f32.mrf.mxu3 }
 0x12c   :  { %v245_v4 = vadd.f32 %v2492_v46, %v244_v61 }
 0x12d   :  { %v460_v2 = vmax.f32 %v385_v0, 0.0  ;;  %v1973_v0 = vor.u32 %v2213_v63, %v1972_v62  ;;  %v948_v62 = vld [vmem:[%s3407_s1 + $0x30] sm:$0xff]  ;;  %v949_v63 = vld [vmem:[%s3407_s1 + $0x38] sm:$0xff] }
 0x12e   :  { %v281_v11 = vmax.f32 %v245_v4, 0.0 }
 0x12f   :  { %v2655_v5 = vpack.c.bf16 %v460_v2, %v459_v1  ;;  %614 = vmatpush.bf16.msrb.mxu2 %v1973_v0  ;;  %v2787_v0 = vpack.c.bf16 %v949_v63, %v948_v62  ;;  %v2243_v63 = vld [vmem:[%s3417_s11 + $0x28] sm:$0xff] }
 0x130   :  { %v298_v14 = vpack.c.bf16 %v281_v11, %v280_v10  ;;  %v950_v10 = vld [vmem:[%s3407_s1 + $0x40] sm:$0xff]  ;;  %v951_v11 = vld [vmem:[%s3407_s1 + $0x48] sm:$0xff] }
 0x131   :  { %709 = vmatmul.bf16.gmra.mxu3 %v2655_v5  ;;  %866 = vmatmul.bf16.gmra.mxu0 %v2655_v5 }
 0x132   :  { %v387_v6 = vpop.f32.mrf.mxu1 }
 0x133   :  { %v388_v12 = vadd.f32 %v2629_v38, %v387_v6  ;;  %v247_v9 = vpop.f32.mrf.mxu3 }
 0x135   :  { %426 = vmatmul.bf16.gmra.mxu2 %v294_v8  ;;  %v461_v18 = vmax.f32 %v388_v12, 0.0 }
 0x13a   :  { %v389_v13 = vpop.f32.mrf.mxu1 }
 0x13b   :  { %v390_v16 = vadd.f32 %v2629_v38, %v389_v13  ;;  %v249_v20 = vpop.f32.mrf.mxu3 }
 0x13c   :  { %v250_v28 = vadd.f32 %v2492_v46, %v249_v20 }
 0x13d   :  { %v462_v19 = vmax.f32 %v390_v16, 0.0  ;;  %v2070_v16 = vld [vmem:[%s3416_s10 + $0x8] sm:$0xf0] }
 0x13e   :  { %v2073_v17 = vor.u32 %v2236_v15, %v2070_v16 }
 0x13f   :  { %v2669_v22 = vpack.c.bf16 %v462_v19, %v461_v18  ;;  %v2068_v18 = vld [vmem:[%s3416_s10] sm:$0xf]  ;;  %v2237_v19 = vld [vmem:[%s3416_s10 + $0x4] sm:$0xf0] }
 0x140   :  { %1147 = vmatpush.bf16.msra.mxu2 %v2073_v17  ;;  %v2069_v21 = vor.u32 %v2237_v19, %v2068_v18 }
 0x141   :  { %714 = vmatmul.bf16.gmra.mxu3 %v2669_v22  ;;  %871 = vmatmul.bf16.gmra.mxu0 %v2669_v22 }
 0x142   :  { %v392_v23 = vpop.f32.mrf.mxu1  ;;  %1058 = vmatpush.bf16.msrb.mxu1 %v2069_v21 }
 0x143   :  { %v393_v29 = vadd.f32 %v2629_v38, %v392_v23 }
 0x145   :  { %431 = vmatmul.bf16.gmra.mxu2 %v295_v24  ;;  %v463_v34 = vmax.f32 %v393_v29, 0.0  ;;  %v248_v24 = vadd.f32 %v2492_v46, %v247_v9 }
 0x14a   :  { %v394_v30 = vpop.f32.mrf.mxu1 }
 0x14b   :  { %v395_v33 = vadd.f32 %v2629_v38, %v394_v30  ;;  %v2737_v30 = vpack.c.bf16 %v943_v27, %v942_v26 }
 0x14d   :  { %v464_v35 = vmax.f32 %v395_v33, 0.0  ;;  %2074 = vmatmul.msk.bf16.vlgmr.msrb.gmra.mxu1 %vm1002_vm1, %v2737_v30  ;;  %v282_v33 = vmax.f32 %v248_v24, 0.0  ;;  %v953_v24 = vld [vmem:[%s3407_s1 + $0x58] sm:$0xff] }
 0x14f   :  { %v2683_v39 = vpack.c.bf16 %v464_v35, %v463_v34  ;;  %v283_v34 = vmax.f32 %v250_v28, 0.0 }
 0x151   :  { %719 = vmatmul.bf16.gmra.mxu3 %v2683_v39  ;;  %876 = vmatmul.bf16.gmra.mxu0 %v2683_v39  ;;  %v299_v46 = vpack.c.bf16 %v283_v34, %v282_v33 }
 0x152   :  { %v397_v41 = vpop.f32.mrf.mxu1 }
 0x153   :  { %v398_v47 = vadd.f32 %v2629_v38, %v397_v41  ;;  %v944_v41 = vld [vmem:[%s3407_s1 + $0x10] sm:$0xff] }
 0x155   :  { %436 = vmatmul.bf16.gmra.mxu2 %v296_v42  ;;  %v465_v54 = vmax.f32 %v398_v47, 0.0  ;;  %v945_v42 = vld [vmem:[%s3407_s1 + $0x18] sm:$0xff] }
 0x156   :  { %v2753_v44 = vpack.c.bf16 %v945_v42, %v944_v41 }
 0x15a   :  { %v399_v48 = vpop.f32.mrf.mxu1 }
 0x15b   :  { %v400_v52 = vadd.f32 %v2629_v38, %v399_v48 }
 0x15d   :  { %v466_v55 = vmax.f32 %v400_v52, 0.0  ;;  %2075 = vmatmul.msk.bf16.gmra.mxu1 %vm1002_vm1, %v2753_v44  ;;  %v2768_v52 = vpack.c.bf16 %v947_v51, %v946_v50 }
 0x15f   :  { %v2697_v58 = vpack.c.bf16 %v466_v55, %v465_v54 }
 0x161   :  { %724 = vmatmul.bf16.gmra.mxu3 %v2697_v58  ;;  %881 = vmatmul.bf16.gmra.mxu0 %v2697_v58 }
 0x162   :  { %v402_v59 = vpop.f32.mrf.mxu1 }
 0x163   :  { %v403_v1 = vadd.f32 %v2629_v38, %v402_v59 }
 0x165   :  { %441 = vmatmul.bf16.gmra.mxu2 %v297_v60  ;;  %v467_v7 = vmax.f32 %v403_v1, 0.0 }
 0x16a   :  { %v404_v2 = vpop.f32.mrf.mxu1 }
 0x16b   :  { %v405_v6 = vadd.f32 %v2629_v38, %v404_v2 }
 0x16d   :  { %v468_v8 = vmax.f32 %v405_v6, 0.0  ;;  %2076 = vmatmul.msk.bf16.gmra.mxu1 %vm1002_vm1, %v2768_v52 }
 0x16f   :  { %v2711_v12 = vpack.c.bf16 %v468_v8, %v467_v7 }
 0x171   :  { %729 = vmatmul.bf16.gmra.mxu3 %v2711_v12  ;;  %886 = vmatmul.bf16.gmra.mxu0 %v2711_v12 }
 0x172   :  { %v407_v13 = vpop.f32.mrf.mxu1 }
 0x173   :  { %v408_v23 = vadd.f32 %v2629_v38, %v407_v13  ;;  %v2808_v13 = vpack.c.bf16 %v951_v11, %v950_v10 }
 0x175   :  { %446 = vmatmul.bf16.gmra.mxu2 %v298_v14  ;;  %v469_v31 = vmax.f32 %v408_v23, 0.0  ;;  %v952_v23 = vld [vmem:[%s3407_s1 + $0x50] sm:$0xff] }
 0x17a   :  { %v409_v25 = vpop.f32.mrf.mxu1 }
 0x17b   :  { %v410_v29 = vadd.f32 %v2629_v38, %v409_v25  ;;  %v2829_v25 = vpack.c.bf16 %v953_v24, %v952_v23  ;;  %v959_v23 = vld [vmem:[%s3407_s1 + $0x88] sm:$0xff] }
 0x17d   :  { %v470_v32 = vmax.f32 %v410_v29, 0.0  ;;  %2077 = vmatmul.msk.bf16.gmra.mxu1 %vm1002_vm1, %v2787_v0 }
 0x17f   :  { %v2741_v35 = vpack.c.bf16 %v470_v32, %v469_v31 }
 0x181   :  { %734 = vmatmul.bf16.gmra.mxu3 %v2741_v35  ;;  %891 = vmatmul.bf16.gmra.mxu0 %v2741_v35 }
 0x182   :  { %v412_v36 = vpop.f32.mrf.mxu1 }
 0x183   :  { %v413_v37 = vadd.f32 %v2629_v38, %v412_v36 }
 0x185   :  { %451 = vmatmul.bf16.gmra.mxu2 %v299_v46  ;;  %v471_v45 = vmax.f32 %v413_v37, 0.0  ;;  %v954_v46 = vld [vmem:[%s3407_s1 + $0x60] sm:$0xff]  ;;  %v955_v37 = vld [vmem:[%s3407_s1 + $0x68] sm:$0xff] }
 0x186   :  { %v2854_v41 = vpack.c.bf16 %v955_v37, %v954_v46  ;;  %v2238_v46 = vld [vmem:[%s3417_s11] sm:$0xff] }
 0x18a   :  { %v414_v40 = vpop.f32.mrf.mxu1 }
 0x18b   :  { %v415_v43 = vadd.f32 %v2629_v38, %v414_v40 }
 0x18d   :  { %v472_v47 = vmax.f32 %v415_v43, 0.0  ;;  %2078 = vmatmul.msk.bf16.gmra.mxu1 %vm1002_vm1, %v2808_v13 }
 0x18f   :  { %v2757_v48 = vpack.c.bf16 %v472_v47, %v471_v45 }
 0x191   :  { %739 = vmatmul.bf16.gmra.mxu3 %v2757_v48  ;;  %896 = vmatmul.bf16.gmra.mxu0 %v2757_v48 }
 0x195   :  { %615 = vmatmul.bf16.vlgmr.msrb.gmra.mxu2 %v2641_v53 }
 0x198   :  { %v417_v49 = vpop.f32.mrf.mxu2 }
 0x199   :  { %v418_v54 = vadd.f32 %v2629_v38, %v417_v49 }
 0x19b   :  { %v473_v53 = vmax.f32 %v418_v54, 0.0 }
 0x19d   :  { %2079 = vmatmul.msk.bf16.gmra.mxu1 %vm1002_vm1, %v2829_v25 }
 0x19e   :  { %v2836_v28 = vpop.f32.mrf.mxu0 }
 0x1a0   :  { %v419_v55 = vpop.f32.mrf.mxu2 }
 0x1a1   :  { %v420_v56 = vadd.f32 %v2629_v38, %v419_v55  ;;  %v2245_v55 = vld [vmem:[%s3417_s11 + $0x38] sm:$0xff] }
 0x1a2   :  { %1453 = vmatpush.bf16.msra.mxu3 %v2245_v55 }
 0x1a3   :  { %v474_v57 = vmax.f32 %v420_v56, 0.0 }
 0x1a4   :  { %v2774_v59 = vpop.f32.mrf.mxu3 }
 0x1a5   :  { %620 = vmatmul.bf16.gmra.mxu2 %v2655_v5  ;;  %v2777_v60 = vpack.c.bf16 %v474_v57, %v473_v53  ;;  %v2244_v53 = vld [vmem:[%s3417_s11 + $0x30] sm:$0xff]  ;;  %v957_v57 = vld [vmem:[%s3407_s1 + $0x78] sm:$0xff] }
 0x1a6   :  { %v2852_v40 = vpop.f32.mrf.mxu0  ;;  %1454 = vmatpush.bf16.msra.mxu3 %v2244_v53 }
 0x1a7   :  { %744 = vmatmul.bf16.gmra.mxu3 %v2777_v60  ;;  %901 = vmatmul.bf16.gmra.mxu0 %v2777_v60 }
 0x1a8   :  { %v422_v61 = vpop.f32.mrf.mxu2 }
 0x1a9   :  { %v423_v5 = vadd.f32 %v2629_v38, %v422_v61 }
 0x1aa   :  { %1455 = vmatpush.bf16.msra.mxu3 %v2243_v63 }
 0x1ab   :  { %v475_v4 = vmax.f32 %v423_v5, 0.0 }
 0x1ac   :  { %v2789_v1 = vpop.f32.mrf.mxu3 }
 0x1ad   :  { %2080 = vmatmul.msk.bf16.gmra.mxu1 %vm1002_vm1, %v2854_v41 }
 0x1ae   :  { %v2864_v51 = vpop.f32.mrf.mxu0 }
 0x1b0   :  { %v424_v2 = vpop.f32.mrf.mxu2 }
 0x1b1   :  { %v425_v3 = vadd.f32 %v2629_v38, %v424_v2 }
 0x1b3   :  { %v476_v6 = vmax.f32 %v425_v3, 0.0 }
 0x1b4   :  { %v2795_v7 = vpop.f32.mrf.mxu3 }
 0x1b5   :  { %625 = vmatmul.bf16.gmra.mxu2 %v2669_v22  ;;  %v2798_v8 = vpack.c.bf16 %v476_v6, %v475_v4  ;;  %v2242_v6 = vld [vmem:[%s3417_s11 + $0x20] sm:$0xff] }
 0x1b6   :  { %v2892_v5 = vpop.f32.mrf.mxu0  ;;  %1456 = vmatpush.bf16.msra.mxu3 %v2242_v6 }
 0x1b7   :  { %749 = vmatmul.bf16.gmra.mxu3 %v2798_v8  ;;  %906 = vmatmul.bf16.gmra.mxu0 %v2798_v8  ;;  %3420 = vst [vmem:[#allocation5_spill] sm:$0xff] %v2892_v5 }
 0x1b8   :  { %v427_v9 = vpop.f32.mrf.mxu2 }
 0x1b9   :  { %v428_v22 = vadd.f32 %v2629_v38, %v427_v9 }
 0x1bb   :  { %v477_v17 = vmax.f32 %v428_v22, 0.0  ;;  %v2241_v22 = vld [vmem:[%s3417_s11 + $0x18] sm:$0xff] }
 0x1bc   :  { %v2810_v14 = vpop.f32.mrf.mxu3  ;;  %1457 = vmatpush.bf16.msra.mxu3 %v2241_v22 }
 0x1c0   :  { %v429_v15 = vpop.f32.mrf.mxu2 }
 0x1c1   :  { %v430_v16 = vadd.f32 %v2629_v38, %v429_v15 }
 0x1c3   :  { %v478_v18 = vmax.f32 %v430_v16, 0.0 }
 0x1c4   :  { %v2816_v19 = vpop.f32.mrf.mxu3 }
 0x1c5   :  { %630 = vmatmul.bf16.gmra.mxu2 %v2683_v39  ;;  %v2819_v20 = vpack.c.bf16 %v478_v18, %v477_v17  ;;  %v2909_v17 = vpop.f32.mrf.mxu0 }
 0x1c6   :  { %3421 = vst [vmem:[#allocation6_spill] sm:$0xff] %v2909_v17 }
 0x1c7   :  { %754 = vmatmul.bf16.gmra.mxu3 %v2819_v20  ;;  %911 = vmatmul.bf16.gmra.mxu0 %v2819_v20 }
 0x1c8   :  { %v432_v21 = vpop.f32.mrf.mxu2 }
 0x1c9   :  { %v433_v39 = vadd.f32 %v2629_v38, %v432_v21  ;;  %v958_v21 = vld [vmem:[%s3407_s1 + $0x80] sm:$0xff] }
 0x1ca   :  { %v1060_v18 = vpop.f32.mrf.mxu1  ;;  %v2920_v24 = vpack.c.bf16 %v959_v23, %v958_v21  ;;  %v962_v23 = vld [vmem:[%s3407_s1 + $0xa0] sm:$0xff] }
 0x1cb   :  { %v479_v31 = vmax.f32 %v433_v39, 0.0  ;;  %v2239_v39 = vld [vmem:[%s3417_s11 + $0x8] sm:$0xff] }
 0x1cc   :  { %v2831_v26 = vpop.f32.mrf.mxu3 }
 0x1cd   :  { %v2934_v37 = vpop.f32.mrf.mxu0 }
 0x1ce   :  { %3422 = vst [vmem:[#allocation7_spill] sm:$0xff] %v2934_v37 }
 0x1d0   :  { %v434_v27 = vpop.f32.mrf.mxu2 }
 0x1d1   :  { %v435_v29 = vadd.f32 %v2629_v38, %v434_v27 }
 0x1d3   :  { %v480_v32 = vmax.f32 %v435_v29, 0.0 }
 0x1d4   :  { %v2839_v33 = vpop.f32.mrf.mxu3 }
 0x1d5   :  { %635 = vmatmul.bf16.gmra.mxu2 %v2697_v58  ;;  %v2842_v34 = vpack.c.bf16 %v480_v32, %v479_v31 }
 0x1d7   :  { %759 = vmatmul.bf16.gmra.mxu3 %v2842_v34  ;;  %916 = vmatmul.bf16.gmra.mxu0 %v2842_v34 }
 0x1d8   :  { %v437_v36 = vpop.f32.mrf.mxu2 }
 0x1d9   :  { %v438_v42 = vadd.f32 %v2629_v38, %v437_v36  ;;  %v1062_v36 = vpop.f32.mrf.mxu1 }
 0x1db   :  { %v481_v47 = vmax.f32 %v438_v42, 0.0 }
 0x1dc   :  { %v2856_v58 = vpop.f32.mrf.mxu3 }
 0x1e0   :  { %v439_v43 = vpop.f32.mrf.mxu2 }
 0x1e1   :  { %v440_v45 = vadd.f32 %v2629_v38, %v439_v43  ;;  %v1065_v55 = vpop.f32.mrf.mxu1 }
 0x1e3   :  { %v482_v49 = vmax.f32 %v440_v45, 0.0 }
 0x1e4   :  { %v2862_v50 = vpop.f32.mrf.mxu3 }
 0x1e5   :  { %640 = vmatmul.bf16.gmra.mxu2 %v2711_v12  ;;  %v2867_v54 = vpack.c.bf16 %v482_v49, %v481_v47  ;;  %v956_v12 = vld [vmem:[%s3407_s1 + $0x70] sm:$0xff]  ;;  %v2253_v47 = vld [vmem:[%s3417_s11 + $0x78] sm:$0xff] }
 0x1e6   :  { %v2883_v61 = vpack.c.bf16 %v957_v57, %v956_v12  ;;  %1542 = vmatpush.bf16.msra.mxu0 %v2253_v47  ;;  %v2954_v57 = vpop.f32.mrf.mxu0 }
 0x1e7   :  { %764 = vmatmul.bf16.gmra.mxu3 %v2867_v54  ;;  %921 = vmatmul.bf16.gmra.mxu0 %v2867_v54  ;;  %3423 = vst [vmem:[#allocation8_spill] sm:$0xff] %v2954_v57 }
 0x1e8   :  { %v442_v56 = vpop.f32.mrf.mxu2  ;;  %2081 = vmatmul.msk.bf16.gmra.mxu1 %vm1002_vm1, %v2883_v61 }
 0x1e9   :  { %v443_v2 = vadd.f32 %v2629_v38, %v442_v56  ;;  %v960_v56 = vld [vmem:[%s3407_s1 + $0x90] sm:$0xff] }
 0x1eb   :  { %v483_v9 = vmax.f32 %v443_v2, 0.0 }
 0x1ec   :  { %v2885_v62 = vpop.f32.mrf.mxu3 }
 0x1f0   :  { %v444_v3 = vpop.f32.mrf.mxu2 }
 0x1f1   :  { %v445_v4 = vadd.f32 %v2629_v38, %v444_v3 }
 0x1f3   :  { %v484_v10 = vmax.f32 %v445_v4, 0.0  ;;  %v1067_v4 = vpop.f32.mrf.mxu1 }
 0x1f4   :  { %v2905_v15 = vpop.f32.mrf.mxu3 }
 0x1f5   :  { %645 = vmatmul.bf16.gmra.mxu2 %v2741_v35  ;;  %v2900_v11 = vpack.c.bf16 %v484_v10, %v483_v9  ;;  %v2240_v35 = vld [vmem:[%s3417_s11 + $0x10] sm:$0xff] }
 0x1f6   :  { %1458 = vmatpush.bf16.msra.mxu3 %v2240_v35 }
 0x1f7   :  { %769 = vmatmul.bf16.gmra.mxu3 %v2900_v11  ;;  %926 = vmatmul.bf16.gmra.mxu0 %v2900_v11 }
 0x1f8   :  { %v447_v16 = vpop.f32.mrf.mxu2  ;;  %2082 = vmatmul.msk.bf16.gmra.mxu1 %vm1002_vm1, %v2920_v24 }
 0x1f9   :  { %v448_v27 = vadd.f32 %v2629_v38, %v447_v16  ;;  %v2965_v16 = vpop.f32.mrf.mxu0 }
 0x1fa   :  { %1459 = vmatpush.bf16.msra.mxu3 %v2239_v39  ;;  %3424 = vst [vmem:[#allocation9_spill] sm:$0xff] %v2965_v16  ;;  %v970_v16 = vld [vmem:[%s3407_s1 + $0xe0] sm:$0xff] }
 0x1fb   :  { %v485_v42 = vmax.f32 %v448_v27, 0.0  ;;  %v1070_v21 = vpop.f32.mrf.mxu1 }
 0x1fc   :  { %v2928_v31 = vpop.f32.mrf.mxu3 }
 0x1fe   :  { %1460 = vmatpush.bf16.msra.mxu3 %v2238_v46 }
 0x200   :  { %v449_v29 = vpop.f32.mrf.mxu2 }
 0x201   :  { %v450_v32 = vadd.f32 %v2629_v38, %v449_v29 }
 0x203   :  { %v486_v43 = vmax.f32 %v450_v32, 0.0 }
 0x204   :  { %v2950_v53 = vpop.f32.mrf.mxu3 }
 0x205   :  { %650 = vmatmul.bf16.gmra.mxu2 %v2757_v48  ;;  %v2937_v45 = vpack.c.bf16 %v486_v43, %v485_v42  ;;  %v961_v48 = vld [vmem:[%s3407_s1 + $0x98] sm:$0xff]  ;;  %v1072_v43 = vpop.f32.mrf.mxu1 }
 0x206   :  { %v2952_v12 = vpack.c.bf16 %v961_v48, %v960_v56  ;;  %v2252_v48 = vld [vmem:[%s3417_s11 + $0x70] sm:$0xff] }
 0x207   :  { %774 = vmatmul.bf16.gmra.mxu3 %v2937_v45  ;;  %931 = vmatmul.bf16.gmra.mxu0 %v2937_v45 }
 0x208   :  { %v452_v49 = vpop.f32.mrf.mxu2  ;;  %2083 = vmatmul.msk.bf16.gmra.mxu1 %vm1002_vm1, %v2952_v12  ;;  %1543 = vmatpush.bf16.msra.mxu0 %v2252_v48  ;;  %v967_v48 = vld [vmem:[%s3407_s1 + $0xc8] sm:$0xff] }
 0x209   :  { %v453_v63 = vadd.f32 %v2629_v38, %v452_v49 }
 0x20b   :  { %v487_v6 = vmax.f32 %v453_v63, 0.0 }
 0x20c   :  { %v2960_v10 = vpop.f32.mrf.mxu3 }
 0x210   :  { %v454_v2 = vpop.f32.mrf.mxu2 }
 0x211   :  { %v455_v3 = vadd.f32 %v2629_v38, %v454_v2  ;;  %v2972_v38 = vld [vmem:[%s3413_s7] sm:$0x3]  ;;  %s2305_s7 = smov 128  }
 0x212   :  { %v2981_v39 = vperm.slane %v2972_v38, 0 }
 0x213   :  { %v488_v9 = vmax.f32 %v455_v3, 0.0  ;;  %v1075_v3 = vpop.f32.mrf.mxu1 }
 0x214   :  { %v2987_v29 = vpop.f32.mrf.mxu3 }
 0x215   :  { %655 = vmatmul.bf16.gmra.mxu2 %v2777_v60  ;;  %v2963_v22 = vpack.c.bf16 %v488_v9, %v487_v6  ;;  %v963_v60 = vld [vmem:[%s3407_s1 + $0xa8] sm:$0xff]  ;;  %v964_v6 = vld [vmem:[%s3407_s1 + $0xb0] sm:$0xff] }
 0x216   :  { %v2983_v27 = vpack.c.bf16 %v963_v60, %v962_v23 }
 0x217   :  { %779 = vmatmul.bf16.gmra.mxu3 %v2963_v22  ;;  %936 = vmatmul.bf16.gmra.mxu0 %v2963_v22 }
 0x218   :  { %v616_v35 = vpop.f32.mrf.mxu2  ;;  %2084 = vmatmul.msk.bf16.gmra.mxu1 %vm1002_vm1, %v2983_v27 }
 0x219   :  { %v617_v32 = vadd.f32 %v616_v35, %v2981_v39 }
 0x21b   :  { %v1229_v47 = vmul.f32 %v1060_v18, %v617_v32  ;;  %v965_v18 = vld [vmem:[%s3407_s1 + $0xb8] sm:$0xff]  ;;  %v1077_v60 = vpop.f32.mrf.mxu1 }
 0x21c   :  { %v2995_v2 = vpop.f32.mrf.mxu3 }
 0x220   :  { %v618_v46 = vpop.f32.mrf.mxu2 }
 0x221   :  { %v619_v42 = vadd.f32 %v618_v46, %v2981_v39 }
 0x223   :  { %v1231_v49 = vmul.f32 %v1062_v36, %v619_v42  ;;  %v3003_v36 = vpack.c.bf16 %v965_v18, %v964_v6 }
 0x225   :  { %v1293_v56 = vpack.c.bf16 %v1231_v49, %v1229_v47  ;;  %660 = vmatmul.bf16.gmra.mxu2 %v2798_v8  ;;  %v1080_v49 = vpop.f32.mrf.mxu1 }
 0x227   :  { %1461 = vmatmul.bf16.vlgmr.msra.gmra.mxu3 %v1293_v56  ;;  %v966_v56 = vld [vmem:[%s3407_s1 + $0xc0] sm:$0xff] }
 0x228   :  { %v621_v63 = vpop.f32.mrf.mxu2  ;;  %2085 = vmatmul.msk.bf16.gmra.mxu1 %vm1002_vm1, %v3003_v36  ;;  %v3020_v6 = vpack.c.bf16 %v967_v48, %v966_v56 }
 0x229   :  { %v622_v8 = vadd.f32 %v621_v63, %v2981_v39 }
 0x22a   :  { %v3008_v35 = vpop.f32.mrf.mxu3 }
 0x22b   :  { %v1233_v32 = vmul.f32 %v1065_v55, %v622_v8 }
 0x22d   :  { %v1082_v18 = vpop.f32.mrf.mxu1 }
 0x230   :  { %v623_v9 = vpop.f32.mrf.mxu2 }
 0x231   :  { %v624_v23 = vadd.f32 %v623_v9, %v2981_v39 }
 0x232   :  { %v3018_v63 = vpop.f32.mrf.mxu3 }
 0x233   :  { %v1235_v46 = vmul.f32 %v1067_v4, %v624_v23 }
 0x235   :  { %v1295_v42 = vpack.c.bf16 %v1235_v46, %v1233_v32  ;;  %665 = vmatmul.bf16.gmra.mxu2 %v2819_v20  ;;  %v2251_v46 = vld [vmem:[%s3417_s11 + $0x68] sm:$0xff]  ;;  %v1085_v56 = vpop.f32.mrf.mxu1 }
 0x236   :  { %1544 = vmatpush.bf16.msra.mxu0 %v2251_v46 }
 0x237   :  { %1466 = vmatmul.bf16.gmra.mxu3 %v1295_v42 }
 0x238   :  { %v626_v47 = vpop.f32.mrf.mxu2  ;;  %2086 = vmatmul.msk.bf16.gmra.mxu1 %vm1002_vm1, %v3020_v6 }
 0x239   :  { %v627_v20 = vadd.f32 %v626_v47, %v2981_v39  ;;  %v968_v47 = vld [vmem:[%s3407_s1 + $0xd0] sm:$0xff] }
 0x23a   :  { %v3026_v23 = vpop.f32.mrf.mxu3 }
 0x23b   :  { %v1237_v8 = vmul.f32 %v1070_v21, %v627_v20  ;;  %v969_v21 = vld [vmem:[%s3407_s1 + $0xd8] sm:$0xff] }
 0x240   :  { %v628_v55 = vpop.f32.mrf.mxu2 }
 0x241   :  { %v629_v4 = vadd.f32 %v628_v55, %v2981_v39 }
 0x243   :  { %v1239_v9 = vmul.f32 %v1072_v43, %v629_v4  ;;  %v3038_v43 = vpack.c.bf16 %v969_v21, %v968_v47  ;;  %v1087_v4 = vpop.f32.mrf.mxu1 }
 0x245   :  { %v1297_v32 = vpack.c.bf16 %v1239_v9, %v1237_v8  ;;  %670 = vmatmul.bf16.gmra.mxu2 %v2842_v34  ;;  %v3042_v34 = vpop.f32.mrf.mxu3 }
 0x247   :  { %1471 = vmatmul.bf16.gmra.mxu3 %v1297_v32 }
 0x248   :  { %v631_v42 = vpop.f32.mrf.mxu2  ;;  %2087 = vmatmul.msk.bf16.gmra.mxu1 %vm1002_vm1, %v3038_v43 }
 0x249   :  { %v632_v48 = vadd.f32 %v631_v42, %v2981_v39  ;;  %v971_v42 = vld [vmem:[%s3407_s1 + $0xe8] sm:$0xff] }
 0x24b   :  { %v1241_v8 = vmul.f32 %v1075_v3, %v632_v48  ;;  %v1090_v21 = vpop.f32.mrf.mxu1 }
 0x24d   :  { %v3047_v47 = vpop.f32.mrf.mxu3 }
 0x24e   :  { %3425 = vst [vmem:[#allocation10_spill] sm:$0xff] %v3047_v47 }
 0x250   :  { %v633_v20 = vpop.f32.mrf.mxu2 }
 0x251   :  { %v634_v55 = vadd.f32 %v633_v20, %v2981_v39  ;;  %v3055_v20 = vpack.c.bf16 %v971_v42, %v970_v16  ;;  %v2250_v16 = vld [vmem:[%s3417_s11 + $0x60] sm:$0xff] }
 0x252   :  { %1545 = vmatpush.bf16.msra.mxu0 %v2250_v16 }
 0x253   :  { %v1243_v9 = vmul.f32 %v1077_v60, %v634_v55  ;;  %v1092_v48 = vpop.f32.mrf.mxu1 }
 0x255   :  { %v1299_v32 = vpack.c.bf16 %v1243_v9, %v1241_v8  ;;  %675 = vmatmul.bf16.gmra.mxu2 %v2867_v54  ;;  %v3061_v55 = vpop.f32.mrf.mxu3 }
 0x256   :  { %3426 = vst [vmem:[#allocation11_spill] sm:$0xff] %v3061_v55 }
 0x257   :  { %1476 = vmatmul.bf16.gmra.mxu3 %v1299_v32 }
 0x258   :  { %v636_v46 = vpop.f32.mrf.mxu2  ;;  %2088 = vmatmul.msk.bf16.gmra.mxu1 %vm1002_vm1, %v3055_v20 }
 0x259   :  { %v637_v54 = vadd.f32 %v636_v46, %v2981_v39  ;;  %v972_v46 = vld [vmem:[%s3407_s1 + $0xf0] sm:$0xff] }
 0x25b   :  { %v1245_v8 = vmul.f32 %v1080_v49, %v637_v54  ;;  %v973_v49 = vld [vmem:[%s3407_s1 + $0xf8] sm:$0xff]  ;;  %s1902_s1 = sshll.u32 %s3419_s13, 4  ;;  %s1903_s1 = int_to_ptr.hbm [resolvable:$true] %s1902_s1 }
 0x25d   :  { %v3075_v54 = vpop.f32.mrf.mxu3 }
 0x25e   :  { %3427 = vst [vmem:[#allocation12_spill] sm:$0xff] %v3075_v54 }
 0x260   :  { %v638_v3 = vpop.f32.mrf.mxu2 }
 0x261   :  { %v639_v60 = vadd.f32 %v638_v3, %v2981_v39 }
 0x263   :  { %v1247_v9 = vmul.f32 %v1082_v18, %v639_v60  ;;  %v3073_v18 = vpack.c.bf16 %v973_v49, %v972_v46 }
 0x265   :  { %v1301_v32 = vpack.c.bf16 %v1247_v9, %v1245_v8  ;;  %680 = vmatmul.bf16.gmra.mxu2 %v2900_v11  ;;  %v1095_v57 = vpop.f32.mrf.mxu1  ;;  %v3082_v37 = vpop.f32.mrf.mxu3 }
 0x267   :  { %1481 = vmatmul.bf16.gmra.mxu3 %v1301_v32 }
 0x268   :  { %v641_v42 = vpop.f32.mrf.mxu2  ;;  %2089 = vmatmul.msk.bf16.gmra.mxu1 %vm1002_vm1, %v3073_v18 }
 0x269   :  { %v642_v11 = vadd.f32 %v641_v42, %v2981_v39 }
 0x26b   :  { %v1249_v9 = vmul.f32 %v1085_v56, %v642_v11 }
 0x26d   :  { %v1097_v8 = vpop.f32.mrf.mxu1  ;;  %v3085_v55 = vpop.f32.mrf.mxu3 }
 0x270   :  { %v643_v3 = vpop.f32.mrf.mxu2 }
 0x271   :  { %v644_v60 = vadd.f32 %v643_v3, %v2981_v39 }
 0x273   :  { %v1251_v32 = vmul.f32 %v1087_v4, %v644_v60 }
 0x275   :  { %v1303_v16 = vpack.c.bf16 %v1251_v32, %v1249_v9  ;;  %685 = vmatmul.bf16.gmra.mxu2 %v2937_v45  ;;  %v1100_v49 = vpop.f32.mrf.mxu1  ;;  %v2249_v45 = vld [vmem:[%s3417_s11 + $0x58] sm:$0xff]  ;;  %v3092_v11 = vpop.f32.mrf.mxu3 }
 0x276   :  { %1546 = vmatpush.bf16.msra.mxu0 %v2249_v45 }
 0x277   :  { %1486 = vmatmul.bf16.gmra.mxu3 %v1303_v16 }
 0x278   :  { %v646_v46 = vpop.f32.mrf.mxu2 }
 0x279   :  { %v647_v54 = vadd.f32 %v646_v46, %v2981_v39 }
 0x27b   :  { %v1253_v47 = vmul.f32 %v1090_v21, %v647_v54  ;;  %v2261_v54 = vld [vmem:[%s3418_s12 + $0x38] sm:$0xff] }
 0x27c   :  { %1775 = vmatpush.bf16.msra.mxu1 %v2261_v54 }
 0x27d   :  { %v1102_v5 = vpop.f32.mrf.mxu1 }
 0x280   :  { %v648_v17 = vpop.f32.mrf.mxu2 }
 0x281   :  { %v649_v42 = vadd.f32 %v648_v17, %v2981_v39 }
 0x283   :  { %v1255_v3 = vmul.f32 %v1092_v48, %v649_v42 }
 0x285   :  { %v1305_v56 = vpack.c.bf16 %v1255_v3, %v1253_v47  ;;  %690 = vmatmul.bf16.gmra.mxu2 %v2963_v22  ;;  %v1105_v60 = vpop.f32.mrf.mxu1  ;;  %v3096_v47 = vpop.f32.mrf.mxu3 }
 0x287   :  { %1491 = vmatmul.bf16.gmra.mxu3 %v1305_v56 }
 0x288   :  { %v651_v4 = vpop.f32.mrf.mxu2 }
 0x289   :  { %v652_v9 = vadd.f32 %v651_v4, %v2981_v39 }
 0x28b   :  { %v1257_v21 = vmul.f32 %v1095_v57, %v652_v9 }
 0x28d   :  { %v1107_v46 = vpop.f32.mrf.mxu1  ;;  %v3103_v42 = vpop.f32.mrf.mxu3 }
 0x290   :  { %v653_v32 = vpop.f32.mrf.mxu2 }
 0x291   :  { %v654_v17 = vadd.f32 %v653_v32, %v2981_v39 }
 0x293   :  { %v1259_v48 = vmul.f32 %v1097_v8, %v654_v17 }
 0x295   :  { %v1307_v22 = vpack.c.bf16 %v1259_v48, %v1257_v21  ;;  %2090 = vmatmul.msk.bf16.vlgmr.msra.gmra.mxu2 %vm1002_vm1, %v2737_v30  ;;  %v1110_v56 = vpop.f32.mrf.mxu1  ;;  %v2248_v30 = vld [vmem:[%s3417_s11 + $0x50] sm:$0xff]  ;;  %v3112_v17 = vpop.f32.mrf.mxu3 }
 0x296   :  { %1547 = vmatpush.bf16.msra.mxu0 %v2248_v30  ;;  %3428 = vst [vmem:[#allocation13_spill] sm:$0xff] %v3112_v17 }
 0x297   :  { %1496 = vmatmul.bf16.gmra.mxu3 %v1307_v22 }
 0x298   :  { %v656_v16 = vpop.f32.mrf.mxu2 }
 0x299   :  { %v657_v3 = vadd.f32 %v656_v16, %v2981_v39 }
 0x29b   :  { %v1261_v45 = vmul.f32 %v1100_v49, %v657_v3 }
 0x29d   :  { %v1112_v21 = vpop.f32.mrf.mxu1 }
 0x2a0   :  { %v658_v57 = vpop.f32.mrf.mxu2 }
 0x2a1   :  { %v659_v8 = vadd.f32 %v658_v57, %v2981_v39  ;;  %v2260_v57 = vld [vmem:[%s3418_s12 + $0x30] sm:$0xff] }
 0x2a2   :  { %1776 = vmatpush.bf16.msra.mxu1 %v2260_v57 }
 0x2a3   :  { %v1263_v4 = vmul.f32 %v1102_v5, %v659_v8  ;;  %v3116_v5 = vpop.f32.mrf.mxu3 }
 0x2a4   :  { %3429 = vst [vmem:[#allocation14_spill] sm:$0xff] %v3116_v5 }
 0x2a5   :  { %v1309_v9 = vpack.c.bf16 %v1263_v4, %v1261_v45  ;;  %2091 = vmatmul.msk.bf16.gmra.mxu2 %vm1002_vm1, %v2753_v44  ;;  %v3118_v44 = vpop.f32.mrf.mxu0  ;;  %v1115_v8 = vpop.f32.mrf.mxu1 }
 0x2a7   :  { %1501 = vmatmul.bf16.gmra.mxu3 %v1309_v9 }
 0x2a8   :  { %v661_v32 = vpop.f32.mrf.mxu2 }
 0x2a9   :  { %v662_v48 = vadd.f32 %v661_v32, %v2981_v39 }
 0x2ab   :  { %v1265_v54 = vmul.f32 %v1105_v60, %v662_v48  ;;  %v3125_v4 = vpop.f32.mrf.mxu3 }
 0x2ac   :  { %3430 = vst [vmem:[#allocation15_spill] sm:$0xff] %v3125_v4 }
 0x2ad   :  { %v3127_v9 = vpop.f32.mrf.mxu0  ;;  %v1117_v30 = vpop.f32.mrf.mxu1 }
 0x2b0   :  { %v663_v22 = vpop.f32.mrf.mxu2 }
 0x2b1   :  { %v664_v49 = vadd.f32 %v663_v22, %v2981_v39 }
 0x2b3   :  { %v1267_v16 = vmul.f32 %v1107_v46, %v664_v49  ;;  %v2247_v49 = vld [vmem:[%s3417_s11 + $0x48] sm:$0xff] }
 0x2b4   :  { %1548 = vmatpush.bf16.msra.mxu0 %v2247_v49 }
 0x2b5   :  { %v1311_v3 = vpack.c.bf16 %v1267_v16, %v1265_v54  ;;  %2092 = vmatmul.msk.bf16.gmra.mxu2 %vm1002_vm1, %v2768_v52  ;;  %v3136_v54 = vpop.f32.mrf.mxu3  ;;  %v1120_v57 = vpop.f32.mrf.mxu1 }
 0x2b6   :  { %3431 = vst [vmem:[#allocation16_spill] sm:$0xff] %v3136_v54 }
 0x2b7   :  { %1506 = vmatmul.bf16.gmra.mxu3 %v1311_v3  ;;  %v3138_v3 = vpop.f32.mrf.mxu0 }
 0x2b8   :  { %v666_v45 = vpop.f32.mrf.mxu2 }
 0x2b9   :  { %v667_v60 = vadd.f32 %v666_v45, %v2981_v39 }
 0x2bb   :  { %v1269_v48 = vmul.f32 %v1110_v56, %v667_v60 }
 0x2c0   :  { %v668_v46 = vpop.f32.mrf.mxu2 }
 0x2c1   :  { %v669_v32 = vadd.f32 %v668_v46, %v2981_v39 }
 0x2c3   :  { %v1271_v52 = vmul.f32 %v1112_v21, %v669_v32  ;;  %v3141_v21 = vpop.f32.mrf.mxu3 }
 0x2c5   :  { %v1313_v22 = vpack.c.bf16 %v1271_v52, %v1269_v48  ;;  %2093 = vmatmul.msk.bf16.gmra.mxu2 %vm1002_vm1, %v2787_v0  ;;  %v3144_v0 = vpop.f32.mrf.mxu0  ;;  %v1122_v48 = vpop.f32.mrf.mxu1 }
 0x2c7   :  { %1511 = vmatmul.bf16.gmra.mxu3 %v1313_v22  ;;  %v2259_v22 = vld [vmem:[%s3418_s12 + $0x28] sm:$0xff] }
 0x2c8   :  { %v671_v16 = vpop.f32.mrf.mxu2  ;;  %1777 = vmatpush.bf16.msra.mxu1 %v2259_v22 }
 0x2c9   :  { %v672_v45 = vadd.f32 %v671_v16, %v2981_v39 }
 0x2cb   :  { %v1273_v46 = vmul.f32 %v1115_v8, %v672_v45  ;;  %v3151_v16 = vpop.f32.mrf.mxu3 }
 0x2cd   :  { %v3153_v54 = vpop.f32.mrf.mxu0 }
 0x2ce   :  { %3432 = vst [vmem:[#allocation17_spill] sm:$0xff] %v3153_v54 }
 0x2d0   :  { %v673_v56 = vpop.f32.mrf.mxu2 }
 0x2d1   :  { %v674_v60 = vadd.f32 %v673_v56, %v2981_v39  ;;  %v1125_v56 = vpop.f32.mrf.mxu1 }
 0x2d3   :  { %v1275_v32 = vmul.f32 %v1117_v30, %v674_v60 }
 0x2d5   :  { %v1315_v52 = vpack.c.bf16 %v1275_v32, %v1273_v46  ;;  %2094 = vmatmul.msk.bf16.gmra.mxu2 %vm1002_vm1, %v2808_v13  ;;  %v3157_v13 = vpop.f32.mrf.mxu3  ;;  %v3164_v22 = vpop.f32.mrf.mxu0 }
 0x2d6   :  { %3433 = vst [vmem:[#allocation18_spill] sm:$0xff] %v3164_v22 }
 0x2d7   :  { %1516 = vmatmul.bf16.gmra.mxu3 %v1315_v52  ;;  %v2246_v52 = vld [vmem:[%s3417_s11 + $0x40] sm:$0xff] }
 0x2d8   :  { %v676_v49 = vpop.f32.mrf.mxu2  ;;  %1549 = vmatpush.bf16.msra.mxu0 %v2246_v52 }
 0x2d9   :  { %v677_v8 = vadd.f32 %v676_v49, %v2981_v39  ;;  %v1127_v4 = vpop.f32.mrf.mxu1 }
 0x2db   :  { %v1277_v60 = vmul.f32 %v1120_v57, %v677_v8 }
 0x2dd   :  { %v3166_v54 = vpop.f32.mrf.mxu3 }
 0x2e0   :  { %v678_v30 = vpop.f32.mrf.mxu2 }
 0x2e1   :  { %v679_v45 = vadd.f32 %v678_v30, %v2981_v39  ;;  %v3170_v30 = vpop.f32.mrf.mxu0 }
 0x2e2   :  { %3434 = vst [vmem:[#allocation19_spill] sm:$0xff] %v3170_v30 }
 0x2e3   :  { %v1279_v46 = vmul.f32 %v1122_v48, %v679_v45 }
 0x2e5   :  { %v1317_v32 = vpack.c.bf16 %v1279_v46, %v1277_v60  ;;  %2095 = vmatmul.msk.bf16.gmra.mxu2 %vm1002_vm1, %v2829_v25  ;;  %v1130_v25 = vpop.f32.mrf.mxu1 }
 0x2e7   :  { %1521 = vmatmul.bf16.gmra.mxu3 %v1317_v32  ;;  %v2258_v32 = vld [vmem:[%s3418_s12 + $0x20] sm:$0xff] }
 0x2e8   :  { %v681_v49 = vpop.f32.mrf.mxu2  ;;  %1778 = vmatpush.bf16.msra.mxu1 %v2258_v32 }
 0x2e9   :  { %v682_v57 = vadd.f32 %v681_v49, %v2981_v39  ;;  %v3177_v49 = vpop.f32.mrf.mxu3  ;;  %v3179_v22 = vpop.f32.mrf.mxu0 }
 0x2ea   :  { %3435 = vst [vmem:[#allocation20_spill] sm:$0xff] %v3179_v22 }
 0x2eb   :  { %v1281_v45 = vmul.f32 %v1125_v56, %v682_v57 }
 0x2f0   :  { %v683_v48 = vpop.f32.mrf.mxu2 }
 0x2f1   :  { %v684_v8 = vadd.f32 %v683_v48, %v2981_v39  ;;  %v1132_v48 = vpop.f32.mrf.mxu1  ;;  %v3183_v57 = vpop.f32.mrf.mxu3 }
 0x2f3   :  { %v1283_v60 = vmul.f32 %v1127_v4, %v684_v8 }
 0x2f5   :  { %v1319_v46 = vpack.c.bf16 %v1283_v60, %v1281_v45  ;;  %2096 = vmatmul.msk.bf16.gmra.mxu2 %vm1002_vm1, %v2854_v41  ;;  %v3185_v45 = vpop.f32.mrf.mxu0 }
 0x2f7   :  { %1526 = vmatmul.bf16.gmra.mxu3 %v1319_v46 }
 0x2f8   :  { %v686_v52 = vpop.f32.mrf.mxu2 }
 0x2f9   :  { %v687_v30 = vadd.f32 %v686_v52, %v2981_v39  ;;  %v1135_v46 = vpop.f32.mrf.mxu1  ;;  %v3189_v22 = vpop.f32.mrf.mxu3 }
 0x2fb   :  { %v1285_v41 = vmul.f32 %v1130_v25, %v687_v30 }
 0x2fd   :  { %v3191_v5 = vpop.f32.mrf.mxu0 }
 0x300   :  { %v688_v56 = vpop.f32.mrf.mxu2 }
 0x301   :  { %v689_v4 = vadd.f32 %v688_v56, %v2981_v39  ;;  %v1137_v17 = vpop.f32.mrf.mxu1 }
 0x303   :  { %v1287_v8 = vmul.f32 %v1132_v48, %v689_v4  ;;  %v2257_v4 = vld [vmem:[%s3418_s12 + $0x18] sm:$0xff] }
 0x304   :  { %1779 = vmatpush.bf16.msra.mxu1 %v2257_v4 }
 0x305   :  { %v1321_v60 = vpack.c.bf16 %v1287_v8, %v1285_v41  ;;  %2097 = vmatmul.msk.bf16.gmra.mxu2 %vm1002_vm1, %v2883_v61  ;;  %v3200_v41 = vpop.f32.mrf.mxu3  ;;  %v3202_v8 = vpop.f32.mrf.mxu0 }
 0x307   :  { %1531 = vmatmul.bf16.gmra.mxu3 %v1321_v60 }
 0x308   :  { %v691_v32 = vpop.f32.mrf.mxu2 }
 0x309   :  { %v692_v52 = vadd.f32 %v691_v32, %v2981_v39  ;;  %v3205_v32 = vperm.slane %v2972_v38, 1 }
 0x30b   :  { %v1289_v25 = vmul.f32 %v1135_v46, %v692_v52  ;;  %v711_v38 = vadd.f32 %v2795_v7, %v3205_v32  ;;  %v716_v7 = vadd.f32 %v2816_v19, %v3205_v32  ;;  %v723_v19 = vadd.f32 %v2856_v58, %v3205_v32 }
 0x30c   :  { %v726_v58 = vadd.f32 %v2862_v50, %v3205_v32  ;;  %v733_v50 = vadd.f32 %v2928_v31, %v3205_v32  ;;  %v736_v31 = vadd.f32 %v2950_v53, %v3205_v32  ;;  %v743_v53 = vadd.f32 %v2995_v2, %v3205_v32 }
 0x310   :  { %v693_v56 = vpop.f32.mrf.mxu2 }
 0x311   :  { %v694_v30 = vadd.f32 %v693_v56, %v2981_v39  ;;  %v706_v39 = vadd.f32 %v2774_v59, %v3205_v32  ;;  %v713_v59 = vadd.f32 %v2810_v14, %v3205_v32  ;;  %v718_v14 = vadd.f32 %v2831_v26, %v3205_v32 }
 0x313   :  { %v1291_v48 = vmul.f32 %v1137_v17, %v694_v30  ;;  %v708_v17 = vadd.f32 %v2789_v1, %v3205_v32 }
 0x315   :  { %v1323_v61 = vpack.c.bf16 %v1291_v48, %v1289_v25  ;;  %2098 = vmatmul.msk.bf16.gmra.mxu2 %vm1002_vm1, %v2920_v24  ;;  %v3211_v24 = vpop.f32.mrf.mxu0 }
 0x317   :  { %1536 = vmatmul.bf16.gmra.mxu3 %v1323_v61 }
 0x318   :  { %v1149_v60 = vpop.f32.mrf.mxu2 }
 0x319   :  { %v1230_v52 = vmul.f32 %v1149_v60, %v706_v39  ;;  %v2256_v39 = vld [vmem:[%s3418_s12 + $0x10] sm:$0xff] }
 0x31a   :  { %1780 = vmatpush.bf16.msra.mxu1 %v2256_v39 }
 0x31d   :  { %v3215_v48 = vpop.f32.mrf.mxu0 }
 0x320   :  { %v1151_v46 = vpop.f32.mrf.mxu2 }
 0x321   :  { %v1232_v56 = vmul.f32 %v1151_v46, %v708_v17 }
 0x323   :  { %v1294_v30 = vpack.c.bf16 %v1232_v56, %v1230_v52 }
 0x325   :  { %2099 = vmatmul.msk.bf16.gmra.mxu2 %vm1002_vm1, %v2952_v12  ;;  %1550 = vmatmul.bf16.vlgmr.msra.gmra.mxu0 %v1294_v30  ;;  %v3226_v12 = vpop.f32.mrf.mxu0 }
 0x328   :  { %v1154_v25 = vpop.f32.mrf.mxu2 }
 0x329   :  { %v1234_v4 = vmul.f32 %v1154_v25, %v711_v38 }
 0x32d   :  { %v3232_v46 = vpop.f32.mrf.mxu0 }
 0x330   :  { %v1156_v1 = vpop.f32.mrf.mxu2 }
 0x331   :  { %v1236_v61 = vmul.f32 %v1156_v1, %v713_v59  ;;  %v721_v59 = vadd.f32 %v2839_v33, %v3205_v32 }
 0x333   :  { %v1296_v60 = vpack.c.bf16 %v1236_v61, %v1234_v4 }
 0x335   :  { %2100 = vmatmul.msk.bf16.gmra.mxu2 %vm1002_vm1, %v2983_v27  ;;  %1555 = vmatmul.bf16.gmra.mxu0 %v1296_v60  ;;  %v3236_v38 = vpop.f32.mrf.mxu0  ;;  %v2255_v60 = vld [vmem:[%s3418_s12 + $0x8] sm:$0xff] }
 0x336   :  { %1781 = vmatpush.bf16.msra.mxu1 %v2255_v60 }
 0x338   :  { %v1159_v17 = vpop.f32.mrf.mxu2 }
 0x339   :  { %v1238_v56 = vmul.f32 %v1159_v17, %v716_v7  ;;  %v728_v17 = vadd.f32 %v2885_v62, %v3205_v32 }
 0x33d   :  { %v3245_v39 = vpop.f32.mrf.mxu0 }
 0x340   :  { %v1161_v52 = vpop.f32.mrf.mxu2 }
 0x341   :  { %v1240_v30 = vmul.f32 %v1161_v52, %v718_v14 }
 0x343   :  { %v1298_v25 = vpack.c.bf16 %v1240_v30, %v1238_v56 }
 0x345   :  { %2101 = vmatmul.msk.bf16.gmra.mxu2 %vm1002_vm1, %v3003_v36  ;;  %1560 = vmatmul.bf16.gmra.mxu0 %v1298_v25  ;;  %v3249_v33 = vpop.f32.mrf.mxu0  ;;  %v731_v25 = vadd.f32 %v2905_v15, %v3205_v32 }
 0x348   :  { %v1164_v27 = vpop.f32.mrf.mxu2 }
 0x349   :  { %v1242_v1 = vmul.f32 %v1164_v27, %v721_v59 }
 0x350   :  { %v1166_v26 = vpop.f32.mrf.mxu2 }
 0x351   :  { %v1244_v4 = vmul.f32 %v1166_v26, %v723_v19 }
 0x353   :  { %v1300_v61 = vpack.c.bf16 %v1244_v4, %v1242_v1  ;;  %v738_v4 = vadd.f32 %v2960_v10, %v3205_v32 }
 0x355   :  { %2102 = vmatmul.msk.bf16.gmra.mxu2 %vm1002_vm1, %v3020_v6  ;;  %1565 = vmatmul.bf16.gmra.mxu0 %v1300_v61  ;;  %v3257_v6 = vpop.f32.mrf.mxu0 }
 0x358   :  { %v1169_v36 = vpop.f32.mrf.mxu2 }
 0x359   :  { %v1246_v14 = vmul.f32 %v1169_v36, %v726_v58 }
 0x35d   :  { %v3263_v19 = vpop.f32.mrf.mxu0 }
 0x360   :  { %v1171_v7 = vpop.f32.mrf.mxu2 }
 0x361   :  { %v1248_v52 = vmul.f32 %v1171_v7, %v728_v17  ;;  %v741_v7 = vadd.f32 %v2987_v29, %v3205_v32 }
 0x363   :  { %v1302_v56 = vpack.c.bf16 %v1248_v52, %v1246_v14 }
 0x365   :  { %2103 = vmatmul.msk.bf16.gmra.mxu2 %vm1002_vm1, %v3038_v43  ;;  %1570 = vmatmul.bf16.gmra.mxu0 %v1302_v56  ;;  %v2254_v43 = vld [vmem:[%s3418_s12] sm:$0xff]  ;;  %v3270_v15 = vpop.f32.mrf.mxu0 }
 0x366   :  { %1782 = vmatpush.bf16.msra.mxu1 %v2254_v43 }
 0x368   :  { %v1174_v30 = vpop.f32.mrf.mxu2 }
 0x369   :  { %v1250_v59 = vmul.f32 %v1174_v30, %v731_v25 }
 0x370   :  { %v1176_v27 = vpop.f32.mrf.mxu2 }
 0x371   :  { %v1252_v62 = vmul.f32 %v1176_v27, %v733_v50  ;;  %v748_v27 = vadd.f32 %v3018_v63, %v3205_v32 }
 0x373   :  { %v1304_v26 = vpack.c.bf16 %v1252_v62, %v1250_v59 }
 0x375   :  { %2104 = vmatmul.msk.bf16.gmra.mxu2 %vm1002_vm1, %v3055_v20  ;;  %1575 = vmatmul.bf16.gmra.mxu0 %v1304_v26  ;;  %v3278_v20 = vpop.f32.mrf.mxu0 }
 0x378   :  { %v1179_v1 = vpop.f32.mrf.mxu2 }
 0x379   :  { %v1254_v60 = vmul.f32 %v1179_v1, %v736_v31  ;;  %v3296_v31 = vld [vmem:[%s3415_s9] ss:$0 sm:$0xff]  ;;  %s2304_s9 = smov [#allocation2]  }
 0x37a   :  { %v863_v63 = vadd.f32 %v3296_v31, %v2836_v28  ;;  %v3307_v28 = vpop.f32.mrf.mxu3  ;;  %s1900_s27 = sshll.u32 %s2304_s9, 4  ;;  %s1901_s27 = int_to_ptr.vmem [resolvable:$true] %s1900_s27 }
 0x37d   :  { %v3284_v14 = vpop.f32.mrf.mxu0 }
 0x380   :  { %v1181_v61 = vpop.f32.mrf.mxu2 }
 0x381   :  { %v1256_v36 = vmul.f32 %v1181_v61, %v738_v4 }
 0x383   :  { %v1306_v58 = vpack.c.bf16 %v1256_v36, %v1254_v60  ;;  %v865_v60 = vadd.f32 %v3296_v31, %v2852_v40 }
 0x385   :  { %2105 = vmatmul.msk.bf16.gmra.mxu2 %vm1002_vm1, %v3073_v18  ;;  %1580 = vmatmul.bf16.gmra.mxu0 %v1306_v58  ;;  %v3286_v50 = vpop.f32.mrf.mxu0  ;;  %v746_v18 = vadd.f32 %v3008_v35, %v3205_v32  ;;  %v753_v58 = vadd.f32 %v3042_v34, %v3205_v32  ;;  %v868_v34 = vadd.f32 %v3296_v31, %v2864_v51 }
 0x388   :  { %v1184_v17 = vpop.f32.mrf.mxu2 }
 0x389   :  { %v1258_v52 = vmul.f32 %v1184_v17, %v741_v7 }
 0x390   :  { %v1186_v10 = vpop.f32.mrf.mxu2 }
 0x391   :  { %v1260_v56 = vmul.f32 %v1186_v10, %v743_v53 }
 0x393   :  { %v1308_v30 = vpack.c.bf16 %v1260_v56, %v1258_v52 }
 0x395   :  { %1585 = vmatmul.bf16.gmra.mxu0 %v1308_v30 }
 0x398   :  { %v1189_v25 = vpop.f32.mrf.mxu2 }
 0x399   :  { %v1262_v59 = vmul.f32 %v1189_v25, %v746_v18 }
 0x3a0   :  { %v1191_v29 = vpop.f32.mrf.mxu2 }
 0x3a1   :  { %v1264_v62 = vmul.f32 %v1191_v29, %v748_v27  ;;  %v3436_v29 = vld [vmem:[#allocation5_spill] sm:$0xff] }
 0x3a2   :  { %v1551_v2 = vpop.f32.mrf.mxu0 }
 0x3a3   :  { %v1310_v26 = vpack.c.bf16 %v1264_v62, %v1262_v59  ;;  %v1552_v43 = vadd.f32 %v1551_v2, %v3141_v21  ;;  %v751_v21 = vadd.f32 %v3026_v23, %v3205_v32  ;;  %v870_v59 = vadd.f32 %v3296_v31, %v3436_v29  ;;  %v1484_v2 = vpop.f32.mrf.mxu3 }
 0x3a5   :  { %1590 = vmatmul.bf16.gmra.mxu0 %v1310_v26  ;;  %v1631_v61 = vmax.f32 %v1552_v43, 0.0  ;;  %v3437_v26 = vld [vmem:[#allocation10_spill] sm:$0xff] }
 0x3a6   :  { %v756_v43 = vadd.f32 %v3437_v26, %v3205_v32 }
 0x3a7   :  { %v1663_v17 = vmul.f32 %v1631_v61, %v863_v63 }
 0x3a8   :  { %v1194_v1 = vpop.f32.mrf.mxu2 }
 0x3a9   :  { %v1266_v10 = vmul.f32 %v1194_v1, %v751_v21  ;;  %v3438_v1 = vld [vmem:[#allocation11_spill] sm:$0xff] }
 0x3aa   :  { %v1553_v4 = vpop.f32.mrf.mxu0 }
 0x3ab   :  { %v1554_v35 = vadd.f32 %v1553_v4, %v3151_v16  ;;  %v758_v4 = vadd.f32 %v3438_v1, %v3205_v32 }
 0x3ad   :  { %v1632_v36 = vmax.f32 %v1554_v35, 0.0 }
 0x3af   :  { %v1664_v7 = vmul.f32 %v1632_v36, %v865_v60 }
 0x3b0   :  { %v1196_v53 = vpop.f32.mrf.mxu2 }
 0x3b1   :  { %v1695_v52 = vpack.c.bf16 %v1664_v7, %v1663_v17  ;;  %v1268_v56 = vmul.f32 %v1196_v53, %v753_v58  ;;  %v3320_v58 = vpop.f32.mrf.mxu3 }
 0x3b2   :  { %v1556_v16 = vpop.f32.mrf.mxu0 }
 0x3b3   :  { %v1312_v30 = vpack.c.bf16 %v1268_v56, %v1266_v10  ;;  %1783 = vmatmul.bf16.vlgmr.msra.gmra.mxu1 %v1695_v52  ;;  %v1557_v40 = vadd.f32 %v1556_v16, %v3157_v13  ;;  %v3439_v52 = vld [vmem:[#allocation6_spill] sm:$0xff]  ;;  %v3440_v16 = vld [vmem:[#allocation7_spill] sm:$0xff] }
 0x3b4   :  { %v873_v56 = vadd.f32 %v3296_v31, %v3439_v52 }
 0x3b5   :  { %1595 = vmatmul.bf16.gmra.mxu0 %v1312_v30  ;;  %v1633_v23 = vmax.f32 %v1557_v40, 0.0  ;;  %v875_v30 = vadd.f32 %v3296_v31, %v3440_v16 }
 0x3b7   :  { %v1665_v13 = vmul.f32 %v1633_v23, %v868_v34 }
 0x3b8   :  { %v1199_v25 = vpop.f32.mrf.mxu2 }
 0x3b9   :  { %v1270_v63 = vmul.f32 %v1199_v25, %v756_v43  ;;  %v3441_v25 = vld [vmem:[#allocation12_spill] sm:$0xff] }
 0x3ba   :  { %v1558_v18 = vpop.f32.mrf.mxu0 }
 0x3bb   :  { %v1559_v27 = vadd.f32 %v1558_v18, %v3166_v54  ;;  %v761_v18 = vadd.f32 %v3441_v25, %v3205_v32 }
 0x3bd   :  { %v1634_v62 = vmax.f32 %v1559_v27, 0.0 }
 0x3bf   :  { %v1666_v61 = vmul.f32 %v1634_v62, %v870_v59 }
 0x3c0   :  { %v1201_v35 = vpop.f32.mrf.mxu2 }
 0x3c1   :  { %v1272_v60 = vmul.f32 %v1201_v35, %v758_v4  ;;  %v1696_v54 = vpack.c.bf16 %v1666_v61, %v1665_v13 }
 0x3c2   :  { %v1561_v36 = vpop.f32.mrf.mxu0 }
 0x3c3   :  { %v1314_v21 = vpack.c.bf16 %v1272_v60, %v1270_v63  ;;  %1788 = vmatmul.bf16.gmra.mxu1 %v1696_v54  ;;  %v1562_v51 = vadd.f32 %v1561_v36, %v3177_v49  ;;  %v763_v49 = vadd.f32 %v3082_v37, %v3205_v32  ;;  %v3442_v37 = vld [vmem:[#allocation8_spill] sm:$0xff]  ;;  %v3443_v54 = vld [vmem:[#allocation9_spill] sm:$0xff] }
 0x3c4   :  { %v878_v60 = vadd.f32 %v3296_v31, %v3442_v37  ;;  %v880_v36 = vadd.f32 %v3296_v31, %v3443_v54 }
 0x3c5   :  { %1600 = vmatmul.bf16.gmra.mxu0 %v1314_v21  ;;  %v1635_v53 = vmax.f32 %v1562_v51, 0.0  ;;  %v766_v51 = vadd.f32 %v3085_v55, %v3205_v32 }
 0x3c7   :  { %v1667_v23 = vmul.f32 %v1635_v53, %v873_v56 }
 0x3c8   :  { %v1204_v17 = vpop.f32.mrf.mxu2 }
 0x3c9   :  { %v1274_v29 = vmul.f32 %v1204_v17, %v761_v18  ;;  %v768_v17 = vadd.f32 %v3092_v11, %v3205_v32  ;;  %v883_v11 = vadd.f32 %v3296_v31, %v3118_v44 }
 0x3ca   :  { %v1563_v7 = vpop.f32.mrf.mxu0 }
 0x3cb   :  { %v1564_v10 = vadd.f32 %v1563_v7, %v3183_v57  ;;  %v1489_v57 = vpop.f32.mrf.mxu3 }
 0x3cd   :  { %v1636_v40 = vmax.f32 %v1564_v10, 0.0 }
 0x3cf   :  { %v1668_v27 = vmul.f32 %v1636_v40, %v875_v30 }
 0x3d0   :  { %v1206_v34 = vpop.f32.mrf.mxu2 }
 0x3d1   :  { %v1276_v59 = vmul.f32 %v1206_v34, %v763_v49  ;;  %v1697_v62 = vpack.c.bf16 %v1668_v27, %v1667_v23  ;;  %v885_v23 = vadd.f32 %v3296_v31, %v3127_v9  ;;  %v771_v34 = vadd.f32 %v3096_v47, %v3205_v32 }
 0x3d2   :  { %v1566_v26 = vpop.f32.mrf.mxu0 }
 0x3d3   :  { %v1316_v43 = vpack.c.bf16 %v1276_v59, %v1274_v29  ;;  %1793 = vmatmul.bf16.gmra.mxu1 %v1697_v62  ;;  %v1567_v1 = vadd.f32 %v1566_v26, %v3189_v22  ;;  %v1492_v63 = vpop.f32.mrf.mxu3  ;;  %v773_v29 = vadd.f32 %v3103_v42, %v3205_v32  ;;  %v888_v42 = vadd.f32 %v3296_v31, %v3138_v3 }
 0x3d5   :  { %1605 = vmatmul.bf16.gmra.mxu0 %v1316_v43  ;;  %v1637_v61 = vmax.f32 %v1567_v1, 0.0 }
 0x3d7   :  { %v1669_v22 = vmul.f32 %v1637_v61, %v878_v60  ;;  %v890_v60 = vadd.f32 %v3296_v31, %v3144_v0 }
 0x3d8   :  { %v1209_v4 = vpop.f32.mrf.mxu2 }
 0x3d9   :  { %v1278_v10 = vmul.f32 %v1209_v4, %v766_v51  ;;  %v3445_v51 = vld [vmem:[#allocation14_spill] sm:$0xff] }
 0x3da   :  { %v1568_v13 = vpop.f32.mrf.mxu0 }
 0x3db   :  { %v1569_v35 = vadd.f32 %v1568_v13, %v3200_v41  ;;  %v1494_v30 = vpop.f32.mrf.mxu3 }
 0x3dd   :  { %v1638_v21 = vmax.f32 %v1569_v35, 0.0 }
 0x3df   :  { %v1670_v7 = vmul.f32 %v1638_v21, %v880_v36  ;;  %v3444_v36 = vld [vmem:[#allocation13_spill] sm:$0xff] }
 0x3e0   :  { %v1211_v53 = vpop.f32.mrf.mxu2  ;;  %v776_v21 = vadd.f32 %v3444_v36, %v3205_v32 }
 0x3e1   :  { %v1280_v52 = vmul.f32 %v1211_v53, %v768_v17  ;;  %v1698_v41 = vpack.c.bf16 %v1670_v7, %v1669_v22  ;;  %v778_v17 = vadd.f32 %v3445_v51, %v3205_v32 }
 0x3e2   :  { %v1571_v56 = vpop.f32.mrf.mxu0 }
 0x3e3   :  { %v1318_v16 = vpack.c.bf16 %v1280_v52, %v1278_v10  ;;  %1798 = vmatmul.bf16.gmra.mxu1 %v1698_v41  ;;  %v1572_v40 = vadd.f32 %v1571_v56, %v3307_v28  ;;  %v1497_v28 = vpop.f32.mrf.mxu3 }
 0x3e5   :  { %1610 = vmatmul.bf16.gmra.mxu0 %v1318_v16  ;;  %v1639_v49 = vmax.f32 %v1572_v40, 0.0 }
 0x3e7   :  { %v1671_v59 = vmul.f32 %v1639_v49, %v883_v11 }
 0x3e8   :  { %v1214_v25 = vpop.f32.mrf.mxu2 }
 0x3e9   :  { %v1282_v43 = vmul.f32 %v1214_v25, %v771_v34  ;;  %v3448_v34 = vld [vmem:[#allocation15_spill] sm:$0xff] }
 0x3ea   :  { %v1573_v18 = vpop.f32.mrf.mxu0 }
 0x3eb   :  { %v1574_v55 = vadd.f32 %v1573_v18, %v1484_v2  ;;  %v1499_v61 = vpop.f32.mrf.mxu3  ;;  %v3446_v18 = vld [vmem:[#allocation17_spill] sm:$0xff] }
 0x3ec   :  { %v893_v49 = vadd.f32 %v3296_v31, %v3446_v18 }
 0x3ed   :  { %v1640_v27 = vmax.f32 %v1574_v55, 0.0  ;;  %v3447_v55 = vld [vmem:[#allocation18_spill] sm:$0xff] }
 0x3ee   :  { %v895_v11 = vadd.f32 %v3296_v31, %v3447_v55 }
 0x3ef   :  { %v1672_v62 = vmul.f32 %v1640_v27, %v885_v23 }
 0x3f0   :  { %v1216_v26 = vpop.f32.mrf.mxu2 }
 0x3f1   :  { %v1284_v1 = vmul.f32 %v1216_v26, %v773_v29  ;;  %v1699_v2 = vpack.c.bf16 %v1672_v62, %v1671_v59  ;;  %v781_v29 = vadd.f32 %v3448_v34, %v3205_v32  ;;  %v3449_v59 = vld [vmem:[#allocation16_spill] sm:$0xff] }
 0x3f2   :  { %v1576_v4 = vpop.f32.mrf.mxu0  ;;  %v783_v62 = vadd.f32 %v3449_v59, %v3205_v32 }
 0x3f3   :  { %v1320_v13 = vpack.c.bf16 %v1284_v1, %v1282_v43  ;;  %1803 = vmatmul.bf16.gmra.mxu1 %v1699_v2  ;;  %v1577_v44 = vadd.f32 %v1576_v4, %v3320_v58  ;;  %v1502_v3 = vpop.f32.mrf.mxu3 }
 0x3f5   :  { %1615 = vmatmul.bf16.gmra.mxu0 %v1320_v13  ;;  %v1641_v47 = vmax.f32 %v1577_v44, 0.0 }
 0x3f7   :  { %v1673_v22 = vmul.f32 %v1641_v47, %v888_v42  ;;  %v3450_v42 = vld [vmem:[#allocation19_spill] sm:$0xff] }
 0x3f8   :  { %v1219_v9 = vpop.f32.mrf.mxu2 }
 0x3f9   :  { %v1286_v53 = vmul.f32 %v1219_v9, %v776_v21 }
 0x3fa   :  { %v1578_v35 = vpop.f32.mrf.mxu0 }
 0x3fb   :  { %v1579_v37 = vadd.f32 %v1578_v35, %v1489_v57  ;;  %v1504_v27 = vpop.f32.mrf.mxu3 }
 0x3fd   :  { %v1642_v54 = vmax.f32 %v1579_v37, 0.0 }
 0x3ff   :  { %v1674_v58 = vmul.f32 %v1642_v54, %v890_v60  ;;  %v898_v60 = vadd.f32 %v3296_v31, %v3450_v42  ;;  %v3451_v54 = vld [vmem:[#allocation20_spill] sm:$0xff] }
 0x400   :  { %v1221_v7 = vpop.f32.mrf.mxu2  ;;  %v900_v32 = vadd.f32 %v3296_v31, %v3451_v54 }
 0x401   :  { %v1288_v10 = vmul.f32 %v1221_v7, %v778_v17  ;;  %v1700_v52 = vpack.c.bf16 %v1674_v58, %v1673_v22 }
 0x402   :  { %v1581_v57 = vpop.f32.mrf.mxu0 }
 0x403   :  { %v1322_v41 = vpack.c.bf16 %v1288_v10, %v1286_v53  ;;  %1808 = vmatmul.bf16.gmra.mxu1 %v1700_v52  ;;  %v1582_v56 = vadd.f32 %v1581_v57, %v1492_v63  ;;  %v1507_v9 = vpop.f32.mrf.mxu3  ;;  %v905_v57 = vadd.f32 %v3296_v31, %v3191_v5  ;;  %v910_v5 = vadd.f32 %v3296_v31, %v3211_v24 }
 0x404   :  { %v915_v24 = vadd.f32 %v3296_v31, %v3226_v12  ;;  %v920_v12 = vadd.f32 %v3296_v31, %v3236_v38  ;;  %v925_v38 = vadd.f32 %v3296_v31, %v3249_v33  ;;  %v930_v33 = vadd.f32 %v3296_v31, %v3263_v19 }
 0x405   :  { %1620 = vmatmul.bf16.gmra.mxu0 %v1322_v41  ;;  %v1643_v40 = vmax.f32 %v1582_v56, 0.0  ;;  %v935_v19 = vadd.f32 %v3296_v31, %v3278_v20  ;;  %v940_v20 = vadd.f32 %v3296_v31, %v3286_v50 }
 0x407   :  { %v1675_v26 = vmul.f32 %v1643_v40, %v893_v49 }
 0x408   :  { %v1224_v0 = vpop.f32.mrf.mxu2 }
 0x409   :  { %v1290_v1 = vmul.f32 %v1224_v0, %v781_v29 }
 0x40a   :  { %v1583_v16 = vpop.f32.mrf.mxu0 }
 0x40b   :  { %v1584_v25 = vadd.f32 %v1583_v16, %v1494_v30  ;;  %v1509_v22 = vpop.f32.mrf.mxu3 }
 0x40d   :  { %v1644_v23 = vmax.f32 %v1584_v25, 0.0 }
 0x40f   :  { %v1676_v63 = vmul.f32 %v1644_v23, %v895_v11 }
 0x410   :  { %v1226_v43 = vpop.f32.mrf.mxu2 }
 0x411   :  { %v1292_v2 = vmul.f32 %v1226_v43, %v783_v62  ;;  %v1701_v30 = vpack.c.bf16 %v1676_v63, %v1675_v26 }
 0x412   :  { %v1586_v4 = vpop.f32.mrf.mxu0 }
 0x413   :  { %v1324_v13 = vpack.c.bf16 %v1292_v2, %v1290_v1  ;;  %1813 = vmatmul.bf16.gmra.mxu1 %v1701_v30  ;;  %v1587_v44 = vadd.f32 %v1586_v4, %v1497_v28  ;;  %v1512_v52 = vpop.f32.mrf.mxu3 }
 0x415   :  { %1625 = vmatmul.bf16.gmra.mxu0 %v1324_v13  ;;  %v1645_v47 = vmax.f32 %v1587_v44, 0.0 }
 0x417   :  { %v1677_v21 = vmul.f32 %v1645_v47, %v898_v60 }
 0x41a   :  { %v1588_v35 = vpop.f32.mrf.mxu0 }
 0x41b   :  { %v1589_v37 = vadd.f32 %v1588_v35, %v1499_v61  ;;  %v903_v61 = vadd.f32 %v3296_v31, %v3185_v45  ;;  %v1514_v18 = vpop.f32.mrf.mxu3  ;;  %v908_v45 = vadd.f32 %v3296_v31, %v3202_v8  ;;  %v913_v8 = vadd.f32 %v3296_v31, %v3215_v48 }
 0x41c   :  { %v918_v48 = vadd.f32 %v3296_v31, %v3232_v46  ;;  %v923_v46 = vadd.f32 %v3296_v31, %v3245_v39  ;;  %v928_v39 = vadd.f32 %v3296_v31, %v3257_v6  ;;  %v933_v6 = vadd.f32 %v3296_v31, %v3270_v15 }
 0x41d   :  { %v1646_v36 = vmax.f32 %v1589_v37, 0.0  ;;  %v938_v15 = vadd.f32 %v3296_v31, %v3284_v14 }
 0x41f   :  { %v1678_v51 = vmul.f32 %v1646_v36, %v900_v32 }
 0x421   :  { %v1702_v17 = vpack.c.bf16 %v1678_v51, %v1677_v21 }
 0x422   :  { %v1591_v58 = vpop.f32.mrf.mxu0 }
 0x423   :  { %1818 = vmatmul.bf16.gmra.mxu1 %v1702_v17  ;;  %v1592_v7 = vadd.f32 %v1591_v58, %v1502_v3  ;;  %v1517_v59 = vpop.f32.mrf.mxu3 }
 0x425   :  { %v1647_v28 = vmax.f32 %v1592_v7, 0.0 }
 0x427   :  { %v1679_v56 = vmul.f32 %v1647_v28, %v903_v61 }
 0x42a   :  { %v1593_v53 = vpop.f32.mrf.mxu0 }
 0x42b   :  { %v1594_v10 = vadd.f32 %v1593_v53, %v1504_v27  ;;  %v1519_v2 = vpop.f32.mrf.mxu3 }
 0x42d   :  { %v1648_v41 = vmax.f32 %v1594_v10, 0.0 }
 0x42f   :  { %v1680_v0 = vmul.f32 %v1648_v41, %v905_v57 }
 0x430   :  { %v1784_v16 = vpop.f32.mrf.mxu1 }
 0x431   :  { %1864 = vst [vmem:[#allocation2] sm:$0xff] %v1784_v16  ;;  %v1703_v40 = vpack.c.bf16 %v1680_v0, %v1679_v56 }
 0x432   :  { %v1596_v25 = vpop.f32.mrf.mxu0 }
 0x433   :  { %1823 = vmatmul.bf16.gmra.mxu1 %v1703_v40  ;;  %v1597_v3 = vadd.f32 %v1596_v25, %v1507_v9  ;;  %v1522_v60 = vpop.f32.mrf.mxu3 }
 0x435   :  { %v1649_v11 = vmax.f32 %v1597_v3, 0.0 }
 0x437   :  { %v1681_v34 = vmul.f32 %v1649_v11, %v908_v45 }
 0x438   :  { %v1786_v49 = vpop.f32.mrf.mxu1 }
 0x439   :  { %1865 = vst [vmem:[#allocation2 + $0x8] sm:$0xff] %v1786_v49 }
 0x43a   :  { %v1598_v55 = vpop.f32.mrf.mxu0 }
 0x43b   :  { %v1599_v23 = vadd.f32 %v1598_v55, %v1509_v22  ;;  %v1524_v22 = vpop.f32.mrf.mxu3 }
 0x43d   :  { %v1650_v27 = vmax.f32 %v1599_v23, 0.0 }
 0x43f   :  { %v1682_v29 = vmul.f32 %v1650_v27, %v910_v5 }
 0x440   :  { %v1789_v62 = vpop.f32.mrf.mxu1 }
 0x441   :  { %1866 = vst [vmem:[#allocation2 + $0x10] sm:$0xff] %v1789_v62  ;;  %v1704_v26 = vpack.c.bf16 %v1682_v29, %v1681_v34 }
 0x442   :  { %v1601_v63 = vpop.f32.mrf.mxu0 }
 0x443   :  { %1828 = vmatmul.bf16.gmra.mxu1 %v1704_v26  ;;  %v1602_v43 = vadd.f32 %v1601_v63, %v1512_v52  ;;  %v1527_v61 = vpop.f32.mrf.mxu3 }
 0x445   :  { %v1651_v4 = vmax.f32 %v1602_v43, 0.0 }
 0x447   :  { %v1683_v9 = vmul.f32 %v1651_v4, %v913_v8 }
 0x448   :  { %v1791_v1 = vpop.f32.mrf.mxu1 }
 0x449   :  { %1867 = vst [vmem:[#allocation2 + $0x18] sm:$0xff] %v1791_v1 }
 0x44a   :  { %v1603_v30 = vpop.f32.mrf.mxu0 }
 0x44b   :  { %v1604_v13 = vadd.f32 %v1603_v30, %v1514_v18  ;;  %v1529_v49 = vpop.f32.mrf.mxu3 }
 0x44d   :  { %v1652_v44 = vmax.f32 %v1604_v13, 0.0 }
 0x44f   :  { %v1684_v35 = vmul.f32 %v1652_v44, %v915_v24 }
 0x450   :  { %v1794_v47 = vpop.f32.mrf.mxu1 }
 0x451   :  { %1868 = vst [vmem:[#allocation2 + $0x20] sm:$0xff] %v1794_v47  ;;  %v1705_v37 = vpack.c.bf16 %v1684_v35, %v1683_v9 }
 0x452   :  { %v1606_v42 = vpop.f32.mrf.mxu0 }
 0x453   :  { %1833 = vmatmul.bf16.gmra.mxu1 %v1705_v37  ;;  %v1607_v54 = vadd.f32 %v1606_v42, %v1517_v59  ;;  %v1532_v34 = vpop.f32.mrf.mxu3 }
 0x455   :  { %v1653_v21 = vmax.f32 %v1607_v54, 0.0 }
 0x457   :  { %v1685_v58 = vmul.f32 %v1653_v21, %v918_v48 }
 0x458   :  { %v1796_v32 = vpop.f32.mrf.mxu1 }
 0x459   :  { %1869 = vst [vmem:[#allocation2 + $0x28] sm:$0xff] %v1796_v32 }
 0x45a   :  { %v1608_v36 = vpop.f32.mrf.mxu0 }
 0x45b   :  { %v1609_v51 = vadd.f32 %v1608_v36, %v1519_v2  ;;  %v1534_v1 = vpop.f32.mrf.mxu3 }
 0x45d   :  { %v1654_v17 = vmax.f32 %v1609_v51, 0.0 }
 0x45f   :  { %v1686_v7 = vmul.f32 %v1654_v17, %v920_v12 }
 0x460   :  { %v1799_v53 = vpop.f32.mrf.mxu1 }
 0x461   :  { %1870 = vst [vmem:[#allocation2 + $0x30] sm:$0xff] %v1799_v53  ;;  %v1706_v28 = vpack.c.bf16 %v1686_v7, %v1685_v58 }
 0x462   :  { %v1611_v10 = vpop.f32.mrf.mxu0 }
 0x463   :  { %1838 = vmatmul.bf16.gmra.mxu1 %v1706_v28  ;;  %v1612_v52 = vadd.f32 %v1611_v10, %v1522_v60  ;;  %v1537_v35 = vpop.f32.mrf.mxu3 }
 0x465   :  { %v1655_v56 = vmax.f32 %v1612_v52, 0.0 }
 0x467   :  { %v1687_v40 = vmul.f32 %v1655_v56, %v923_v46 }
 0x468   :  { %v1801_v57 = vpop.f32.mrf.mxu1 }
 0x469   :  { %1871 = vst [vmem:[#allocation2 + $0x38] sm:$0xff] %v1801_v57 }
 0x46a   :  { %v1613_v41 = vpop.f32.mrf.mxu0 }
 0x46b   :  { %v1614_v0 = vadd.f32 %v1613_v41, %v1524_v22  ;;  %v1539_v32 = vpop.f32.mrf.mxu3 }
 0x46d   :  { %v1656_v16 = vmax.f32 %v1614_v0, 0.0 }
 0x46f   :  { %v1688_v25 = vmul.f32 %v1656_v16, %v925_v38 }
 0x470   :  { %v1804_v18 = vpop.f32.mrf.mxu1 }
 0x471   :  { %1872 = vst [vmem:[#allocation2 + $0x40] sm:$0xff] %v1804_v18  ;;  %v1707_v3 = vpack.c.bf16 %v1688_v25, %v1687_v40 }
 0x472   :  { %v1616_v55 = vpop.f32.mrf.mxu0 }
 0x473   :  { %1843 = vmatmul.bf16.gmra.mxu1 %v1707_v3  ;;  %v1617_v11 = vadd.f32 %v1616_v55, %v1527_v61 }
 0x475   :  { %v1657_v5 = vmax.f32 %v1617_v11, 0.0 }
 0x477   :  { %v1689_v59 = vmul.f32 %v1657_v5, %v928_v39 }
 0x478   :  { %v1806_v23 = vpop.f32.mrf.mxu1 }
 0x479   :  { %1873 = vst [vmem:[#allocation2 + $0x48] sm:$0xff] %v1806_v23 }
 0x47a   :  { %v1618_v45 = vpop.f32.mrf.mxu0 }
 0x47b   :  { %v1619_v27 = vadd.f32 %v1618_v45, %v1529_v49 }
 0x47d   :  { %v1658_v29 = vmax.f32 %v1619_v27, 0.0 }
 0x47f   :  { %v1690_v62 = vmul.f32 %v1658_v29, %v930_v33 }
 0x480   :  { %v1809_v26 = vpop.f32.mrf.mxu1 }
 0x481   :  { %1874 = vst [vmem:[#allocation2 + $0x50] sm:$0xff] %v1809_v26  ;;  %v1708_v63 = vpack.c.bf16 %v1690_v62, %v1689_v59 }
 0x482   :  { %v1621_v43 = vpop.f32.mrf.mxu0 }
 0x483   :  { %1848 = vmatmul.bf16.gmra.mxu1 %v1708_v63  ;;  %v1622_v2 = vadd.f32 %v1621_v43, %v1532_v34 }
 0x485   :  { %v1659_v13 = vmax.f32 %v1622_v2, 0.0 }
 0x487   :  { %v1691_v44 = vmul.f32 %v1659_v13, %v933_v6 }
 0x488   :  { %v1811_v30 = vpop.f32.mrf.mxu1 }
 0x489   :  { %1875 = vst [vmem:[#allocation2 + $0x58] sm:$0xff] %v1811_v30 }
 0x48a   :  { %v1623_v4 = vpop.f32.mrf.mxu0 }
 0x48b   :  { %v1624_v8 = vadd.f32 %v1623_v4, %v1534_v1 }
 0x48d   :  { %v1660_v24 = vmax.f32 %v1624_v8, 0.0 }
 0x48f   :  { %v1692_v9 = vmul.f32 %v1660_v24, %v935_v19 }
 0x490   :  { %v1814_v47 = vpop.f32.mrf.mxu1 }
 0x491   :  { %1876 = vst [vmem:[#allocation2 + $0x60] sm:$0xff] %v1814_v47  ;;  %v1709_v37 = vpack.c.bf16 %v1692_v9, %v1691_v44 }
 0x492   :  { %v1626_v42 = vpop.f32.mrf.mxu0 }
 0x493   :  { %1853 = vmatmul.bf16.gmra.mxu1 %v1709_v37  ;;  %v1627_v60 = vadd.f32 %v1626_v42, %v1537_v35 }
 0x495   :  { %v1661_v21 = vmax.f32 %v1627_v60, 0.0 }
 0x497   :  { %v1693_v12 = vmul.f32 %v1661_v21, %v938_v15 }
 0x498   :  { %v1816_v54 = vpop.f32.mrf.mxu1 }
 0x499   :  { %1877 = vst [vmem:[#allocation2 + $0x68] sm:$0xff] %v1816_v54 }
 0x49a   :  { %v1628_v36 = vpop.f32.mrf.mxu0 }
 0x49b   :  { %v1629_v51 = vadd.f32 %v1628_v36, %v1539_v32 }
 0x49d   :  { %v1662_v48 = vmax.f32 %v1629_v51, 0.0 }
 0x49f   :  { %v1694_v17 = vmul.f32 %v1662_v48, %v940_v20 }
 0x4a0   :  { %v1819_v22 = vpop.f32.mrf.mxu1 }
 0x4a1   :  { %1878 = vst [vmem:[#allocation2 + $0x70] sm:$0xff] %v1819_v22  ;;  %v1710_v58 = vpack.c.bf16 %v1694_v17, %v1693_v12 }
 0x4a3   :  { %1858 = vmatmul.bf16.gmra.mxu1 %v1710_v58 }
 0x4a8   :  { %v1821_v7 = vpop.f32.mrf.mxu1 }
 0x4a9   :  { %1879 = vst [vmem:[#allocation2 + $0x78] sm:$0xff] %v1821_v7 }
 0x4b0   :  { %v1824_v53 = vpop.f32.mrf.mxu1 }
 0x4b1   :  { %1880 = vst [vmem:[#allocation2 + $0x80] sm:$0xff] %v1824_v53 }
 0x4b8   :  { %v1826_v28 = vpop.f32.mrf.mxu1 }
 0x4b9   :  { %1881 = vst [vmem:[#allocation2 + $0x88] sm:$0xff] %v1826_v28 }
 0x4c0   :  { %v1829_v10 = vpop.f32.mrf.mxu1 }
 0x4c1   :  { %1882 = vst [vmem:[#allocation2 + $0x90] sm:$0xff] %v1829_v10 }
 0x4c8   :  { %v1831_v52 = vpop.f32.mrf.mxu1 }
 0x4c9   :  { %1883 = vst [vmem:[#allocation2 + $0x98] sm:$0xff] %v1831_v52 }
 0x4d0   :  { %v1834_v14 = vpop.f32.mrf.mxu1 }
 0x4d1   :  { %1884 = vst [vmem:[#allocation2 + $0xa0] sm:$0xff] %v1834_v14 }
 0x4d8   :  { %v1836_v50 = vpop.f32.mrf.mxu1 }
 0x4d9   :  { %1885 = vst [vmem:[#allocation2 + $0xa8] sm:$0xff] %v1836_v50 }
 0x4e0   :  { %v1839_v31 = vpop.f32.mrf.mxu1 }
 0x4e1   :  { %1886 = vst [vmem:[#allocation2 + $0xb0] sm:$0xff] %v1839_v31 }
 0x4e8   :  { %v1841_v61 = vpop.f32.mrf.mxu1 }
 0x4e9   :  { %1887 = vst [vmem:[#allocation2 + $0xb8] sm:$0xff] %v1841_v61 }
 0x4f0   :  { %v1844_v57 = vpop.f32.mrf.mxu1 }
 0x4f1   :  { %1888 = vst [vmem:[#allocation2 + $0xc0] sm:$0xff] %v1844_v57 }
 0x4f8   :  { %v1846_v41 = vpop.f32.mrf.mxu1 }
 0x4f9   :  { %1889 = vst [vmem:[#allocation2 + $0xc8] sm:$0xff] %v1846_v41 }
 0x500   :  { %v1849_v56 = vpop.f32.mrf.mxu1 }
 0x501   :  { %1890 = vst [vmem:[#allocation2 + $0xd0] sm:$0xff] %v1849_v56 }
 0x508   :  { %v1851_v0 = vpop.f32.mrf.mxu1 }
 0x509   :  { %1891 = vst [vmem:[#allocation2 + $0xd8] sm:$0xff] %v1851_v0 }
 0x510   :  { %v1854_v46 = vpop.f32.mrf.mxu1 }
 0x511   :  { %1892 = vst [vmem:[#allocation2 + $0xe0] sm:$0xff] %v1854_v46 }
 0x518   :  { %v1856_v38 = vpop.f32.mrf.mxu1 }
 0x519   :  { %1893 = vst [vmem:[#allocation2 + $0xe8] sm:$0xff] %v1856_v38 }
 0x520   :  { %v1859_v16 = vpop.f32.mrf.mxu1 }
 0x521   :  { %1894 = vst [vmem:[#allocation2 + $0xf0] sm:$0xff] %v1859_v16 }
 0x528   :  { %v1861_v40 = vpop.f32.mrf.mxu1 }
 0x529   :  { %1895 = vst [vmem:[#allocation2 + $0xf8] sm:$0xff] %v1861_v40 }
 0x52a   :  { %1908 = dma.vmem_to_hbm [thread:$0]  %s1901_s27, 4096, %s1903_s1, [#allocation3], %s2305_s7, %s2305_s7, %s2306_s8  }
 0x52b   :  { %2302 = dma.done.wait [#allocation3], 4096  }
 0x52c   :  { %2303 = vsyncadd [#allocation3], 4294963200 }
 0x52d   :  { %1913 = vsyncpa [#allocation3], 1 }

</bundles_post_ra>
